<compile_context>
chip_gen: v7x
topology: tpu7x:2x2x1
jax: 0.10.0
libtpu: 0.0.40
codegen_flags: <defaults>
</compile_context>

<pallas_src>
import functools

import numpy as np
import jax
import jax.numpy as jnp
from jax import lax
from jax.experimental import pallas as pl
from jax.experimental.pallas import tpu as pltpu

EPS = 1e-16


def _depthconv1d_kernel(x_ref, w1_ref, pp_ref, wo_ref, out_ref, skip_ref,
                        *, kernel_size, dilation, d_bn, nb, T):
    NT = nb * T
    C = w1_ref.shape[0]                                    # d_inside

    x = x_ref[...]                                         # [d_bn, NT] f32
    w1 = w1_ref[...]                                       # bf16 [C, d_bn]
    wo = wo_ref[...]                                       # bf16 [d_bn + d_skip, C]
    pp = pp_ref[...]                                       # f32  [C, 6 + K] (lane-dense)

    alpha1, gamma1, beta1 = pp[:, 0:1], pp[:, 1:2], pp[:, 2:3]
    alpha2, gamma2, beta2 = pp[:, 3:4], pp[:, 4:5], pp[:, 5:6]

    # Row of ones pushes the big GroupNorm channel reductions onto the MXU
    # (K = C, otherwise idle between the two real matmuls); only a tiny [1, T]
    # lane reduce per sample is left for the XLU.
    ones_c = jnp.ones((1, C), dtype=jnp.float32)
    n = float(C * T)

    def group_norm(y, gamma, beta):
        csum = jnp.dot(ones_c, y, preferred_element_type=jnp.float32)      # [1, NT]
        csq = jnp.dot(ones_c, y * y, preferred_element_type=jnp.float32)   # [1, NT]
        pieces = []
        for b in range(nb):                      # per-sample stats via static T-slices
            sl = slice(b * T, (b + 1) * T)
            mean = jnp.sum(csum[:, sl]) / n
            var = jnp.maximum(jnp.sum(csq[:, sl]) / n - mean * mean, 0.0)
            inv = lax.rsqrt(var + EPS)
            scale = gamma * inv                  # [C, 1]
            shift = beta - gamma * (mean * inv)  # [C, 1]
            pieces.append(y[:, sl] * scale + shift)
        return pieces[0] if nb == 1 else jnp.concatenate(pieces, axis=1)

    # --- 1x1 conv: ONE bf16 MXU matmul over the whole batch block (N = nb*T) ---
    y = jnp.dot(w1, x.astype(jnp.bfloat16),
                preferred_element_type=jnp.float32)        # [C, NT] f32

    # --- PReLU + GroupNorm(1 group) ---
    y = jnp.where(y >= 0, y, alpha1 * y)
    y = group_norm(y, gamma1, beta1)

    # --- depthwise dilated conv ('same' padding): XLU rolls + per-sample masks ---
    pad = (kernel_size - 1) * dilation // 2
    # position-within-sample for every flattened lane: tile a (1, T) iota nb times
    tau = jnp.tile(lax.broadcasted_iota(jnp.int32, (1, T), 1), (1, nb))    # [1, NT]
    acc = None
    for k in range(kernel_size):
        s_k = k * dilation - pad
        tap = pp[:, 6 + k:7 + k]                 # [C, 1]
        if s_k == 0:
            term = y * tap                       # center tap: no roll, no mask
        else:
            shifted = pltpu.roll(y, shift=(-s_k) % NT, axis=1)
            valid = (tau + s_k >= 0) & (tau + s_k < T)     # [1, NT] per-sample mask
            term = jnp.where(valid, shifted, 0.0) * tap
        acc = term if acc is None else acc + term          # first tap seeds acc
    y = acc

    # --- PReLU + GroupNorm(1 group) ---
    y = jnp.where(y >= 0, y, alpha2 * y)
    y = group_norm(y, gamma2, beta2)

    # --- fused output+skip 1x1 convs: one MXU pass, sublane-aligned row split ---
    yo = jnp.dot(wo, y.astype(jnp.bfloat16),
                 preferred_element_type=jnp.float32)       # [d_bn + d_skip, NT]
    out_ref[...] = (yo[:d_bn, :] + x).astype(out_ref.dtype)
    skip_ref[...] = yo[d_bn:, :].astype(skip_ref.dtype)


def _vmem_capacity_bytes():
    """Physical VMEM of the local TPU (fallback: v7x's conservative 64 MiB/TC)."""
    try:
        info = pltpu.get_tpu_info()
        for name in ("vmem_capacity_bytes", "vmem_bytes", "vmem_size_bytes"):
            v = getattr(info, name, None)
            if v:
                return int(v)
    except Exception:
        pass
    return 64 * 1024 * 1024


def _pick_block_batch(B, d_bn, d_inside, d_skip, T, budget_bytes):
    """Largest batch block whose per-step working set fits the VMEM budget,
    preferring an even number of grid steps (keeps both v7x TensorCores busy),
    then any multi-step grid, then a single step."""
    def fits(nb):
        nt = nb * T
        io = 2 * 4 * nt * (2 * d_bn + d_skip)              # double-buffered x/out/skip (f32)
        tmp = 4 * nt * (6 * d_inside + (d_bn + d_skip))    # live f32 intermediates
        return io + tmp <= budget_bytes

    divisors = [nb for nb in range(1, B + 1) if B % nb == 0 and fits(nb)]
    if not divisors:
        return 1
    even_grid = [nb for nb in divisors if (B // nb) % 2 == 0]
    multi_grid = [nb for nb in divisors if (B // nb) >= 2]
    for pool in (even_grid, multi_grid, divisors):
        if pool:
            return max(pool)
    return 1


def depth_conv1d(x, params, *, kernel_size, dilation, block_batch=None):
    """x: [B, d_bn, T] float32. Returns (skip [B, d_skip, T], output [B, d_bn, T])."""
    B, d_bn, T = x.shape
    d_inside = params["w1"].shape[0]
    d_skip = params["w_skip"].shape[0]

    assert T % 128 == 0, "pad T to a multiple of 128 before calling"
    assert (kernel_size - 1) * dilation % 2 == 0, "'same' padding needs even (K-1)*dilation"
    # TODO(synk): for production T not a multiple of 128, pad T in the wrapper and
    # exclude the padded region from GroupNorm stats / tap masks.
    # TODO(synk): for very long T (block no longer VMEM-resident on v7x's 64 MiB),
    # add a T grid axis with two-pass GroupNorm stats accumulated in scratch.
    # TODO(synk): if profiling shows HBM-bound on v5e/v6e, move x/out/skip to bf16
    # at the HBM boundary (keep residual add + GroupNorm math in f32 in-kernel).

    # Generation-aware VMEM policy: ~100 MiB limit on 128 MiB parts (v5e/v6e),
    # ~48 MiB within v7x's 64 MiB per-TC VMEM.
    vmem_cap = _vmem_capacity_bytes()
    vmem_limit = (100 * 1024 * 1024 if vmem_cap >= 96 * 1024 * 1024
                  else 48 * 1024 * 1024)
    block_budget = int(vmem_limit * 0.75)

    if block_batch is None:
        block_batch = _pick_block_batch(B, d_bn, d_inside, d_skip, T, block_budget)
    nb = block_batch
    assert B % nb == 0
    grid = (B // nb,)

    # Channel-major, batch-on-lanes layout: the kernel sees x as [d_bn, nb*T] so
    # every 1x1 conv is one matmul with N = nb*T and out/skip stores are lane-dense.
    x_cbt = jnp.transpose(x, (1, 0, 2)).reshape(d_bn, B * T)

    # Weights prepared once host-side: bf16 MXU operands, fused out|skip matrix,
    # one lane-dense packed per-channel parameter tensor [d_inside, 6+K].
    w1 = params["w1"].astype(jnp.bfloat16)                               # [d_inside, d_bn]
    wo = jnp.concatenate([params["w_out"], params["w_skip"]],
                         axis=0).astype(jnp.bfloat16)                    # [d_bn+d_skip, d_inside]
    pp = jnp.concatenate(
        [params["alpha1"], params["gamma1"], params["beta1"],
         params["alpha2"], params["gamma2"], params["beta2"],
         params["w_d"][:, :, 0].T], axis=1).astype(jnp.float32)          # [d_inside, 6+K]

    kernel = functools.partial(_depthconv1d_kernel, kernel_size=kernel_size,
                               dilation=dilation, d_bn=d_bn, nb=nb, T=T)

    out_cbt, skip_cbt = pl.pallas_call(
        kernel,
        out_shape=(jax.ShapeDtypeStruct((d_bn, B * T), x.dtype),
                   jax.ShapeDtypeStruct((d_skip, B * T), x.dtype)),
        grid_spec=pltpu.PrefetchScalarGridSpec(
            num_scalar_prefetch=0,
            grid=grid,
            in_specs=[
                pl.BlockSpec((d_bn, nb * T), lambda i: (0, i)),                # x block
                pl.BlockSpec((d_inside, d_bn), lambda i: (0, 0)),              # w1 (bf16)
                pl.BlockSpec((d_inside, 6 + kernel_size), lambda i: (0, 0)),   # packed params
                pl.BlockSpec((d_bn + d_skip, d_inside), lambda i: (0, 0)),     # fused w_out|w_skip
            ],
            out_specs=[
                pl.BlockSpec((d_bn, nb * T), lambda i: (0, i)),
                pl.BlockSpec((d_skip, nb * T), lambda i: (0, i)),
            ],
        ),
        compiler_params=pltpu.CompilerParams(
            dimension_semantics=("parallel",),
            vmem_limit_bytes=vmem_limit,
        ),
    )(x_cbt, w1, pp, wo)

    out = out_cbt.reshape(d_bn, B, T).transpose(1, 0, 2)
    skip = skip_cbt.reshape(d_skip, B, T).transpose(1, 0, 2)
    return skip, out


def reference(x, p, *, kernel_size, dilation):
    """Pure-JAX (f32) reference of the PyTorch forward."""
    def prelu(y, a):
        return jnp.where(y >= 0, y, a[None, :, :] * y)

    def group_norm(y, g, b):
        mean = jnp.mean(y, axis=(1, 2), keepdims=True)
        var = jnp.mean((y - mean) ** 2, axis=(1, 2), keepdims=True)
        return (y - mean) / jnp.sqrt(var + EPS) * g[None, :, :] + b[None, :, :]

    B, d_bn, T = x.shape
    y = jnp.einsum('oi,bit->bot', p["w1"], x)
    y = prelu(y, p["alpha1"])
    y = group_norm(y, p["gamma1"], p["beta1"])

    pad = (kernel_size - 1) * dilation // 2
    yp = jnp.pad(y, ((0, 0), (0, 0), (pad, pad)))
    acc = jnp.zeros_like(y)
    for k in range(kernel_size):
        acc = acc + yp[:, :, k * dilation:k * dilation + T] * p["w_d"][k][None, :, :]
    y = acc

    y = prelu(y, p["alpha2"])
    y = group_norm(y, p["gamma2"], p["beta2"])
    out = jnp.einsum('oi,bit->bot', p["w_out"], y) + x
    skip = jnp.einsum('oi,bit->bot', p["w_skip"], y)
    return skip, out


if __name__ == "__main__":
    # Small, deterministic config (cfg.AUDIO.FBANK_NUM -> d_skip = 40).
    B, d_bn, T = 4, 32, 128
    d_inside, kernel_size, dilation, d_skip = 128, 3, 2, 40

    key = jax.random.PRNGKey(0)
    ks = jax.random.split(key, 12)
    params = {
        "w1":     0.1 * jax.random.normal(ks[0], (d_inside, d_bn), jnp.float32),
        "alpha1": 0.25 + 0.05 * jax.random.normal(ks[1], (d_inside, 1), jnp.float32),
        "gamma1": 1.0 + 0.1 * jax.random.normal(ks[2], (d_inside, 1), jnp.float32),
        "beta1":  0.1 * jax.random.normal(ks[3], (d_inside, 1), jnp.float32),
        "w_d":    0.1 * jax.random.normal(ks[4], (kernel_size, d_inside, 1), jnp.float32),
        "alpha2": 0.25 + 0.05 * jax.random.normal(ks[5], (d_inside, 1), jnp.float32),
        "gamma2": 1.0 + 0.1 * jax.random.normal(ks[6], (d_inside, 1), jnp.float32),
        "beta2":  0.1 * jax.random.normal(ks[7], (d_inside, 1), jnp.float32),
        "w_out":  0.1 * jax.random.normal(ks[8], (d_bn, d_inside), jnp.float32),
        "w_skip": 0.1 * jax.random.normal(ks[9], (d_skip, d_inside), jnp.float32),
    }
    x = jax.random.normal(ks[10], (B, d_bn, T), jnp.float32)

    skip, out = depth_conv1d(x, params, kernel_size=kernel_size, dilation=dilation)
    jax.block_until_ready((skip, out))

    skip_ref, out_ref = reference(x, params, kernel_size=kernel_size, dilation=dilation)
    np.testing.assert_allclose(np.asarray(skip), np.asarray(skip_ref), rtol=5e-2, atol=5e-2)
    np.testing.assert_allclose(np.asarray(out), np.asarray(out_ref), rtol=5e-2, atol=5e-2)

    print("KERNEL_OK")
</pallas_src>

<mosaic_0001>
module attributes {stable_mosaic.version = 11 : i64} {
  func.func @_depthconv1d_kernel(%arg0: i32, %arg1: memref<32x256xf32, #tpu.memory_space<vmem>>, %arg2: memref<128x32xbf16, #tpu.memory_space<vmem>>, %arg3: memref<128x9xf32, #tpu.memory_space<vmem>>, %arg4: memref<72x128xbf16, #tpu.memory_space<vmem>>, %arg5: memref<32x256xf32, #tpu.memory_space<vmem>>, %arg6: memref<40x256xf32, #tpu.memory_space<vmem>>) attributes {dimension_semantics = [#tpu.dimension_semantics<parallel>], iteration_bounds = array<i64: 2>, scalar_prefetch = 0 : i64, scratch_operands = 0 : i64, tpu.core_type = #tpu.core_type<tc>, window_params = [{transform_indices = @transform_0, window_bounds = array<i64: 32, 256>}, {pipeline_mode = #tpu.pipeline_mode<synchronous>, transform_indices = @transform_1, window_bounds = array<i64: 128, 32>}, {pipeline_mode = #tpu.pipeline_mode<synchronous>, transform_indices = @transform_2, window_bounds = array<i64: 128, 9>}, {pipeline_mode = #tpu.pipeline_mode<synchronous>, transform_indices = @transform_3, window_bounds = array<i64: 72, 128>}, {transform_indices = @transform_4, window_bounds = array<i64: 32, 256>}, {transform_indices = @transform_5, window_bounds = array<i64: 40, 256>}]} {
    %c0 = arith.constant 0 : index
    %c0_0 = arith.constant 0 : index
    %0 = vector.load %arg1[%c0, %c0_0] : memref<32x256xf32, #tpu.memory_space<vmem>>, vector<32x256xf32>
    %c0_1 = arith.constant 0 : index
    %c0_2 = arith.constant 0 : index
    %1 = vector.load %arg2[%c0_1, %c0_2] : memref<128x32xbf16, #tpu.memory_space<vmem>>, vector<128x32xbf16>
    %c0_3 = arith.constant 0 : index
    %c0_4 = arith.constant 0 : index
    %2 = vector.load %arg4[%c0_3, %c0_4] : memref<72x128xbf16, #tpu.memory_space<vmem>>, vector<72x128xbf16>
    %c0_5 = arith.constant 0 : index
    %c0_6 = arith.constant 0 : index
    %3 = vector.load %arg3[%c0_5, %c0_6] : memref<128x9xf32, #tpu.memory_space<vmem>>, vector<128x9xf32>
    %4 = vector.extract_strided_slice %3 {offsets = [0, 0], sizes = [128, 1], strides = [1, 1]} : vector<128x9xf32> to vector<128x1xf32>
    %5 = vector.extract_strided_slice %3 {offsets = [0, 1], sizes = [128, 1], strides = [1, 1]} : vector<128x9xf32> to vector<128x1xf32>
    %6 = vector.extract_strided_slice %3 {offsets = [0, 2], sizes = [128, 1], strides = [1, 1]} : vector<128x9xf32> to vector<128x1xf32>
    %7 = vector.extract_strided_slice %3 {offsets = [0, 3], sizes = [128, 1], strides = [1, 1]} : vector<128x9xf32> to vector<128x1xf32>
    %8 = vector.extract_strided_slice %3 {offsets = [0, 4], sizes = [128, 1], strides = [1, 1]} : vector<128x9xf32> to vector<128x1xf32>
    %9 = vector.extract_strided_slice %3 {offsets = [0, 5], sizes = [128, 1], strides = [1, 1]} : vector<128x9xf32> to vector<128x1xf32>
    %cst = arith.constant 1.000000e+00 : f32
    %10 = vector.broadcast %cst : f32 to vector<1x128xf32>
    %11 = arith.truncf %0 : vector<32x256xf32> to vector<32x256xbf16>
    %cst_7 = arith.constant dense<0.000000e+00> : vector<128x256xf32>
    %12 = tpu.matmul %1, %11, %cst_7 {dimension_numbers = #tpu.dot_dimension_numbers<[1], [0], [0], [1], [0, 0, 1, 1], [], []>} : vector<128x32xbf16>, vector<32x256xbf16>, vector<128x256xf32> -> vector<128x256xf32>
    %cst_8 = arith.constant 0.000000e+00 : f32
    %13 = vector.broadcast %cst_8 : f32 to vector<128x256xf32>
    %14 = arith.cmpf oge, %12, %13 : vector<128x256xf32>
    %15 = vector.broadcast %4 : vector<128x1xf32> to vector<128x256xf32>
    %16 = arith.mulf %15, %12 : vector<128x256xf32>
    %17 = arith.select %14, %12, %16 : vector<128x256xi1>, vector<128x256xf32>
    %cst_9 = arith.constant dense<0.000000e+00> : vector<1x256xf32>
    %18 = tpu.matmul %10, %17, %cst_9 {dimension_numbers = #tpu.dot_dimension_numbers<[1], [0], [0], [1], [0, 0, 1, 1], [], []>} : vector<1x128xf32>, vector<128x256xf32>, vector<1x256xf32> -> vector<1x256xf32>
    %19 = arith.mulf %17, %17 : vector<128x256xf32>
    %cst_10 = arith.constant dense<0.000000e+00> : vector<1x256xf32>
    %20 = tpu.matmul %10, %19, %cst_10 {dimension_numbers = #tpu.dot_dimension_numbers<[1], [0], [0], [1], [0, 0, 1, 1], [], []>} : vector<1x128xf32>, vector<128x256xf32>, vector<1x256xf32> -> vector<1x256xf32>
    %21 = vector.extract_strided_slice %18 {offsets = [0, 0], sizes = [1, 128], strides = [1, 1]} : vector<1x256xf32> to vector<1x128xf32>
    %22 = vector.shape_cast %21 : vector<1x128xf32> to vector<1x1x128xf32>
    %cst_11 = arith.constant dense<0.000000e+00> : vector<1xf32>
    %23 = vector.multi_reduction <add>, %22, %cst_11 [1, 2] : vector<1x1x128xf32> to vector<1xf32>
    %24 = vector.shape_cast %23 : vector<1xf32> to vector<1x1x1xf32>
    %25 = vector.extract %24[0, 0, 0] : f32 from vector<1x1x1xf32>
    %cst_12 = arith.constant 1.638400e+04 : f32
    %26 = arith.divf %25, %cst_12 : f32
    %27 = vector.extract_strided_slice %20 {offsets = [0, 0], sizes = [1, 128], strides = [1, 1]} : vector<1x256xf32> to vector<1x128xf32>
    %28 = vector.shape_cast %27 : vector<1x128xf32> to vector<1x1x128xf32>
    %cst_13 = arith.constant dense<0.000000e+00> : vector<1xf32>
    %29 = vector.multi_reduction <add>, %28, %cst_13 [1, 2] : vector<1x1x128xf32> to vector<1xf32>
    %30 = vector.shape_cast %29 : vector<1xf32> to vector<1x1x1xf32>
    %31 = vector.extract %30[0, 0, 0] : f32 from vector<1x1x1xf32>
    %cst_14 = arith.constant 1.638400e+04 : f32
    %32 = arith.divf %31, %cst_14 : f32
    %33 = arith.mulf %26, %26 : f32
    %34 = arith.subf %32, %33 : f32
    %cst_15 = arith.constant 0.000000e+00 : f32
    %35 = arith.maximumf %34, %cst_15 : f32
    %cst_16 = arith.constant 1.000000e-16 : f32
    %36 = arith.addf %35, %cst_16 : f32
    %37 = math.rsqrt %36 : f32
    %38 = vector.broadcast %37 : f32 to vector<128x1xf32>
    %39 = arith.mulf %5, %38 : vector<128x1xf32>
    %40 = arith.mulf %26, %37 : f32
    %41 = vector.broadcast %40 : f32 to vector<128x1xf32>
    %42 = arith.mulf %5, %41 : vector<128x1xf32>
    %43 = arith.subf %6, %42 : vector<128x1xf32>
    %44 = vector.extract_strided_slice %17 {offsets = [0, 0], sizes = [128, 128], strides = [1, 1]} : vector<128x256xf32> to vector<128x128xf32>
    %45 = vector.broadcast %39 : vector<128x1xf32> to vector<128x128xf32>
    %46 = arith.mulf %44, %45 : vector<128x128xf32>
    %47 = vector.broadcast %43 : vector<128x1xf32> to vector<128x128xf32>
    %48 = arith.addf %46, %47 : vector<128x128xf32>
    %49 = vector.extract_strided_slice %18 {offsets = [0, 128], sizes = [1, 128], strides = [1, 1]} : vector<1x256xf32> to vector<1x128xf32>
    %50 = vector.shape_cast %49 : vector<1x128xf32> to vector<1x1x128xf32>
    %cst_17 = arith.constant dense<0.000000e+00> : vector<1xf32>
    %51 = vector.multi_reduction <add>, %50, %cst_17 [1, 2] : vector<1x1x128xf32> to vector<1xf32>
    %52 = vector.shape_cast %51 : vector<1xf32> to vector<1x1x1xf32>
    %53 = vector.extract %52[0, 0, 0] : f32 from vector<1x1x1xf32>
    %cst_18 = arith.constant 1.638400e+04 : f32
    %54 = arith.divf %53, %cst_18 : f32
    %55 = vector.extract_strided_slice %20 {offsets = [0, 128], sizes = [1, 128], strides = [1, 1]} : vector<1x256xf32> to vector<1x128xf32>
    %56 = vector.shape_cast %55 : vector<1x128xf32> to vector<1x1x128xf32>
    %cst_19 = arith.constant dense<0.000000e+00> : vector<1xf32>
    %57 = vector.multi_reduction <add>, %56, %cst_19 [1, 2] : vector<1x1x128xf32> to vector<1xf32>
    %58 = vector.shape_cast %57 : vector<1xf32> to vector<1x1x1xf32>
    %59 = vector.extract %58[0, 0, 0] : f32 from vector<1x1x1xf32>
    %cst_20 = arith.constant 1.638400e+04 : f32
    %60 = arith.divf %59, %cst_20 : f32
    %61 = arith.mulf %54, %54 : f32
    %62 = arith.subf %60, %61 : f32
    %cst_21 = arith.constant 0.000000e+00 : f32
    %63 = arith.maximumf %62, %cst_21 : f32
    %cst_22 = arith.constant 1.000000e-16 : f32
    %64 = arith.addf %63, %cst_22 : f32
    %65 = math.rsqrt %64 : f32
    %66 = vector.broadcast %65 : f32 to vector<128x1xf32>
    %67 = arith.mulf %5, %66 : vector<128x1xf32>
    %68 = arith.mulf %54, %65 : f32
    %69 = vector.broadcast %68 : f32 to vector<128x1xf32>
    %70 = arith.mulf %5, %69 : vector<128x1xf32>
    %71 = arith.subf %6, %70 : vector<128x1xf32>
    %72 = vector.extract_strided_slice %17 {offsets = [0, 128], sizes = [128, 128], strides = [1, 1]} : vector<128x256xf32> to vector<128x128xf32>
    %73 = vector.broadcast %67 : vector<128x1xf32> to vector<128x128xf32>
    %74 = arith.mulf %72, %73 : vector<128x128xf32>
    %75 = vector.broadcast %71 : vector<128x1xf32> to vector<128x128xf32>
    %76 = arith.addf %74, %75 : vector<128x128xf32>
    %77 = tpu.concatenate %48, %76 in 1 : vector<128x128xf32>, vector<128x128xf32> -> vector<128x256xf32>
    %78 = tpu.iota {dimensions = array<i32: 1>} : vector<1x128xi32>
    %79 = tpu.concatenate %78, %78 in 1 : vector<1x128xi32>, vector<1x128xi32> -> vector<1x256xi32>
    %80 = vector.extract_strided_slice %3 {offsets = [0, 6], sizes = [128, 1], strides = [1, 1]} : vector<128x9xf32> to vector<128x1xf32>
    %c2_i32 = arith.constant 2 : i32
    %81 = tpu.dynamic_rotate %77 by %c2_i32 dim 1 : vector<128x256xf32>, i32 -> vector<128x256xf32>
    %c-2_i32 = arith.constant -2 : i32
    %82 = vector.broadcast %c-2_i32 : i32 to vector<1x256xi32>
    %83 = arith.addi %79, %82 : vector<1x256xi32>
    %c0_i32 = arith.constant 0 : i32
    %84 = vector.broadcast %c0_i32 : i32 to vector<1x256xi32>
    %85 = arith.cmpi sge, %83, %84 : vector<1x256xi32>
    %c-2_i32_23 = arith.constant -2 : i32
    %86 = vector.broadcast %c-2_i32_23 : i32 to vector<1x256xi32>
    %87 = arith.addi %79, %86 : vector<1x256xi32>
    %c128_i32 = arith.constant 128 : i32
    %88 = vector.broadcast %c128_i32 : i32 to vector<1x256xi32>
    %89 = arith.cmpi slt, %87, %88 : vector<1x256xi32>
    %90 = arith.andi %85, %89 : vector<1x256xi1>
    %cst_24 = arith.constant 0.000000e+00 : f32
    %91 = vector.shape_cast %90 : vector<1x256xi1> to vector<1x256xi1>
    %92 = vector.broadcast %91 : vector<1x256xi1> to vector<128x256xi1>
    %93 = vector.broadcast %cst_24 : f32 to vector<128x256xf32>
    %94 = arith.select %92, %81, %93 : vector<128x256xi1>, vector<128x256xf32>
    %95 = vector.broadcast %80 : vector<128x1xf32> to vector<128x256xf32>
    %96 = arith.mulf %94, %95 : vector<128x256xf32>
    %97 = vector.extract_strided_slice %3 {offsets = [0, 7], sizes = [128, 1], strides = [1, 1]} : vector<128x9xf32> to vector<128x1xf32>
    %98 = vector.broadcast %97 : vector<128x1xf32> to vector<128x256xf32>
    %99 = arith.mulf %77, %98 : vector<128x256xf32>
    %100 = arith.addf %96, %99 : vector<128x256xf32>
    %101 = vector.extract_strided_slice %3 {offsets = [0, 8], sizes = [128, 1], strides = [1, 1]} : vector<128x9xf32> to vector<128x1xf32>
    %c254_i32 = arith.constant 254 : i32
    %102 = tpu.dynamic_rotate %77 by %c254_i32 dim 1 : vector<128x256xf32>, i32 -> vector<128x256xf32>
    %c2_i32_25 = arith.constant 2 : i32
    %103 = vector.broadcast %c2_i32_25 : i32 to vector<1x256xi32>
    %104 = arith.addi %79, %103 : vector<1x256xi32>
    %c0_i32_26 = arith.constant 0 : i32
    %105 = vector.broadcast %c0_i32_26 : i32 to vector<1x256xi32>
    %106 = arith.cmpi sge, %104, %105 : vector<1x256xi32>
    %c2_i32_27 = arith.constant 2 : i32
    %107 = vector.broadcast %c2_i32_27 : i32 to vector<1x256xi32>
    %108 = arith.addi %79, %107 : vector<1x256xi32>
    %c128_i32_28 = arith.constant 128 : i32
    %109 = vector.broadcast %c128_i32_28 : i32 to vector<1x256xi32>
    %110 = arith.cmpi slt, %108, %109 : vector<1x256xi32>
    %111 = arith.andi %106, %110 : vector<1x256xi1>
    %cst_29 = arith.constant 0.000000e+00 : f32
    %112 = vector.shape_cast %111 : vector<1x256xi1> to vector<1x256xi1>
    %113 = vector.broadcast %112 : vector<1x256xi1> to vector<128x256xi1>
    %114 = vector.broadcast %cst_29 : f32 to vector<128x256xf32>
    %115 = arith.select %113, %102, %114 : vector<128x256xi1>, vector<128x256xf32>
    %116 = vector.broadcast %101 : vector<128x1xf32> to vector<128x256xf32>
    %117 = arith.mulf %115, %116 : vector<128x256xf32>
    %118 = arith.addf %100, %117 : vector<128x256xf32>
    %cst_30 = arith.constant 0.000000e+00 : f32
    %119 = vector.broadcast %cst_30 : f32 to vector<128x256xf32>
    %120 = arith.cmpf oge, %118, %119 : vector<128x256xf32>
    %121 = vector.broadcast %7 : vector<128x1xf32> to vector<128x256xf32>
    %122 = arith.mulf %121, %118 : vector<128x256xf32>
    %123 = arith.select %120, %118, %122 : vector<128x256xi1>, vector<128x256xf32>
    %cst_31 = arith.constant dense<0.000000e+00> : vector<1x256xf32>
    %124 = tpu.matmul %10, %123, %cst_31 {dimension_numbers = #tpu.dot_dimension_numbers<[1], [0], [0], [1], [0, 0, 1, 1], [], []>} : vector<1x128xf32>, vector<128x256xf32>, vector<1x256xf32> -> vector<1x256xf32>
    %125 = arith.mulf %123, %123 : vector<128x256xf32>
    %cst_32 = arith.constant dense<0.000000e+00> : vector<1x256xf32>
    %126 = tpu.matmul %10, %125, %cst_32 {dimension_numbers = #tpu.dot_dimension_numbers<[1], [0], [0], [1], [0, 0, 1, 1], [], []>} : vector<1x128xf32>, vector<128x256xf32>, vector<1x256xf32> -> vector<1x256xf32>
    %127 = vector.extract_strided_slice %124 {offsets = [0, 0], sizes = [1, 128], strides = [1, 1]} : vector<1x256xf32> to vector<1x128xf32>
    %128 = vector.shape_cast %127 : vector<1x128xf32> to vector<1x1x128xf32>
    %cst_33 = arith.constant dense<0.000000e+00> : vector<1xf32>
    %129 = vector.multi_reduction <add>, %128, %cst_33 [1, 2] : vector<1x1x128xf32> to vector<1xf32>
    %130 = vector.shape_cast %129 : vector<1xf32> to vector<1x1x1xf32>
    %131 = vector.extract %130[0, 0, 0] : f32 from vector<1x1x1xf32>
    %cst_34 = arith.constant 1.638400e+04 : f32
    %132 = arith.divf %131, %cst_34 : f32
    %133 = vector.extract_strided_slice %126 {offsets = [0, 0], sizes = [1, 128], strides = [1, 1]} : vector<1x256xf32> to vector<1x128xf32>
    %134 = vector.shape_cast %133 : vector<1x128xf32> to vector<1x1x128xf32>
    %cst_35 = arith.constant dense<0.000000e+00> : vector<1xf32>
    %135 = vector.multi_reduction <add>, %134, %cst_35 [1, 2] : vector<1x1x128xf32> to vector<1xf32>
    %136 = vector.shape_cast %135 : vector<1xf32> to vector<1x1x1xf32>
    %137 = vector.extract %136[0, 0, 0] : f32 from vector<1x1x1xf32>
    %cst_36 = arith.constant 1.638400e+04 : f32
    %138 = arith.divf %137, %cst_36 : f32
    %139 = arith.mulf %132, %132 : f32
    %140 = arith.subf %138, %139 : f32
    %cst_37 = arith.constant 0.000000e+00 : f32
    %141 = arith.maximumf %140, %cst_37 : f32
    %cst_38 = arith.constant 1.000000e-16 : f32
    %142 = arith.addf %141, %cst_38 : f32
    %143 = math.rsqrt %142 : f32
    %144 = vector.broadcast %143 : f32 to vector<128x1xf32>
    %145 = arith.mulf %8, %144 : vector<128x1xf32>
    %146 = arith.mulf %132, %143 : f32
    %147 = vector.broadcast %146 : f32 to vector<128x1xf32>
    %148 = arith.mulf %8, %147 : vector<128x1xf32>
    %149 = arith.subf %9, %148 : vector<128x1xf32>
    %150 = vector.extract_strided_slice %123 {offsets = [0, 0], sizes = [128, 128], strides = [1, 1]} : vector<128x256xf32> to vector<128x128xf32>
    %151 = vector.broadcast %145 : vector<128x1xf32> to vector<128x128xf32>
    %152 = arith.mulf %150, %151 : vector<128x128xf32>
    %153 = vector.broadcast %149 : vector<128x1xf32> to vector<128x128xf32>
    %154 = arith.addf %152, %153 : vector<128x128xf32>
    %155 = vector.extract_strided_slice %124 {offsets = [0, 128], sizes = [1, 128], strides = [1, 1]} : vector<1x256xf32> to vector<1x128xf32>
    %156 = vector.shape_cast %155 : vector<1x128xf32> to vector<1x1x128xf32>
    %cst_39 = arith.constant dense<0.000000e+00> : vector<1xf32>
    %157 = vector.multi_reduction <add>, %156, %cst_39 [1, 2] : vector<1x1x128xf32> to vector<1xf32>
    %158 = vector.shape_cast %157 : vector<1xf32> to vector<1x1x1xf32>
    %159 = vector.extract %158[0, 0, 0] : f32 from vector<1x1x1xf32>
    %cst_40 = arith.constant 1.638400e+04 : f32
    %160 = arith.divf %159, %cst_40 : f32
    %161 = vector.extract_strided_slice %126 {offsets = [0, 128], sizes = [1, 128], strides = [1, 1]} : vector<1x256xf32> to vector<1x128xf32>
    %162 = vector.shape_cast %161 : vector<1x128xf32> to vector<1x1x128xf32>
    %cst_41 = arith.constant dense<0.000000e+00> : vector<1xf32>
    %163 = vector.multi_reduction <add>, %162, %cst_41 [1, 2] : vector<1x1x128xf32> to vector<1xf32>
    %164 = vector.shape_cast %163 : vector<1xf32> to vector<1x1x1xf32>
    %165 = vector.extract %164[0, 0, 0] : f32 from vector<1x1x1xf32>
    %cst_42 = arith.constant 1.638400e+04 : f32
    %166 = arith.divf %165, %cst_42 : f32
    %167 = arith.mulf %160, %160 : f32
    %168 = arith.subf %166, %167 : f32
    %cst_43 = arith.constant 0.000000e+00 : f32
    %169 = arith.maximumf %168, %cst_43 : f32
    %cst_44 = arith.constant 1.000000e-16 : f32
    %170 = arith.addf %169, %cst_44 : f32
    %171 = math.rsqrt %170 : f32
    %172 = vector.broadcast %171 : f32 to vector<128x1xf32>
    %173 = arith.mulf %8, %172 : vector<128x1xf32>
    %174 = arith.mulf %160, %171 : f32
    %175 = vector.broadcast %174 : f32 to vector<128x1xf32>
    %176 = arith.mulf %8, %175 : vector<128x1xf32>
    %177 = arith.subf %9, %176 : vector<128x1xf32>
    %178 = vector.extract_strided_slice %123 {offsets = [0, 128], sizes = [128, 128], strides = [1, 1]} : vector<128x256xf32> to vector<128x128xf32>
    %179 = vector.broadcast %173 : vector<128x1xf32> to vector<128x128xf32>
    %180 = arith.mulf %178, %179 : vector<128x128xf32>
    %181 = vector.broadcast %177 : vector<128x1xf32> to vector<128x128xf32>
    %182 = arith.addf %180, %181 : vector<128x128xf32>
    %183 = tpu.concatenate %154, %182 in 1 : vector<128x128xf32>, vector<128x128xf32> -> vector<128x256xf32>
    %184 = arith.truncf %183 : vector<128x256xf32> to vector<128x256xbf16>
    %cst_45 = arith.constant dense<0.000000e+00> : vector<72x256xf32>
    %185 = tpu.matmul %2, %184, %cst_45 {dimension_numbers = #tpu.dot_dimension_numbers<[1], [0], [0], [1], [0, 0, 1, 1], [], []>} : vector<72x128xbf16>, vector<128x256xbf16>, vector<72x256xf32> -> vector<72x256xf32>
    %186 = vector.extract_strided_slice %185 {offsets = [0, 0], sizes = [32, 256], strides = [1, 1]} : vector<72x256xf32> to vector<32x256xf32>
    %187 = arith.addf %186, %0 : vector<32x256xf32>
    %c0_46 = arith.constant 0 : index
    %c0_47 = arith.constant 0 : index
    %188 = vector.load %arg5[%c0_46, %c0_47] : memref<32x256xf32, #tpu.memory_space<vmem>>, vector<32x256xf32>
    tpu.vector_store %arg5[%c0_46, %c0_47], %187 {strides = array<i32>} : memref<32x256xf32, #tpu.memory_space<vmem>>, vector<32x256xf32>,
    %189 = vector.extract_strided_slice %185 {offsets = [32, 0], sizes = [40, 256], strides = [1, 1]} : vector<72x256xf32> to vector<40x256xf32>
    %c0_48 = arith.constant 0 : index
    %c0_49 = arith.constant 0 : index
    %190 = vector.load %arg6[%c0_48, %c0_49] : memref<40x256xf32, #tpu.memory_space<vmem>>, vector<40x256xf32>
    tpu.vector_store %arg6[%c0_48, %c0_49], %189 {strides = array<i32>} : memref<40x256xf32, #tpu.memory_space<vmem>>, vector<40x256xf32>,
    return
  }
  func.func @transform_0(%arg0: i32) -> (i32, i32) {
    %c0_i32 = arith.constant 0 : i32
    %c0_i32_0 = arith.constant 0 : i32
    return %c0_i32, %arg0 : i32, i32
  }
  func.func @transform_1(%arg0: i32) -> (i32, i32) {
    %c0_i32 = arith.constant 0 : i32
    %c0_i32_0 = arith.constant 0 : i32
    %c0_i32_1 = arith.constant 0 : i32
    return %c0_i32, %c0_i32_0 : i32, i32
  }
  func.func @transform_2(%arg0: i32) -> (i32, i32) {
    %c0_i32 = arith.constant 0 : i32
    %c0_i32_0 = arith.constant 0 : i32
    %c0_i32_1 = arith.constant 0 : i32
    return %c0_i32, %c0_i32_0 : i32, i32
  }
  func.func @transform_3(%arg0: i32) -> (i32, i32) {
    %c0_i32 = arith.constant 0 : i32
    %c0_i32_0 = arith.constant 0 : i32
    %c0_i32_1 = arith.constant 0 : i32
    return %c0_i32, %c0_i32_0 : i32, i32
  }
  func.func @transform_4(%arg0: i32) -> (i32, i32) {
    %c0_i32 = arith.constant 0 : i32
    %c0_i32_0 = arith.constant 0 : i32
    return %c0_i32, %arg0 : i32, i32
  }
  func.func @transform_5(%arg0: i32) -> (i32, i32) {
    %c0_i32 = arith.constant 0 : i32
    %c0_i32_0 = arith.constant 0 : i32
    return %c0_i32, %arg0 : i32, i32
  }
}

</mosaic_0001>

<bundles_post_ra>
// kernel: tpu_custom_call.1
= control target key start
LH: loop header
LB: loop body
LE: loop exit
PB: predicated region body
PF: predicated region fallthrough
CT: control target
= control target key end

     0   :  { %11 = vsyncpa [#allocation4], 0  ;;  %s6749_s0 = inlined_call_operand.vmem [shape: f32[32,512], index: 0, kind: input, shape index: {}]   ;;  %s6750_s1 = inlined_call_operand.vmem [shape: bf16[128,32], index: 1, kind: input, shape index: {}]   ;;  %s6751_s2 = inlined_call_operand.vmem [shape: f32[128,9], index: 2, kind: input, shape index: {}]   ;;  %s6752_s3 = inlined_call_operand.vmem [shape: bf16[72,128], index: 3, kind: input, shape index: {}]   ;;  %s6753_s4 = inlined_call_operand.hbm [shape: f32[32,512], index: 4, kind: output, shape index: {0}]   ;;  %s6754_s5 = inlined_call_operand.hbm [shape: f32[40,512], index: 5, kind: output, shape index: {1}]  }
   0x1   :  { %13 = vsyncpa [#allocation4 + $0x1], 0 }
   0x2   :  { %14 = vsyncpa [#allocation6], 0 }
   0x3   :  { %16 = vsyncpa [#allocation6 + $0x1], 0  ;;  %s3978_s18 = smov 0   ;;  %s3980_s19 = smov 0  }
   0x4   :  { %s3982_s20 = smov 0   ;;  %s3984_s21 = smov 0  }
   0x5 LB: > { %s3465_s22 = sadd.s32 4294967295, %s3926_s21   ;;  %s3466_s23 = sadd.s32 4294967294, %s3926_s21   ;;  %s3926_s21 = sphi %s3984_s21, %s7199_s21   ;;  %s3922_s20 = sphi %s3982_s20, %s7198_s20   ;;  %s3918_s19 = sphi %s3980_s19, %s7197_s19   ;;  %s3914_s18 = sphi %s3978_s18, %s7196_s18  }
   0x6   : > { %s4001_s24 = sadd.s32 1, %s3926_s21   ;;  %s29_s25 = sadd.s32 1, %s3922_s20 }
   0x7   : > { %s26_s26 = ssub.s32 %s3926_s21, %s4001_s24  ;;  %p36_p0 = scmp.ne.s32.totalorder %s3922_s20, %s3918_s19 }
   0x8   : > { %p27_p1 = scmp.eq.s32.totalorder %s26_s26, 0  ;;  %p37_p2 = scmp.eq.s32.totalorder %s3926_s21, 0 }
   0x9   : > { %p129_p3 = scmp.eq.s32.totalorder %s3465_s22, 1  ;;  %p134_p4 = scmp.ne.s32.totalorder %s3918_s19, %s3914_s18 }
   0xa   : > { %s4014_s27 = scalar_select %p27_p1, %s3922_s20, %s29_s25  }
   0xb   : > { %p38_p5 = por %p37_p2, %p36_p0  ;;  %p4016_p6 = por %p129_p3, %p36_p0 }
   0xc   : > { %p135_p7 = scmp.eq.s32.totalorder %s3466_s23, 1  ;;  %p3468_p9 = scmp.ge.s32.totalorder %s3926_s21, 2 }
   0xe   : > { %p4020_p8 = por %p135_p7, %p134_p4  ;;  %186 = sbr.rel (%p3468_p9) target bundleno = 29 (0x1d), region = 28 }
  0x15   : > { %189 = sbr.rel (!%p38_p5) target bundleno = 29 (0x1d), region = 32  ;;  %s191_s30 = sand.u32 (%p38_p5), 1, %s3922_s20  }
  0x16   : > { %s3503_s6 = sshll.u32 (%p38_p5), %s3926_s21, 4  ;;  %s3469_s7 = sshll.u32 (%p38_p5), %s191_s30, 6 }
  0x17   : > { %s196_s10 = scalar_lea.vmem (%p38_p5), %s6749_s0, %s3503_s6  ;;  %s193_s11 = scalar_lea.vmem (%p38_p5), [#allocation2], %s3469_s7 }
  0x18   : > { %v209_v0 = vld [vmem:[%s196_s10] sm:$0xff] (%p38_p5)  ;;  %v211_v1 = vld [vmem:[%s196_s10 + $0x8] sm:$0xff] (%p38_p5) }
  0x19   : > { %v213_v2 = vld [vmem:[%s196_s10 + $0x20] sm:$0xff] (%p38_p5)  ;;  %210 = vst [vmem:[%s193_s11] sm:$0xff] (%p38_p5), %v209_v0  ;;  %212 = vst [vmem:[%s193_s11 + $0x8] sm:$0xff] (%p38_p5), %v211_v1  ;;  %v215_v3 = vld [vmem:[%s196_s10 + $0x28] sm:$0xff] (%p38_p5) }
  0x1a   : > { %214 = vst [vmem:[%s193_s11 + $0x10] sm:$0xff] (%p38_p5), %v213_v2  ;;  %v217_v4 = vld [vmem:[%s196_s10 + $0x40] sm:$0xff] (%p38_p5)  ;;  %v219_v5 = vld [vmem:[%s196_s10 + $0x48] sm:$0xff] (%p38_p5)  ;;  %216 = vst [vmem:[%s193_s11 + $0x18] sm:$0xff] (%p38_p5), %v215_v3 }
  0x1b   : > { %218 = vst [vmem:[%s193_s11 + $0x20] sm:$0xff] (%p38_p5), %v217_v4  ;;  %220 = vst [vmem:[%s193_s11 + $0x28] sm:$0xff] (%p38_p5), %v219_v5  ;;  %v221_v6 = vld [vmem:[%s196_s10 + $0x60] sm:$0xff] (%p38_p5)  ;;  %v223_v7 = vld [vmem:[%s196_s10 + $0x68] sm:$0xff] (%p38_p5) }
  0x1c   : > { %222 = vst [vmem:[%s193_s11 + $0x30] sm:$0xff] %v221_v6  ;;  %224 = vst [vmem:[%s193_s11 + $0x38] sm:$0xff] %v223_v7 }
  0x1d PF: > { %p3472_p10 = scmp.ge.s32.totalorder %s3926_s21, 1  ;;  %p229_p11 = scmp.lt.s32.totalorder %s3926_s21, 3 }
  0x1f   : > { %p230_p12 = pnand %p3472_p10, %p229_p11 }
  0x21   : > { %233 = sbr.rel (%p230_p12) target bundleno = 2628 (0xa44), region = 55 }
  0x28   : > { %s4035_s12 = sand.u32 1, %s3918_s19   ;;  %v6755_v8 = vmov 0   ;;  %v3771_v21 = vld [vmem:[%s6750_s1] sm:$0xff]   ;;  %vm365_vm0 = vcmask 261120   ;;  %v4068_v24 = vld [vmem:[%s6751_s2 + $0x10] sm:$0xff]  ;;  %v4077_v25 = vld [vmem:[%s6751_s2 + $0x8] sm:$0xff] }
  0x29   : > { %s3473_s13 = sshll.u32 %s4035_s12, 6  ;;  %422 = vmatprep.mubr.bf16.mxu0 %v6755_v8  ;;  %462 = vmatprep.mubr.bf16.mxu1 %v6755_v8  ;;  %v3772_v22 = vld [vmem:[%s6750_s1 + $0x20] sm:$0xff]   ;;  %v4082_v26 = vld [vmem:[%s6751_s2 + $0x18] sm:$0xff]  ;;  %v3773_v27 = vld [vmem:[%s6750_s1 + $0x8] sm:$0xff]   ;;  %v6757_v45 = vmov 0.0   ;;  %v6759_v46 = vmov 6  }
  0x2a   : > { %3725 = vset.pattern.permute.xlu0 %v6755_v8  ;;  %3726 = vset.pattern.permute.xlu1 %v6755_v8  ;;  %s4044_s14 = scalar_lea.vmem [#allocation2], %s3473_s13  ;;  %v4063_v23 = vld [vmem:[%s6751_s2] sm:$0xff]  ;;  %v3774_v28 = vld [vmem:[%s6750_s1 + $0x28] sm:$0xff]   ;;  %v4111_v31 = vld [vmem:[%s6751_s2 + $0x30] sm:$0xff]  ;;  %v6761_v47 = vmov 3   ;;  %v6763_v48 = vmov 7  }
  0x2b   : > { %v273_v9 = vld [vmem:[%s4044_s14 + $0x8] sm:$0xff]  ;;  %v275_v10 = vld [vmem:[%s4044_s14 + $0x18] sm:$0xff]  ;;  %v272_v11 = vld [vmem:[%s4044_s14] sm:$0xff]  ;;  %6886 = vst [vmem:[#allocation9_spill] sm:$0xff] %v4063_v23  ;;  %537 = vperm.xlu0 %3725, %v4063_v23   ;;  %547 = vperm.xlu1 %3726, %v4068_v24   ;;  %v6765_v49 = vmov 8   ;;  %s3936_s17 = smov 0.0  }
  0x2c   : > { %v322_v12 = vpack.c.bf16 %v275_v10, %v273_v9  ;;  %v274_v13 = vld [vmem:[%s4044_s14 + $0x10] sm:$0xff]  ;;  %v277_v14 = vld [vmem:[%s4044_s14 + $0x28] sm:$0xff]  ;;  %v279_v15 = vld [vmem:[%s4044_s14 + $0x38] sm:$0xff] }
  0x2d   : > { %v321_v16 = vpack.c.bf16 %v274_v13, %v272_v11  ;;  %v324_v17 = vpack.c.bf16 %v279_v15, %v277_v14  ;;  %v276_v18 = vld [vmem:[%s4044_s14 + $0x20] sm:$0xff]  ;;  %v278_v19 = vld [vmem:[%s4044_s14 + $0x30] sm:$0xff]  ;;  %v4102_v30 = vld [vmem:[%s6751_s2 + $0x28] sm:$0xff] }
  0x2e   : > { %390 = vmatprep.subr.bf16.mxu0 %v322_v12  ;;  %3634 = vmatprep.subr.bf16.mxu1 %v322_v12  ;;  %v323_v20 = vpack.c.bf16 %v278_v19, %v276_v18  ;;  %v4097_v29 = vld [vmem:[%s6751_s2 + $0x20] sm:$0xff]  ;;  %v4116_v32 = vld [vmem:[%s6751_s2 + $0x38] sm:$0xff]  ;;  %v3775_v33 = vld [vmem:[%s6750_s1 + $0x10] sm:$0xff]  }
  0x2f   : > { %391 = vmatpush1.bf16.msra.mxu0 %v321_v16  ;;  %3636 = vmatpush1.bf16.msra.mxu1 %v321_v16  ;;  %v3776_v34 = vld [vmem:[%s6750_s1 + $0x30] sm:$0xff]   ;;  %v4131_v35 = vld [vmem:[%s6751_s2 + $0x40] sm:$0xff]  ;;  %v4136_v36 = vld [vmem:[%s6751_s2 + $0x48] sm:$0xff] }
  0x30   : > { %392 = vmatprep.subr.bf16.mxu0 %v324_v17  ;;  %3635 = vmatprep.subr.bf16.mxu1 %v324_v17  ;;  %v4145_v37 = vld [vmem:[%s6751_s2 + $0x50] sm:$0xff]  ;;  %v4150_v38 = vld [vmem:[%s6751_s2 + $0x58] sm:$0xff]  ;;  %v4165_v41 = vld [vmem:[%s6751_s2 + $0x60] sm:$0xff] }
  0x31   : > { %542 = vperm.xlu0 %3725, %v4077_v25   ;;  %552 = vperm.xlu1 %3726, %v4082_v26   ;;  %v3777_v39 = vld [vmem:[%s6750_s1 + $0x18] sm:$0xff]   ;;  %v4170_v42 = vld [vmem:[%s6751_s2 + $0x68] sm:$0xff]  ;;  %v4179_v43 = vld [vmem:[%s6751_s2 + $0x70] sm:$0xff] }
  0x32   : > { %v3778_v40 = vld [vmem:[%s6750_s1 + $0x38] sm:$0xff]  }
  0x33   : > { %393 = vmatpush1.bf16.msra.mxu0 %v323_v20  ;;  %3637 = vmatpush1.bf16.msra.mxu1 %v323_v20  ;;  %v4184_v44 = vld [vmem:[%s6751_s2 + $0x78] sm:$0xff] }
  0x35   : > { %557 = vperm.xlu0 %3725, %v4097_v29   ;;  %562 = vperm.xlu1 %3726, %v4102_v30  }
  0x36   : > { %3483 = vmatmul.mubr.msk.bf16.vlgmr.msra.gmra.mrb[0].mxu0 %vm365_vm0, %v3771_v21  ;;  %3487 = vmatmul.mubr.msk.bf16.vlgmr.msra.gmra.mrb[0].mxu1 %vm365_vm0, %v3772_v22 }
  0x37   : > { %432 = vmatprep.mubr.bf16.mxu0 %v6755_v8  ;;  %472 = vmatprep.mubr.bf16.mxu1 %v6755_v8 }
  0x39   : > { %567 = vperm.xlu0 %3725, %v4111_v31   ;;  %572 = vperm.xlu1 %3726, %v4116_v32  }
  0x3d   : > { %577 = vperm.xlu0 %3725, %v4131_v35   ;;  %582 = vperm.xlu1 %3726, %v4136_v36  }
  0x3e   : > { %3484 = vmatmul.mubr.msk.bf16.gmra.mrb[4].mxu0 %vm365_vm0, %v3773_v27  ;;  %3488 = vmatmul.mubr.msk.bf16.gmra.mrb[4].mxu1 %vm365_vm0, %v3774_v28 }
  0x3f   : > { %442 = vmatprep.mubr.bf16.mxu0 %v6755_v8  ;;  %482 = vmatprep.mubr.bf16.mxu1 %v6755_v8 }
  0x41   : > { %587 = vperm.xlu0 %3725, %v4145_v37   ;;  %592 = vperm.xlu1 %3726, %v4150_v38  }
  0x45   : > { %597 = vperm.xlu0 %3725, %v4165_v41   ;;  %602 = vperm.xlu1 %3726, %v4170_v42  }
  0x46   : > { %3485 = vmatmul.mubr.msk.bf16.gmra.mrb[8].mxu0 %vm365_vm0, %v3775_v33  ;;  %3489 = vmatmul.mubr.msk.bf16.gmra.mrb[8].mxu1 %vm365_vm0, %v3776_v34 }
  0x47   : > { %452 = vmatprep.mubr.bf16.mxu0 %v6755_v8  ;;  %492 = vmatprep.mubr.bf16.mxu1 %v6755_v8 }
  0x49   : > { %607 = vperm.xlu0 %3725, %v4179_v43   ;;  %612 = vperm.xlu1 %3726, %v4184_v44  }
  0x4d   : > { %3727 = vset.pattern.permute.xlu1 %v6759_v46  ;;  %3734 = vset.pattern.permute.xlu0 %v6761_v47 }
  0x4e   : > { %3486 = vmatmul.mubr.msk.bf16.gmra.mrb[12].mxu0 %vm365_vm0, %v3777_v39  ;;  %3490 = vmatmul.mubr.msk.bf16.gmra.mrb[12].mxu1 %vm365_vm0, %v3778_v40 }
  0x4f   : > { %743 = vmatprep.mubr.f32.mxu1 %v6757_v45  ;;  %2390 = vmatprep.mubr.f32.mxu0 %v6757_v45 }
  0x50   : > { %1680 = vperm.xlu1 %3727, %v4077_v25   ;;  %2203 = vperm.xlu0 %3734, %v4077_v25  }
  0x54   : > { %3728 = vset.pattern.permute.xlu1 %v6763_v48  ;;  %2211 = vperm.xlu0 %3734, %v4082_v26  }
  0x55   : > { %1772 = vperm.xlu1 %3728, %v4063_v23  }
  0x58   : > { %2219 = vperm.xlu0 %3734, %v4102_v30  }
  0x59   : > { %3729 = vset.pattern.permute.xlu1 %v6765_v49 }
  0x5a   : > { %2039 = vperm.xlu1 %3729, %v4063_v23  }
  0x5c   : > { %3743 = vset.pattern.permute.xlu0 %v6759_v46 }
  0x5d   : > { %1676 = vperm.xlu0 %3743, %v4063_v23  }
  0x5e   : > { %2043 = vperm.xlu1 %3729, %v4077_v25  }
  0x62   : > { %3730 = vset.pattern.permute.xlu1 %v6759_v46 }
  0x63   : > { %1688 = vperm.xlu1 %3730, %v4082_v26  }
  0x67   : > { %3731 = vset.pattern.permute.xlu1 %v6763_v48 }
  0x68   : > { %1780 = vperm.xlu1 %3731, %v4068_v24  }
  0x6c   : > { %3732 = vset.pattern.permute.xlu1 %v6765_v49 }
  0x6d   : > { %2051 = vperm.xlu1 %3732, %v4082_v26  }
  0x71   : > { %3733 = vset.pattern.permute.xlu1 %v6761_v47 }
  0x72   : > { %2199 = vperm.xlu1 %3733, %v4063_v23   ;;  %v6891_v23 = vmov 8  }
  0x76   : > { %3735 = vset.pattern.permute.xlu1 %v6759_v46 }
  0x77   : > { %1696 = vperm.xlu1 %3735, %v4102_v30  }
  0x7b   : > { %3736 = vset.pattern.permute.xlu1 %v6763_v48 }
  0x7c   : > { %1788 = vperm.xlu1 %3736, %v4097_v29  }
  0x80   : > { %3737 = vset.pattern.permute.xlu1 %v6765_v49 }
  0x81   : > { %2059 = vperm.xlu1 %3737, %v4102_v30  }
  0x85   : > { %3738 = vset.pattern.permute.xlu1 %v6761_v47 }
  0x86   : > { %2207 = vperm.xlu1 %3738, %v4068_v24  }
  0x8a   : > { %3739 = vset.pattern.permute.xlu1 %v6759_v46 }
  0x8b   : > { %1704 = vperm.xlu1 %3739, %v4116_v32  }
  0x8f   : > { %3740 = vset.pattern.permute.xlu1 %v6763_v48 }
  0x90   : > { %1796 = vperm.xlu1 %3740, %v4111_v31  }
  0x94   : > { %3741 = vset.pattern.permute.xlu1 %v6891_v23 }
  0x95   : > { %2067 = vperm.xlu1 %3741, %v4116_v32  }
  0xaa   : > { %v538_v50 = vpop.permute.xlu0 %537  ;;  %v548_v51 = vpop.permute.xlu1 %547 }
  0xb0   : > { %v543_v52 = vpop.permute.xlu0 %542  ;;  %v553_v53 = vpop.permute.xlu1 %552 }
  0xb4   : > { %v558_v4 = vpop.permute.xlu0 %557  ;;  %v563_v5 = vpop.permute.xlu1 %562 }
  0xb8   : > { %v4245_v19 = vpop.permute.xlu0 %567  ;;  %v4247_v20 = vpop.permute.xlu1 %572 }
 0x109   : > { %v424_v54 = vpop.f32.mrb[0].mxu0  ;;  %v4211_v55 = vpop.f32.mrb[0].mxu1 }
 0x10a   : > { %v426_v56 = vpop.f32.mrb[1].mxu0  ;;  %v4213_v57 = vpop.f32.mrb[1].mxu1  ;;  %v615_v0 = vmul.f32 %v538_v50, %v424_v54  ;;  %vm503_vm4 = vcmp.ge.f32.partialorder %v424_v54, 0.0  ;;  %vm519_vm0 = vcmp.ge.f32.partialorder %v4211_v55, 0.0 }
 0x10b   : > { %v428_v58 = vpop.f32.mrb[2].mxu0  ;;  %v4215_v59 = vpop.f32.mrb[2].mxu1  ;;  %v616_v60 = vmul.f32 %v538_v50, %v426_v56  ;;  %vm504_vm2 = vcmp.ge.f32.partialorder %v426_v56, 0.0  ;;  %vm520_vm13 = vcmp.ge.f32.partialorder %v4213_v57, 0.0 }
 0x10c   : > { %vm505_vm1 = vcmp.ge.f32.partialorder %v428_v58, 0.0  ;;  %v617_v61 = vmul.f32 %v543_v52, %v428_v58  ;;  %v430_v62 = vpop.f32.mrb[3].mxu0  ;;  %v4218_v63 = vpop.f32.mrb[3].mxu1  ;;  %v4228_v7 = vsel %vm503_vm4, %v424_v54, %v615_v0  ;;  %vm521_vm4 = vcmp.ge.f32.partialorder %v4215_v59, 0.0 }
 0x10d   : > { %vm506_vm3 = vcmp.ge.f32.partialorder %v430_v62, 0.0  ;;  %v618_v1 = vmul.f32 %v543_v52, %v430_v62  ;;  %v4225_v6 = vsel %vm504_vm2, %v426_v56, %v616_v60  ;;  %v578_v0 = vpop.permute.xlu0 %577  ;;  %vm522_vm14 = vcmp.ge.f32.partialorder %v4218_v63, 0.0 }
 0x10e   : > { %v4221_v2 = vsel %vm505_vm1, %v428_v58, %v617_v61 }
 0x10f   : > { %v4223_v3 = vsel %vm506_vm3, %v430_v62, %v618_v1  ;;  %v3508_v12 = vpack.c.bf16 %v4221_v2, %v4228_v7  ;;  %v583_v1 = vpop.permute.xlu1 %582 }
 0x110   : > { %6887 = vst [vmem:[#allocation10_spill] sm:$0xff] %v4223_v3  ;;  %v3506_v11 = vpack.c.bf16 %v4223_v3, %v4225_v6  ;;  %v634_v47 = vmul.f32 %v583_v1, %v4218_v63 }
 0x111   : > { %v434_v9 = vpop.f32.mrb[4].mxu0  ;;  %v4230_v10 = vpop.f32.mrb[4].mxu1 }
 0x112   : > { %v436_v13 = vpop.f32.mrb[5].mxu0  ;;  %v4237_v14 = vpop.f32.mrb[5].mxu1  ;;  %3507 = vmatprep.subr.bf16.mxu1 %v3506_v11  ;;  %v619_v34 = vmul.f32 %v548_v51, %v434_v9  ;;  %vm507_vm8 = vcmp.ge.f32.partialorder %v434_v9, 0.0 }
 0x113   : > { %v438_v15 = vpop.f32.mrb[6].mxu0  ;;  %v4239_v16 = vpop.f32.mrb[6].mxu1  ;;  %3509 = vmatpush1.bf16.msra.mxu1 %v3508_v12  ;;  %v620_v27 = vmul.f32 %v548_v51, %v436_v13  ;;  %vm508_vm7 = vcmp.ge.f32.partialorder %v436_v13, 0.0 }
 0x114   : > { %v440_v17 = vpop.f32.mrb[7].mxu0  ;;  %v4241_v18 = vpop.f32.mrb[7].mxu1  ;;  %v621_v21 = vmul.f32 %v553_v53, %v438_v15  ;;  %vm509_vm6 = vcmp.ge.f32.partialorder %v438_v15, 0.0  ;;  %v4265_v60 = vsel %vm507_vm8, %v434_v9, %v619_v34  ;;  %vm525_vm8 = vcmp.ge.f32.partialorder %v4239_v16, 0.0 }
 0x115   : > { %vm510_vm5 = vcmp.ge.f32.partialorder %v440_v17, 0.0  ;;  %v622_v22 = vmul.f32 %v553_v53, %v440_v17  ;;  %v4263_v51 = vsel %vm508_vm7, %v436_v13, %v620_v27  ;;  %v593_v46 = vpop.permute.xlu1 %592  ;;  %vm523_vm7 = vcmp.ge.f32.partialorder %v4230_v10, 0.0 }
 0x116   : > { %v4259_v53 = vsel %vm509_vm6, %v438_v15, %v621_v21  ;;  %vm526_vm6 = vcmp.ge.f32.partialorder %v4241_v18, 0.0 }
 0x117   : > { %v4254_v50 = vsel %vm510_vm5, %v440_v17, %v622_v22  ;;  %v3512_v62 = vpack.c.bf16 %v4259_v53, %v4265_v60  ;;  %vm524_vm5 = vcmp.ge.f32.partialorder %v4237_v14, 0.0 }
 0x118   : > { %6888 = vst [vmem:[#allocation11_spill] sm:$0xff] %v4254_v50  ;;  %v3510_v61 = vpack.c.bf16 %v4254_v50, %v4263_v51 }
 0x119   : > { %v444_v28 = vpop.f32.mrb[8].mxu0  ;;  %v4249_v33 = vpop.f32.mrb[8].mxu1 }
 0x11a   : > { %v446_v39 = vpop.f32.mrb[9].mxu0  ;;  %v4251_v40 = vpop.f32.mrb[9].mxu1  ;;  %3511 = vmatprep.subr.bf16.mxu1 %v3510_v61  ;;  %v623_v22 = vmul.f32 %v558_v4, %v444_v28  ;;  %vm511_vm12 = vcmp.ge.f32.partialorder %v444_v28, 0.0 }
 0x11b   : > { %v448_v52 = vpop.f32.mrb[10].mxu0  ;;  %v4256_v54 = vpop.f32.mrb[10].mxu1  ;;  %3513 = vmatpush1.bf16.msra.mxu1 %v3512_v62  ;;  %v624_v15 = vmul.f32 %v558_v4, %v446_v39  ;;  %vm512_vm11 = vcmp.ge.f32.partialorder %v446_v39, 0.0  ;;  %v632_v4 = vmul.f32 %v578_v0, %v4213_v57 }
 0x11c   : > { %v450_v56 = vpop.f32.mrb[11].mxu0  ;;  %v4261_v58 = vpop.f32.mrb[11].mxu1  ;;  %v625_v11 = vmul.f32 %v563_v5, %v448_v52  ;;  %vm513_vm10 = vcmp.ge.f32.partialorder %v448_v52, 0.0 }
 0x11d   : > { %vm514_vm9 = vcmp.ge.f32.partialorder %v450_v56, 0.0  ;;  %v626_v12 = vmul.f32 %v563_v5, %v450_v56  ;;  %v4289_v45 = vsel %vm512_vm11, %v446_v39, %v624_v15  ;;  %v588_v39 = vpop.permute.xlu0 %587  ;;  %v631_v15 = vmul.f32 %v578_v0, %v4211_v55 }
 0x11e   : > { %v4284_v5 = vsel %vm513_vm10, %v448_v52, %v625_v11  ;;  %v633_v0 = vmul.f32 %v583_v1, %v4215_v59  ;;  %v603_v1 = vpop.permute.xlu1 %602  ;;  %vm528_vm10 = vcmp.ge.f32.partialorder %v4251_v40, 0.0  ;;  %vm529_vm11 = vcmp.ge.f32.partialorder %v4256_v54, 0.0 }
 0x11f   : > { %v4279_v61 = vsel %vm514_vm9, %v450_v56, %v626_v12  ;;  %v4292_v56 = vsel %vm511_vm12, %v444_v28, %v623_v22  ;;  %v4307_v22 = vsel %vm520_vm13, %v4213_v57, %v632_v4  ;;  %v636_v57 = vmul.f32 %v588_v39, %v4237_v14 }
 0x120   : > { %6889 = vst [vmem:[#allocation12_spill] sm:$0xff] %v4279_v61  ;;  %v3514_v12 = vpack.c.bf16 %v4279_v61, %v4289_v45  ;;  %v3516_v52 = vpack.c.bf16 %v4284_v5, %v4292_v56  ;;  %6890 = vst [vmem:[#allocation13_spill] sm:$0xff] %v4307_v22  ;;  %vm530_vm9 = vcmp.ge.f32.partialorder %v4261_v58, 0.0  ;;  %vm527_vm13 = vcmp.ge.f32.partialorder %v4249_v33, 0.0 }
 0x121   : > { %v454_v13 = vpop.f32.mrb[12].mxu0  ;;  %v4273_v9 = vpop.f32.mrb[12].mxu1 }
 0x122   : > { %v456_v17 = vpop.f32.mrb[13].mxu0  ;;  %v4275_v21 = vpop.f32.mrb[13].mxu1  ;;  %v627_v28 = vmul.f32 %v4245_v19, %v454_v13  ;;  %3515 = vmatprep.subr.bf16.mxu1 %v3514_v12  ;;  %vm515_vm2 = vcmp.ge.f32.partialorder %v454_v13, 0.0 }
 0x123   : > { %v458_v27 = vpop.f32.mrb[14].mxu0  ;;  %v4277_v34 = vpop.f32.mrb[14].mxu1  ;;  %v628_v11 = vmul.f32 %v4245_v19, %v456_v17  ;;  %vm516_vm1 = vcmp.ge.f32.partialorder %v456_v17, 0.0  ;;  %3517 = vmatpush1.bf16.msra.mxu1 %v3516_v52  ;;  %v4316_v19 = vsel %vm522_vm14, %v4218_v63, %v634_v47  ;;  %v4338_v63 = vsel %vm519_vm0, %v4211_v55, %v631_v15 }
 0x124   : > { %v460_v8 = vpop.f32.mrb[15].mxu0  ;;  %v4281_v62 = vpop.f32.mrb[15].mxu1  ;;  %v629_v48 = vmul.f32 %v4247_v20, %v458_v27  ;;  %vm517_vm15 = vcmp.ge.f32.partialorder %v458_v27, 0.0  ;;  %6892 = vst [vmem:[#allocation14_spill] sm:$0xff] %v4316_v19  ;;  %v4331_v47 = vsel %vm515_vm2, %v454_v13, %v627_v28  ;;  %v3522_v55 = vpack.c.bf16 %v4316_v19, %v4307_v22 }
 0x125   : > { %vm518_vm3 = vcmp.ge.f32.partialorder %v460_v8, 0.0  ;;  %v630_v49 = vmul.f32 %v4247_v20, %v460_v8  ;;  %v638_v20 = vmul.f32 %v593_v46, %v4241_v18  ;;  %v4324_v4 = vsel %vm516_vm1, %v456_v17, %v628_v11  ;;  %v598_v13 = vpop.permute.xlu0 %597 }
 0x126   : > { %v4319_v12 = vsel %vm517_vm15, %v458_v27, %v629_v48  ;;  %v635_v17 = vmul.f32 %v588_v39, %v4230_v10  ;;  %v637_v27 = vmul.f32 %v593_v46, %v4239_v16  ;;  %v4353_v11 = vsel %vm524_vm5, %v4237_v14, %v636_v57 }
 0x127   : > { %v4326_v52 = vsel %vm518_vm3, %v460_v8, %v630_v49  ;;  %v3520_v8 = vpack.c.bf16 %v4319_v12, %v4331_v47  ;;  %v4346_v49 = vsel %vm521_vm4, %v4215_v59, %v633_v0  ;;  %6894 = vst [vmem:[#allocation16_spill] sm:$0xff] %v4353_v11  ;;  %v4357_v39 = vsel %vm526_vm6, %v4241_v18, %v638_v20  ;;  %v613_v18 = vpop.permute.xlu1 %612 }
 0x128   : > { %6893 = vst [vmem:[#allocation15_spill] sm:$0xff] %v4326_v52  ;;  %v3518_v48 = vpack.c.bf16 %v4326_v52, %v4324_v4  ;;  %6895 = vst [vmem:[#allocation17_spill] sm:$0xff] %v4357_v39  ;;  %v642_v59 = vmul.f32 %v603_v1, %v4261_v58  ;;  %v3524_v46 = vpack.c.bf16 %v4346_v49, %v4338_v63  ;;  %v6896_v28 = vmov 3  }
 0x129   : > { %v4364_v15 = vsel %vm523_vm7, %v4230_v10, %v635_v17  ;;  %v640_v14 = vmul.f32 %v598_v13, %v4251_v40  ;;  %3742 = vset.pattern.permute.xlu1 %v6896_v28  ;;  %v4369_v0 = vsel %vm525_vm8, %v4239_v16, %v637_v27  ;;  %v641_v57 = vmul.f32 %v603_v1, %v4256_v54  ;;  %v608_v16 = vpop.permute.xlu0 %607 }
 0x12a   : > { %3519 = vmatprep.subr.bf16.mxu1 %v3518_v48  ;;  %v3526_v20 = vpack.c.bf16 %v4357_v39, %v4353_v11  ;;  %2215 = vperm.xlu1 %3742, %v4097_v29   ;;  %v4378_v10 = vsel %vm530_vm9, %v4261_v58, %v642_v59  ;;  %v646_v48 = vmul.f32 %v613_v18, %v4281_v62  ;;  %vm534_vm12 = vcmp.ge.f32.partialorder %v4281_v62, 0.0 }
 0x12b   : > { %3521 = vmatpush1.bf16.msra.mxu1 %v3520_v8  ;;  %6897 = vst [vmem:[#allocation18_spill] sm:$0xff] %v4378_v10  ;;  %v639_v17 = vmul.f32 %v598_v13, %v4249_v33  ;;  %v3528_v1 = vpack.c.bf16 %v4369_v0, %v4364_v15  ;;  %v4387_v8 = vsel %vm528_vm10, %v4251_v40, %v640_v14  ;;  %vm532_vm14 = vcmp.ge.f32.partialorder %v4275_v21, 0.0 }
 0x12c   : > { %3523 = vmatprep.subr.bf16.mxu1 %v3522_v55  ;;  %6898 = vst [vmem:[#allocation19_spill] sm:$0xff] %v4387_v8  ;;  %v644_v58 = vmul.f32 %v608_v16, %v4275_v21  ;;  %v4391_v27 = vsel %vm529_vm11, %v4256_v54, %v641_v57  ;;  %v645_v13 = vmul.f32 %v613_v18, %v4277_v34  ;;  %v6900_v59 = vmov 6  }
 0x12d   : > { %6899 = vst [vmem:[#allocation20_spill] sm:$0xff] %v4391_v27  ;;  %v3530_v55 = vpack.c.bf16 %v4378_v10, %v4387_v8  ;;  %vm533_vm15 = vcmp.ge.f32.partialorder %v4277_v34, 0.0  ;;  %v4404_v40 = vsel %vm527_vm13, %v4249_v33, %v639_v17  ;;  %v643_v54 = vmul.f32 %v608_v16, %v4273_v9 }
 0x12e   : > { %3744 = vset.pattern.permute.xlu1 %v6900_v59  ;;  %6902 = vst [vmem:[#allocation22_spill] sm:$0xff] %v4404_v40  ;;  %v3532_v14 = vpack.c.bf16 %v4391_v27, %v4404_v40  ;;  %vm531_vm0 = vcmp.ge.f32.partialorder %v4273_v9, 0.0  ;;  %v4411_v18 = vsel %vm532_vm14, %v4275_v21, %v644_v58  ;;  %v4416_v57 = vsel %vm533_vm15, %v4277_v34, %v645_v13 }
 0x12f   : > { %3525 = vmatpush1.bf16.msra.mxu1 %v3524_v46  ;;  %v4400_v46 = vsel %vm534_vm12, %v4281_v62, %v646_v48  ;;  %1712 = vperm.xlu1 %3744, %v4136_v36   ;;  %6903 = vst [vmem:[#allocation23_spill] sm:$0xff] %v4411_v18  ;;  %v753_v62 = vmul.f32 %v4223_v3, %v4223_v3  ;;  %6904 = vst [vmem:[#allocation24_spill] sm:$0xff] %v4416_v57  ;;  %vm853_vm1 = vcmask 1040384  }
 0x130   : > { %3527 = vmatprep.subr.bf16.mxu1 %v3526_v20  ;;  %6901 = vst [vmem:[#allocation21_spill] sm:$0xff] %v4400_v46  ;;  %v3534_v33 = vpack.c.bf16 %v4400_v46, %v4411_v18  ;;  %v6905_v20 = vmov 7   ;;  %v751_v48 = vmul.f32 %v4225_v6, %v4225_v6  ;;  %v4424_v16 = vsel %vm531_vm0, %v4273_v9, %v643_v54 }
 0x131   : > { %v752_v21 = vmul.f32 %v4221_v2, %v4221_v2  ;;  %v3536_v34 = vpack.c.bf16 %v4416_v57, %v4424_v16  ;;  %v757_v17 = vmul.f32 %v4254_v50, %v4254_v50  ;;  %v750_v58 = vmul.f32 %v4228_v7, %v4228_v7 }
 0x132   : > { %v755_v9 = vmul.f32 %v4263_v51, %v4263_v51  ;;  %v756_v13 = vmul.f32 %v4259_v53, %v4259_v53  ;;  %v761_v54 = vmul.f32 %v4279_v61, %v4279_v61 }
 0x133   : > { %3529 = vmatpush1.bf16.msra.mxu1 %v3528_v1  ;;  %3745 = vset.pattern.permute.xlu1 %v6905_v20  ;;  %v3538_v1 = vpack.c.bf16 %v753_v62, %v751_v48  ;;  %v6906_v48 = vmov 0.0  }
 0x134   : > { %3531 = vmatprep.subr.bf16.mxu1 %v3530_v55  ;;  %1804 = vperm.xlu1 %3745, %v4131_v35   ;;  %v3540_v55 = vpack.c.bf16 %v752_v21, %v750_v58  ;;  %v3542_v62 = vpack.c.bf16 %v757_v17, %v755_v9  ;;  %v760_v21 = vmul.f32 %v4284_v5, %v4284_v5 }
 0x135   : > { %v765_v58 = vmul.f32 %v4326_v52, %v4326_v52  ;;  %v758_v9 = vmul.f32 %v4292_v56, %v4292_v56 }
 0x137   : > { %3533 = vmatpush1.bf16.msra.mxu1 %v3532_v14  ;;  %v6768_v14 = vmov 1.0  }
 0x138   : > { %3535 = vmatprep.subr.bf16.mxu1 %v3534_v33  ;;  %3746 = vset.pattern.permute.xlu1 %v6891_v23  ;;  %v754_v33 = vmul.f32 %v4265_v60, %v4265_v60 }
 0x139   : > { %2075 = vperm.xlu1 %3746, %v4136_v36  }
 0x13b   : > { %3537 = vmatpush1.bf16.msra.mxu1 %v3536_v34  ;;  %v759_v34 = vmul.f32 %v4289_v45, %v4289_v45 }
 0x13c   : > { %3539 = vmatprep.subr.bf16.mxu1 %v3538_v1  ;;  %v3544_v1 = vpack.c.bf16 %v756_v13, %v754_v33  ;;  %v3548_v13 = vpack.c.bf16 %v760_v21, %v758_v9  ;;  %v767_v33 = vmul.f32 %v4307_v22, %v4307_v22  ;;  %v768_v21 = vmul.f32 %v4346_v49, %v4346_v49 }
 0x13d   : > { %3747 = vset.pattern.permute.xlu1 %v6896_v28  ;;  %v3546_v17 = vpack.c.bf16 %v761_v54, %v759_v34  ;;  %v769_v54 = vmul.f32 %v4316_v19, %v4316_v19 }
 0x13e   : > { %744 = vmatmul.mubr.f32.vlgmr.msra.gmra.mrb[16].mxu1 %v6768_v14  ;;  %2223 = vperm.xlu1 %3747, %v4111_v31   ;;  %v771_v14 = vmul.f32 %v4353_v11, %v4353_v11 }
 0x13f   : > { %3541 = vmatpush1.bf16.msra.mxu1 %v3540_v55  ;;  %846 = vmatprep.mubr.f32.mxu1 %v6906_v48  ;;  %v763_v55 = vmul.f32 %v4324_v4, %v4324_v4 }
 0x140   : > { %3543 = vmatprep.subr.bf16.mxu1 %v3542_v62  ;;  %v764_v62 = vmul.f32 %v4319_v12, %v4319_v12 }
 0x141   : > { %v3550_v34 = vpack.c.bf16 %v765_v58, %v763_v55  ;;  %v773_v58 = vmul.f32 %v4357_v39, %v4357_v39  ;;  %v3554_v55 = vpack.c.bf16 %v769_v54, %v767_v33  ;;  %v775_v33 = vmul.f32 %v4387_v8, %v4387_v8 }
 0x142   : > { %3748 = vset.pattern.permute.xlu1 %v6900_v59  ;;  %v776_v54 = vmul.f32 %v4391_v27, %v4391_v27 }
 0x143   : > { %3545 = vmatpush1.bf16.msra.mxu1 %v3544_v1  ;;  %v762_v1 = vmul.f32 %v4331_v47, %v4331_v47  ;;  %1720 = vperm.xlu1 %3748, %v4150_v38   ;;  %v3558_v19 = vpack.c.bf16 %v773_v58, %v771_v14  ;;  %v774_v14 = vmul.f32 %v4404_v40, %v4404_v40 }
 0x144   : > { %3547 = vmatprep.subr.bf16.mxu1 %v3546_v17  ;;  %v766_v17 = vmul.f32 %v4338_v63, %v4338_v63  ;;  %v779_v58 = vmul.f32 %v4411_v18, %v4411_v18 }
 0x145   : > { %v3552_v9 = vpack.c.bf16 %v764_v62, %v762_v1  ;;  %v777_v1 = vmul.f32 %v4378_v10, %v4378_v10 }
 0x146   : > { %v3556_v62 = vpack.c.bf16 %v768_v21, %v766_v17  ;;  %v781_v17 = vmul.f32 %v4400_v46, %v4400_v46 }
 0x147   : > { %3549 = vmatpush1.bf16.msra.mxu1 %v3548_v13  ;;  %3749 = vset.pattern.permute.xlu1 %v6905_v20  ;;  %v770_v13 = vmul.f32 %v4364_v15, %v4364_v15  ;;  %v3562_v21 = vpack.c.bf16 %v777_v1, %v775_v33  ;;  %v6907_v1 = vmov 1.0  }
 0x148   : > { %3551 = vmatprep.subr.bf16.mxu1 %v3550_v34  ;;  %1812 = vperm.xlu1 %3749, %v4145_v37   ;;  %v772_v34 = vmul.f32 %v4369_v0, %v4369_v0 }
 0x14b   : > { %3553 = vmatpush1.bf16.msra.mxu1 %v3552_v9  ;;  %v3560_v9 = vpack.c.bf16 %v772_v34, %v770_v13  ;;  %v3566_v13 = vpack.c.bf16 %v781_v17, %v779_v58  ;;  %v778_v34 = vmul.f32 %v4424_v16, %v4424_v16  ;;  %v4511_v58 = vpop.permute.xlu1 %1680 }
 0x14c   : > { %3555 = vmatprep.subr.bf16.mxu1 %v3554_v55  ;;  %3750 = vset.pattern.permute.xlu1 %v6891_v23  ;;  %v3564_v55 = vpack.c.bf16 %v776_v54, %v774_v14  ;;  %6908 = vst [vmem:[#allocation25_spill] sm:$0xff] %v4511_v58 }
 0x14d   : > { %2083 = vperm.xlu1 %3750, %v4150_v38  }
 0x14f   : > { %3557 = vmatpush1.bf16.msra.mxu1 %v3556_v62 }
 0x150   : > { %3559 = vmatprep.subr.bf16.mxu1 %v3558_v19  ;;  %v780_v19 = vmul.f32 %v4416_v57, %v4416_v57 }
 0x151   : > { %3751 = vset.pattern.permute.xlu1 %v6896_v28 }
 0x152   : > { %2231 = vperm.xlu1 %3751, %v4131_v35   ;;  %v3568_v62 = vpack.c.bf16 %v780_v19, %v778_v34 }
 0x153   : > { %3561 = vmatpush1.bf16.msra.mxu1 %v3560_v9 }
 0x154   : > { %3563 = vmatprep.subr.bf16.mxu1 %v3562_v21 }
 0x156   : > { %3752 = vset.pattern.permute.xlu1 %v6900_v59 }
 0x157   : > { %3565 = vmatpush1.bf16.msra.mxu1 %v3564_v55 }
 0x158   : > { %3567 = vmatprep.subr.bf16.mxu1 %v3566_v13 }
 0x15b   : > { %3569 = vmatpush1.bf16.msra.mxu1 %v3568_v62 }
 0x15e   : > { %847 = vmatmul.mubr.f32.vlgmr.msra.gmra.mrb[18].mxu1 %v6907_v1 }
 0x15f   : > { %2493 = vmatprep.mubr.f32.mxu1 %v6906_v48  ;;  %v4515_v48 = vpop.permute.xlu1 %1772 }
 0x160   : > { %6909 = vst [vmem:[#allocation26_spill] sm:$0xff] %v4515_v48 }
 0x163   : > { %v4517_v19 = vpop.permute.xlu1 %2039 }
 0x164   : > { %6910 = vst [vmem:[#allocation27_spill] sm:$0xff] %v4517_v19 }
 0x167   : > { %v4520_v55 = vpop.permute.xlu1 %2043 }
 0x168   : > { %6911 = vst [vmem:[#allocation28_spill] sm:$0xff] %v4520_v55 }
 0x16b   : > { %v4524_v13 = vpop.permute.xlu1 %1688 }
 0x16c   : > { %6912 = vst [vmem:[#allocation29_spill] sm:$0xff] %v4524_v13 }
 0x16f   : > { %v4528_v34 = vpop.permute.xlu1 %1780 }
 0x170   : > { %6913 = vst [vmem:[#allocation30_spill] sm:$0xff] %v4528_v34 }
 0x173   : > { %v4532_v62 = vpop.permute.xlu1 %2051 }
 0x174   : > { %6914 = vst [vmem:[#allocation31_spill] sm:$0xff] %v4532_v62 }
 0x211   : > { %v745_v33 = vpop.f32.mrb[16].mxu1 }
 0x212   : > { %v747_v54 = vpop.f32.mrb[17].mxu1  ;;  %v854_v9 = vsel %vm853_vm1, %v745_v33, 0.0 }
 0x213   : > { %855 = vadd.xlane.f32.xlu0 %v854_v9  ;;  %v1194_v33 = vsel %vm853_vm1, %v747_v54, 0.0 }
 0x229   : > { %1684 = vperm.xlu0 %3743, %v4068_v24  }
 0x22d   : > { %1692 = vperm.xlu0 %3743, %v4097_v29  }
 0x231   : > { %1700 = vperm.xlu0 %3743, %v4111_v31   ;;  %v848_v17 = vpop.f32.mrb[18].mxu1 }
 0x232   : > { %v850_v21 = vpop.f32.mrb[19].mxu1  ;;  %v867_v14 = vsel %vm853_vm1, %v848_v17, 0.0  ;;  %v4538_v17 = vpop.permute.xlu1 %2199 }
 0x233   : > { %868 = vadd.xlane.f32.xlu1 %v867_v14  ;;  %v1207_v9 = vsel %vm853_vm1, %v850_v21, 0.0  ;;  %6915 = vst [vmem:[#allocation32_spill] sm:$0xff] %v4538_v17 }
 0x235   : > { %1708 = vperm.xlu0 %3743, %v4131_v35  }
 0x236   : > { %v4542_v14 = vpop.permute.xlu1 %1696 }
 0x237   : > { %6916 = vst [vmem:[#allocation33_spill] sm:$0xff] %v4542_v14 }
 0x239   : > { %1716 = vperm.xlu0 %3743, %v4145_v37  }
 0x23a   : > { %v4544_v1 = vpop.permute.xlu1 %1788 }
 0x23b   : > { %6917 = vst [vmem:[#allocation34_spill] sm:$0xff] %v4544_v1 }
 0x23e   : > { %v4546_v62 = vpop.permute.xlu1 %2059 }
 0x23f   : > { %6918 = vst [vmem:[#allocation35_spill] sm:$0xff] %v4546_v62  ;;  %v4566_v62 = vpop.permute.xlu0 %2203 }
 0x240   : > { %6924 = vst [vmem:[#allocation41_spill] sm:$0xff] %v4566_v62 }
 0x244   : > { %1728 = vperm.xlu1 %3752, %v4170_v42  }
 0x248   : > { %3753 = vset.pattern.permute.xlu1 %v6905_v20 }
 0x249   : > { %1820 = vperm.xlu1 %3753, %v4165_v41  }
 0x24d   : > { %3754 = vset.pattern.permute.xlu1 %v6891_v23 }
 0x24e   : > { %2091 = vperm.xlu1 %3754, %v4170_v42  }
 0x252   : > { %3755 = vset.pattern.permute.xlu1 %v6896_v28 }
 0x253   : > { %2239 = vperm.xlu1 %3755, %v4145_v37  }
 0x257   : > { %3757 = vset.pattern.permute.xlu1 %v6900_v59  ;;  %v4549_v59 = vpop.permute.xlu1 %2207 }
 0x258   : > { %1195 = vadd.xlane.f32.xlu0 %v1194_v33  ;;  %1736 = vperm.xlu1 %3757, %v4184_v44   ;;  %6919 = vst [vmem:[#allocation36_spill] sm:$0xff] %v4549_v59 }
 0x25b   : > { %v4552_v54 = vpop.permute.xlu1 %1704 }
 0x25c   : > { %1208 = vadd.xlane.f32.xlu0 %v1207_v9  ;;  %3758 = vset.pattern.permute.xlu1 %v6905_v20  ;;  %6920 = vst [vmem:[#allocation37_spill] sm:$0xff] %v4552_v54  ;;  %v4571_v54 = vpop.permute.xlu0 %2211 }
 0x25d   : > { %1828 = vperm.xlu1 %3758, %v4179_v43   ;;  %6926 = vst [vmem:[#allocation43_spill] sm:$0xff] %v4571_v54 }
 0x25f   : > { %v4557_v21 = vpop.permute.xlu1 %1796 }
 0x260   : > { %6921 = vst [vmem:[#allocation38_spill] sm:$0xff] %v4557_v21 }
 0x263   : > { %v4560_v33 = vpop.permute.xlu1 %2067 }
 0x264   : > { %6922 = vst [vmem:[#allocation39_spill] sm:$0xff] %v4560_v33  ;;  %v4577_v33 = vpop.permute.xlu0 %2219 }
 0x265   : > { %6928 = vst [vmem:[#allocation45_spill] sm:$0xff] %v4577_v33 }
 0x267   : > { %v4564_v9 = vpop.permute.xlu1 %2215 }
 0x268   : > { %6923 = vst [vmem:[#allocation40_spill] sm:$0xff] %v4564_v9  ;;  %v4580_v13 = vpop.permute.xlu0 %1676 }
 0x269   : > { %6929 = vst [vmem:[#allocation46_spill] sm:$0xff] %v4580_v13 }
 0x272   : > { %1724 = vperm.xlu0 %3743, %v4165_v41  }
 0x276   : > { %1732 = vperm.xlu0 %3743, %v4179_v43  }
 0x27a   : > { %3756 = vset.pattern.permute.xlu0 %v6905_v20  ;;  %v4569_v20 = vpop.permute.xlu1 %1712 }
 0x27b   : > { %1776 = vperm.xlu0 %3756, %v4077_v25   ;;  %6925 = vst [vmem:[#allocation42_spill] sm:$0xff] %v4569_v20 }
 0x27e   : > { %v4575_v14 = vpop.permute.xlu1 %1804 }
 0x27f   : > { %1784 = vperm.xlu0 %3756, %v4082_v26   ;;  %6927 = vst [vmem:[#allocation44_spill] sm:$0xff] %v4575_v14 }
 0x282   : > { %v4583_v62 = vpop.permute.xlu1 %2075 }
 0x283   : > { %1792 = vperm.xlu0 %3756, %v4102_v30   ;;  %6930 = vst [vmem:[#allocation47_spill] sm:$0xff] %v4583_v62 }
 0x286   : > { %v4586_v58 = vpop.permute.xlu1 %2223 }
 0x287   : > { %1800 = vperm.xlu0 %3756, %v4116_v32   ;;  %6931 = vst [vmem:[#allocation48_spill] sm:$0xff] %v4586_v58 }
 0x28a   : > { %v4590_v17 = vpop.permute.xlu1 %1720 }
 0x28b   : > { %1808 = vperm.xlu0 %3756, %v4136_v36   ;;  %6932 = vst [vmem:[#allocation49_spill] sm:$0xff] %v4590_v17 }
 0x28e   : > { %v4593_v62 = vpop.permute.xlu1 %1812 }
 0x28f   : > { %1816 = vperm.xlu0 %3756, %v4150_v38   ;;  %6933 = vst [vmem:[#allocation50_spill] sm:$0xff] %v4593_v62 }
 0x293   : > { %1824 = vperm.xlu0 %3756, %v4170_v42  }
 0x297   : > { %1832 = vperm.xlu0 %3756, %v4184_v44  }
 0x29b   : > { %3759 = vset.pattern.permute.xlu0 %v6891_v23 }
 0x29c   : > { %2047 = vperm.xlu0 %3759, %v4068_v24  }
 0x2a0   : > { %v856_v55 = vpop.xlane.xlu0 %855  ;;  %2055 = vperm.xlu0 %3759, %v4097_v29  }
 0x2a1   : > { %v857_v20 = vrot.slane %v856_v55, 4 }
 0x2a3   : > { %v858_v54 = vadd.f32 %v857_v20, %v856_v55  ;;  %v4597_v55 = vpop.permute.xlu1 %2083 }
 0x2a4   : > { %2063 = vperm.xlu0 %3759, %v4111_v31   ;;  %6934 = vst [vmem:[#allocation51_spill] sm:$0xff] %v4597_v55 }
 0x2a5   : > { %v859_v9 = vrot.slane %v858_v54, 2 }
 0x2a7   : > { %v860_v59 = vadd.f32 %v859_v9, %v858_v54  ;;  %v4599_v20 = vpop.permute.xlu1 %2231 }
 0x2a8   : > { %2071 = vperm.xlu0 %3759, %v4131_v35   ;;  %6935 = vst [vmem:[#allocation52_spill] sm:$0xff] %v4599_v20 }
 0x2a9   : > { %v861_v33 = vrot.slane %v860_v59, 1 }
 0x2ab   : > { %v862_v19 = vadd.f32 %v861_v33, %v860_v59  ;;  %v3935_v33 = vmov 1  }
 0x2ac   : > { %2079 = vperm.xlu0 %3759, %v4145_v37   ;;  %3761 = vset.pattern.permute.xlu1 %v3935_v33 }
 0x2ad   : > { %3639 = vpush %v862_v19  ;;  %v4601_v19 = vpop.permute.xlu0 %1684 }
 0x2ae   : > { %6936 = vst [vmem:[#allocation53_spill] sm:$0xff] %v4601_v19 }
 0x2b0   : > { %2087 = vperm.xlu0 %3759, %v4165_v41  }
 0x2b1   : > { %v4603_v62 = vpop.permute.xlu0 %1692 }
 0x2b2   : > { %6937 = vst [vmem:[#allocation54_spill] sm:$0xff] %v4603_v62 }
 0x2b4   : > { %2095 = vperm.xlu0 %3759, %v4179_v43  }
 0x2b5   : > { %v4605_v21 = vpop.permute.xlu0 %1700 }
 0x2b6   : > { %6938 = vst [vmem:[#allocation55_spill] sm:$0xff] %v4605_v21 }
 0x2b8   : > { %3760 = vset.pattern.permute.xlu0 %v3935_v33 }
 0x2b9   : > { %v4607_v55 = vpop.permute.xlu0 %1708 }
 0x2ba   : > { %6939 = vst [vmem:[#allocation56_spill] sm:$0xff] %v4607_v55 }
 0x2bd   : > { %v4609_v20 = vpop.permute.xlu0 %1716 }
 0x2be   : > { %6940 = vst [vmem:[#allocation57_spill] sm:$0xff] %v4609_v20 }
 0x2c0   : > { %v869_v54 = vpop.xlane.xlu1 %868 }
 0x2c1   : > { %v870_v9 = vrot.slane %v869_v54, 4 }
 0x2c3   : > { %v871_v58 = vadd.f32 %v870_v9, %v869_v54 }
 0x2c5   : > { %v872_v13 = vrot.slane %v871_v58, 2 }
 0x2c7   : > { %v873_v14 = vadd.f32 %v872_v13, %v871_v58 }
 0x2c9   : > { %v874_v17 = vrot.slane %v873_v14, 1 }
 0x2cb   : > { %v875_v59 = vadd.f32 %v874_v17, %v873_v14 }
 0x2cd   : > { %3641 = vpush %v875_v59 }
 0x2de   : > { %s3640_s8 = spop %3639 }
 0x2df   : > { %s4611_s9 = smul.f32 6.1035156e-05, %s3640_s8 }
 0x2e1   : > { %s880_s10 = smul.f32 %s4611_s9, %s4611_s9 }
 0x2e5   : > { %v1196_v1 = vpop.xlane.xlu0 %1195 }
 0x2e6   : > { %v1197_v13 = vrot.slane %v1196_v1, 4 }
 0x2e8   : > { %v1198_v14 = vadd.f32 %v1197_v13, %v1196_v1  ;;  %v6941_v13 = vld [vmem:[#allocation9_spill] sm:$0xff] }
 0x2e9   : > { %v1209_v58 = vpop.xlane.xlu0 %1208 }
 0x2ea   : > { %v1210_v17 = vrot.slane %v1209_v58, 4  ;;  %v1199_v9 = vrot.slane %v1198_v14, 2 }
 0x2ec   : > { %v1211_v54 = vadd.f32 %v1210_v17, %v1209_v58  ;;  %v1200_v20 = vadd.f32 %v1199_v9, %v1198_v14  ;;  %v4667_v9 = vld [vmem:[%s6751_s2 + $0x10] sm:$0xff] }
 0x2ee   : > { %v1212_v33 = vrot.slane %v1211_v54, 2  ;;  %v1201_v21 = vrot.slane %v1200_v20, 1 }
 0x2f0   : > { %v1213_v55 = vadd.f32 %v1212_v33, %v1211_v54  ;;  %v1202_v34 = vadd.f32 %v1201_v21, %v1200_v20 }
 0x2f2   : > { %v1214_v62 = vrot.slane %v1213_v55, 1 }
 0x2f4   : > { %v1215_v48 = vadd.f32 %v1214_v62, %v1213_v55 }
 0x2fe   : > { %s3642_s11 = spop %3641 }
 0x2ff   : > { %s879_s15 = smul.f32 6.1035156e-05, %s3642_s11 }
 0x301   : > { %s881_s16 = ssub.f32 %s879_s15, %s880_s10 }
 0x303   : > { %s882_s23 = smax.f32 %s3936_s17, %s881_s16 }
 0x304   : > { %s883_s25 = sadd.f32 1e-16, %s882_s23 }
 0x306   : > { %v884_v59 = vstv %s883_s25 }
 0x307   : > { %3784 = vrsqrt.f32 %v884_v59 }
 0x311   : > { %v3785_v19 = vpop.eup %3784 }
 0x312   : > { %3643 = vpush %v3785_v19 }
 0x313   : > { %3645 = vpush %v1202_v34 }
 0x314   : > { %3647 = vpush %v1215_v48 }
 0x343   : > { %s4616_s26 = spop %3643 }
 0x344   : > { %v887_v1 = vstv %s4616_s26  ;;  %s3646_s30 = spop %3645  ;;  %s904_s23 = smul.f32 %s4616_s26, %s4611_s9 }
 0x345   : > { %s4619_s6 = smul.f32 6.1035156e-05, %s3646_s30  ;;  %s3648_s7 = spop %3647  ;;  %v889_v58 = vmul.f32 %v887_v1, %v4077_v25  ;;  %v888_v17 = vmul.f32 %v887_v1, %v6941_v13  ;;  %v891_v48 = vmul.f32 %v887_v1, %v4082_v26  ;;  %v890_v34 = vmul.f32 %v887_v1, %v4068_v24  ;;  %v4683_v13 = vld [vmem:[%s6751_s2 + $0x20] sm:$0xff] }
 0x346   : > { %s1219_s8 = smul.f32 6.1035156e-05, %s3648_s7  ;;  %v893_v62 = vmul.f32 %v887_v1, %v4102_v30  ;;  %v892_v25 = vmul.f32 %v887_v1, %v4097_v29  ;;  %v895_v55 = vmul.f32 %v887_v1, %v4116_v32  ;;  %v894_v26 = vmul.f32 %v887_v1, %v4111_v31  ;;  %s3937_s9 = smov 1  }
 0x347   : > { %s1220_s10 = smul.f32 %s4619_s6, %s4619_s6  ;;  %1009 = vperm.xlu1 %3761, %v889_v58   ;;  %1004 = vperm.xlu0 %3760, %v888_v17   ;;  %v897_v24 = vmul.f32 %v887_v1, %v4136_v36  ;;  %v896_v20 = vmul.f32 %v887_v1, %v4131_v35  ;;  %v899_v29 = vmul.f32 %v887_v1, %v4150_v38  ;;  %v905_v14 = vstv %s904_s23  ;;  %s3940_s26 = smov 126  }
 0x348   : > { %v898_v19 = vmul.f32 %v887_v1, %v4145_v37  ;;  %v901_v32 = vmul.f32 %v887_v1, %v4170_v42  ;;  %v900_v31 = vmul.f32 %v887_v1, %v4165_v41  ;;  %v903_v36 = vmul.f32 %v887_v1, %v4184_v44  ;;  %v4645_v37 = vld [vmem:[%s6751_s2] sm:$0xff]  ;;  %v4651_v41 = vld [vmem:[%s6751_s2 + $0x8] sm:$0xff]  ;;  %v4654_v44 = vpop.permute.xlu0 %1724 }
 0x349   : > { %s1221_s11 = ssub.f32 %s1219_s8, %s1220_s10  ;;  %v902_v35 = vmul.f32 %v887_v1, %v4179_v43  ;;  %v906_v38 = vmul.f32 %v4645_v37, %v905_v14  ;;  %v907_v42 = vmul.f32 %v4651_v41, %v905_v14  ;;  %6942 = vst [vmem:[#allocation9_spill] sm:$0xff] %v4654_v44  ;;  %v4661_v43 = vld [vmem:[%s6751_s2 + $0x18] sm:$0xff]  ;;  %v908_v59 = vmul.f32 %v4667_v9, %v905_v14  ;;  %v4677_v1 = vld [vmem:[%s6751_s2 + $0x28] sm:$0xff] }
 0x34a   : > { %v909_v54 = vmul.f32 %v4661_v43, %v905_v14  ;;  %v911_v58 = vmul.f32 %v4677_v1, %v905_v14  ;;  %v910_v17 = vmul.f32 %v4683_v13, %v905_v14 }
 0x34b   : > { %s1222_s15 = smax.f32 %s3936_s17, %s1221_s11  ;;  %1019 = vperm.xlu1 %3761, %v891_v48   ;;  %1014 = vperm.xlu0 %3760, %v890_v34   ;;  %v4693_v34 = vld [vmem:[%s6751_s2 + $0x38] sm:$0xff] }
 0x34c   : > { %s1223_s16 = sadd.f32 1e-16, %s1222_s15  ;;  %v4672_v33 = vpop.permute.xlu0 %1732 }
 0x34d   : > { %6943 = vst [vmem:[#allocation58_spill] sm:$0xff] %v4672_v33 }
 0x34e   : > { %v1224_v21 = vstv %s1223_s16 }
 0x34f   : > { %3786 = vrsqrt.f32 %v1224_v21  ;;  %1029 = vperm.xlu1 %3761, %v893_v62   ;;  %1024 = vperm.xlu0 %3760, %v892_v25   ;;  %v913_v62 = vmul.f32 %v4693_v34, %v905_v14  ;;  %v4699_v25 = vld [vmem:[%s6751_s2 + $0x30] sm:$0xff] }
 0x350   : > { %v4688_v48 = vpop.permute.xlu0 %1776  ;;  %v912_v21 = vmul.f32 %v4699_v25, %v905_v14 }
 0x351   : > { %6944 = vst [vmem:[#allocation59_spill] sm:$0xff] %v4688_v48 }
 0x353   : > { %1039 = vperm.xlu1 %3761, %v895_v55   ;;  %1034 = vperm.xlu0 %3760, %v894_v26   ;;  %v4707_v55 = vld [vmem:[%s6751_s2 + $0x48] sm:$0xff] }
 0x354   : > { %v915_v26 = vmul.f32 %v4707_v55, %v905_v14 }
 0x357   : > { %1049 = vperm.xlu1 %3761, %v897_v24   ;;  %1044 = vperm.xlu0 %3760, %v896_v20   ;;  %v4713_v24 = vld [vmem:[%s6751_s2 + $0x40] sm:$0xff] }
 0x358   : > { %v914_v20 = vmul.f32 %v4713_v24, %v905_v14 }
 0x359   : > { %v3787_v30 = vpop.eup %3786 }
 0x35a   : > { %3649 = vpush %v3787_v30  ;;  %v4716_v30 = vpop.permute.xlu0 %1784 }
 0x35b   : > { %1059 = vperm.xlu1 %3761, %v899_v29   ;;  %1054 = vperm.xlu0 %3760, %v898_v19   ;;  %6945 = vst [vmem:[#allocation60_spill] sm:$0xff] %v4716_v30  ;;  %v4723_v29 = vld [vmem:[%s6751_s2 + $0x58] sm:$0xff] }
 0x35c   : > { %v917_v19 = vmul.f32 %v4723_v29, %v905_v14 }
 0x35f   : > { %1069 = vperm.xlu1 %3761, %v901_v32   ;;  %1064 = vperm.xlu0 %3760, %v900_v31   ;;  %v4729_v32 = vld [vmem:[%s6751_s2 + $0x50] sm:$0xff] }
 0x360   : > { %v916_v31 = vmul.f32 %v4729_v32, %v905_v14 }
 0x363   : > { %1079 = vperm.xlu1 %3761, %v903_v36   ;;  %1074 = vperm.xlu0 %3760, %v902_v35   ;;  %v4734_v36 = vpop.permute.xlu0 %1792  ;;  %v4739_v35 = vld [vmem:[%s6751_s2 + $0x68] sm:$0xff] }
 0x364   : > { %6946 = vst [vmem:[#allocation61_spill] sm:$0xff] %v4734_v36 }
 0x367   : > { %938 = vrot.lane.b32.xlu1 %v906_v38, %s3937_s9  ;;  %940 = vrot.lane.b32.xlu0 %v907_v42, %s3937_s9  ;;  %v919_v38 = vmul.f32 %v4739_v35, %v905_v14  ;;  %v4745_v42 = vld [vmem:[%s6751_s2 + $0x60] sm:$0xff] }
 0x36b   : > { %944 = vrot.lane.b32.xlu1 %v909_v54, %s3937_s9  ;;  %942 = vrot.lane.b32.xlu0 %v908_v59, %s3937_s9  ;;  %v918_v54 = vmul.f32 %v4745_v42, %v905_v14  ;;  %v4753_v59 = vld [vmem:[%s6751_s2 + $0x78] sm:$0xff] }
 0x36f   : > { %948 = vrot.lane.b32.xlu1 %v911_v58, %s3937_s9  ;;  %946 = vrot.lane.b32.xlu0 %v910_v17, %s3937_s9  ;;  %v921_v58 = vmul.f32 %v4753_v59, %v905_v14  ;;  %v4759_v17 = vld [vmem:[%s6751_s2 + $0x70] sm:$0xff] }
 0x373   : > { %952 = vrot.lane.b32.xlu1 %v913_v62, %s3937_s9  ;;  %950 = vrot.lane.b32.xlu0 %v912_v21, %s3937_s9  ;;  %v920_v62 = vmul.f32 %v4759_v17, %v905_v14  ;;  %v4762_v21 = vpop.permute.xlu0 %1800 }
 0x374   : > { %6947 = vst [vmem:[#allocation62_spill] sm:$0xff] %v4762_v21 }
 0x377   : > { %956 = vrot.lane.b32.xlu1 %v915_v26, %s3937_s9  ;;  %954 = vrot.lane.b32.xlu0 %v914_v20, %s3937_s9  ;;  %v4766_v26 = vpop.permute.xlu0 %1808 }
 0x378   : > { %6948 = vst [vmem:[#allocation63_spill] sm:$0xff] %v4766_v26 }
 0x37b   : > { %960 = vrot.lane.b32.xlu1 %v917_v19, %s3937_s9  ;;  %958 = vrot.lane.b32.xlu0 %v916_v31, %s3937_s9 }
 0x37f   : > { %964 = vrot.lane.b32.xlu1 %v919_v38, %s3937_s9  ;;  %962 = vrot.lane.b32.xlu0 %v918_v54, %s3937_s9  ;;  %v4773_v38 = vpop.permute.xlu0 %1816 }
 0x380   : > { %6949 = vst [vmem:[#allocation64_spill] sm:$0xff] %v4773_v38 }
 0x383   : > { %968 = vrot.lane.b32.xlu1 %v921_v58, %s3937_s9  ;;  %966 = vrot.lane.b32.xlu0 %v920_v62, %s3937_s9  ;;  %v4777_v58 = vpop.permute.xlu0 %1824 }
 0x384   : > { %6950 = vst [vmem:[#allocation65_spill] sm:$0xff] %v4777_v58  ;;  %v4791_v58 = vpop.permute.xlu1 %1728 }
 0x385   : > { %6953 = vst [vmem:[#allocation68_spill] sm:$0xff] %v4791_v58 }
 0x38b   : > { %s4768_s7 = spop %3649 }
 0x38c   : > { %v1227_v20 = vstv %s4768_s7  ;;  %s1244_s8 = smul.f32 %s4768_s7, %s4619_s6  ;;  %s3939_s6 = smov 2  }
 0x38d   : > { %v1229_v19 = vmul.f32 %v4651_v41, %v1227_v20  ;;  %v1228_v31 = vmul.f32 %v4645_v37, %v1227_v20  ;;  %v1231_v14 = vmul.f32 %v4661_v43, %v1227_v20  ;;  %v1230_v54 = vmul.f32 %v4667_v9, %v1227_v20 }
 0x38e   : > { %v1233_v62 = vmul.f32 %v4677_v1, %v1227_v20  ;;  %v1232_v33 = vmul.f32 %v4683_v13, %v1227_v20  ;;  %v1235_v44 = vmul.f32 %v4693_v34, %v1227_v20  ;;  %v1234_v38 = vmul.f32 %v4699_v25, %v1227_v20 }
 0x38f   : > { %1349 = vperm.xlu0 %3760, %v1229_v19   ;;  %1344 = vperm.xlu1 %3761, %v1228_v31   ;;  %v4783_v19 = vpop.permute.xlu0 %1832  ;;  %v1237_v31 = vmul.f32 %v4707_v55, %v1227_v20  ;;  %v4803_v26 = vstv %s1244_s8 }
 0x390   : > { %6951 = vst [vmem:[#allocation66_spill] sm:$0xff] %v4783_v19  ;;  %v1261_v36 = vmul.f32 %v4753_v59, %v4803_v26 }
 0x393   : > { %1359 = vperm.xlu0 %3760, %v1231_v14   ;;  %1354 = vperm.xlu1 %3761, %v1230_v54   ;;  %v1236_v14 = vmul.f32 %v4713_v24, %v1227_v20  ;;  %v4787_v54 = vpop.permute.xlu0 %2047 }
 0x394   : > { %6952 = vst [vmem:[#allocation67_spill] sm:$0xff] %v4787_v54  ;;  %v4799_v54 = vpop.permute.xlu1 %1820 }
 0x395   : > { %6955 = vst [vmem:[#allocation70_spill] sm:$0xff] %v4799_v54 }
 0x397   : > { %1369 = vperm.xlu0 %3760, %v1233_v62   ;;  %1364 = vperm.xlu1 %3761, %v1232_v33   ;;  %v1239_v33 = vmul.f32 %v4723_v29, %v1227_v20  ;;  %v1238_v62 = vmul.f32 %v4729_v32, %v1227_v20  ;;  %v4793_v19 = vpop.permute.xlu0 %2055 }
 0x398   : > { %6954 = vst [vmem:[#allocation69_spill] sm:$0xff] %v4793_v19 }
 0x39b   : > { %1379 = vperm.xlu0 %3760, %v1235_v44   ;;  %1374 = vperm.xlu1 %3761, %v1234_v38   ;;  %v1241_v44 = vmul.f32 %v4739_v35, %v1227_v20  ;;  %v1240_v38 = vmul.f32 %v4745_v42, %v1227_v20  ;;  %v4805_v58 = vpop.permute.xlu0 %2063 }
 0x39c   : > { %6956 = vst [vmem:[#allocation71_spill] sm:$0xff] %v4805_v58 }
 0x39f   : > { %1389 = vperm.xlu0 %3760, %v1237_v31   ;;  %1384 = vperm.xlu1 %3761, %v1236_v14   ;;  %v1243_v31 = vmul.f32 %v4753_v59, %v1227_v20  ;;  %v1242_v14 = vmul.f32 %v4759_v17, %v1227_v20  ;;  %v1250_v20 = vmul.f32 %v4683_v13, %v4803_v26 }
 0x3a3   : > { %1399 = vperm.xlu0 %3760, %v1239_v33   ;;  %1394 = vperm.xlu1 %3761, %v1238_v62   ;;  %v1248_v33 = vmul.f32 %v4667_v9, %v4803_v26  ;;  %v1246_v62 = vmul.f32 %v4645_v37, %v4803_v26 }
 0x3a7   : > { %1409 = vperm.xlu0 %3760, %v1241_v44   ;;  %1404 = vperm.xlu1 %3761, %v1240_v38   ;;  %v4811_v44 = vpop.permute.xlu1 %2091  ;;  %v4815_v38 = vpop.permute.xlu0 %2071 }
 0x3a8   : > { %6957 = vst [vmem:[#allocation72_spill] sm:$0xff] %v4811_v44  ;;  %6958 = vst [vmem:[#allocation73_spill] sm:$0xff] %v4815_v38  ;;  %v1254_v44 = vmul.f32 %v4713_v24, %v4803_v26 }
 0x3ab   : > { %1419 = vperm.xlu0 %3760, %v1243_v31   ;;  %1414 = vperm.xlu1 %3761, %v1242_v14   ;;  %v1247_v31 = vmul.f32 %v4651_v41, %v4803_v26  ;;  %v4825_v14 = vpop.permute.xlu1 %2239 }
 0x3ac   : > { %6959 = vst [vmem:[#allocation74_spill] sm:$0xff] %v4825_v14 }
 0x3af   : > { %1282 = vrot.lane.b32.xlu0 %v1248_v33, %s3937_s9  ;;  %1278 = vrot.lane.b32.xlu1 %v1246_v62, %s3937_s9  ;;  %v1252_v33 = vmul.f32 %v4699_v25, %v4803_v26  ;;  %v4831_v62 = vpop.permute.xlu0 %2079 }
 0x3b0   : > { %3763 = vset.pattern.permute.xlu1 %v6891_v23  ;;  %3762 = vset.pattern.permute.xlu0 %v6896_v28  ;;  %v1249_v23 = vmul.f32 %v4661_v43, %v4803_v26  ;;  %6960 = vst [vmem:[#allocation75_spill] sm:$0xff] %v4831_v62  ;;  %v1256_v62 = vmul.f32 %v4729_v32, %v4803_v26 }
 0x3b3   : > { %1286 = vrot.lane.b32.xlu0 %v1250_v20, %s3937_s9  ;;  %1280 = vrot.lane.b32.xlu1 %v1247_v31, %s3937_s9  ;;  %v1251_v20 = vmul.f32 %v4677_v1, %v4803_v26  ;;  %v4839_v31 = vpop.permute.xlu1 %1736  ;;  %v4843_v14 = vpop.permute.xlu0 %2087 }
 0x3b4   : > { %6961 = vst [vmem:[#allocation76_spill] sm:$0xff] %v4839_v31  ;;  %6962 = vst [vmem:[#allocation77_spill] sm:$0xff] %v4843_v14  ;;  %v1258_v31 = vmul.f32 %v4745_v42, %v4803_v26  ;;  %v1260_v14 = vmul.f32 %v4759_v17, %v4803_v26 }
 0x3b7   : > { %1290 = vrot.lane.b32.xlu0 %v1252_v33, %s3937_s9  ;;  %1284 = vrot.lane.b32.xlu1 %v1249_v23, %s3937_s9  ;;  %v1253_v33 = vmul.f32 %v4693_v34, %v4803_v26  ;;  %v4851_v23 = vpop.permute.xlu1 %1828 }
 0x3b8   : > { %6963 = vst [vmem:[#allocation78_spill] sm:$0xff] %v4851_v23 }
 0x3bb   : > { %1294 = vrot.lane.b32.xlu0 %v1254_v44, %s3937_s9  ;;  %1288 = vrot.lane.b32.xlu1 %v1251_v20, %s3937_s9  ;;  %v1255_v44 = vmul.f32 %v4707_v55, %v4803_v26  ;;  %v4857_v20 = vpop.permute.xlu0 %2095 }
 0x3bc   : > { %6964 = vst [vmem:[#allocation79_spill] sm:$0xff] %v4857_v20  ;;  %v1259_v20 = vmul.f32 %v4739_v35, %v4803_v26 }
 0x3bf   : > { %1298 = vrot.lane.b32.xlu0 %v1256_v62, %s3937_s9  ;;  %1292 = vrot.lane.b32.xlu1 %v1253_v33, %s3937_s9  ;;  %v1257_v62 = vmul.f32 %v4723_v29, %v4803_v26 }
 0x3c3   : > { %1302 = vrot.lane.b32.xlu0 %v1258_v31, %s3937_s9  ;;  %1296 = vrot.lane.b32.xlu1 %v1255_v44, %s3937_s9 }
 0x3c6   : > { %v4865_v33 = vpop.permute.xlu1 %1009  ;;  %v4867_v38 = vpop.permute.xlu0 %1004 }
 0x3c7   : > { %1306 = vrot.lane.b32.xlu0 %v1260_v14, %s3937_s9  ;;  %1300 = vrot.lane.b32.xlu1 %v1257_v62, %s3937_s9 }
 0x3ca   : > { %v4873_v31 = vpop.permute.xlu1 %1019  ;;  %v4875_v44 = vpop.permute.xlu0 %1014 }
 0x3cb   : > { %1304 = vrot.lane.b32.xlu1 %v1259_v20, %s3937_s9  ;;  %2227 = vperm.xlu0 %3762, %v4693_v34  }
 0x3ce   : > { %v4879_v58 = vpop.permute.xlu1 %1029  ;;  %v4881_v19 = vpop.permute.xlu0 %1024 }
 0x3cf   : > { %2099 = vperm.xlu1 %3763, %v4753_v59   ;;  %2235 = vperm.xlu0 %3762, %v4707_v55  }
 0x3d2   : > { %v4885_v14 = vpop.permute.xlu1 %1039  ;;  %v4887_v62 = vpop.permute.xlu0 %1034 }
 0x3d3   : > { %3764 = vset.pattern.permute.xlu1 %v6896_v28  ;;  %2243 = vperm.xlu0 %3762, %v4723_v29   ;;  %v3938_v28 = vmov 2  }
 0x3d4   : > { %2247 = vperm.xlu1 %3764, %v4745_v42  }
 0x3d6   : > { %v4892_v20 = vpop.permute.xlu1 %1049  ;;  %v4894_v23 = vpop.permute.xlu0 %1044 }
 0x3d7   : > { %2251 = vperm.xlu0 %3762, %v4739_v35  }
 0x3d8   : > { %2259 = vperm.xlu1 %3764, %v4753_v59  }
 0x3da   : > { %v4898_v54 = vpop.permute.xlu1 %1059  ;;  %v4900_v21 = vpop.permute.xlu0 %1054 }
 0x3db   : > { %2255 = vperm.xlu0 %3762, %v4759_v17  }
 0x3dc   : > { %1308 = vrot.lane.b32.xlu1 %v1261_v36, %s3937_s9 }
 0x3dd   : > { %3765 = vset.pattern.permute.xlu1 %v3938_v28 }
 0x3de   : > { %v4906_v30 = vpop.permute.xlu1 %1069  ;;  %v4908_v48 = vpop.permute.xlu0 %1064 }
 0x3df   : > { %6965 = vst [vmem:[#allocation80_spill] sm:$0xff] %v4906_v30  ;;  %6966 = vst [vmem:[#allocation81_spill] sm:$0xff] %v4908_v48  ;;  %3766 = vset.pattern.permute.xlu0 %v3938_v28 }
 0x3e2   : > { %v4910_v46 = vpop.permute.xlu1 %1079  ;;  %v4912_v10 = vpop.permute.xlu0 %1074 }
 0x3e3   : > { %6967 = vst [vmem:[#allocation82_spill] sm:$0xff] %v4910_v46 }
 0x3e6   : > { %v939_v39 = vpop.permute.xlu1 %938  ;;  %v941_v52 = vpop.permute.xlu0 %940 }
 0x3e7   : > { %v986_v61 = vsub.f32 %v4645_v37, %v939_v39  ;;  %v987_v26 = vsub.f32 %v4651_v41, %v941_v52 }
 0x3e9   : > { %1100 = vperm.xlu1 %3765, %v986_v61   ;;  %1105 = vperm.xlu0 %3766, %v987_v26  }
 0x3ea   : > { %v945_v36 = vpop.permute.xlu1 %944  ;;  %v943_v50 = vpop.permute.xlu0 %942 }
 0x3eb   : > { %v989_v18 = vsub.f32 %v4661_v43, %v945_v36  ;;  %v988_v3 = vsub.f32 %v4667_v9, %v943_v50 }
 0x3ed   : > { %1115 = vperm.xlu0 %3766, %v989_v18   ;;  %1110 = vperm.xlu1 %3765, %v988_v3  }
 0x3ee   : > { %v949_v28 = vpop.permute.xlu1 %948  ;;  %v947_v8 = vpop.permute.xlu0 %946 }
 0x3ef   : > { %v991_v46 = vsub.f32 %v4677_v1, %v949_v28  ;;  %v990_v57 = vsub.f32 %v4683_v13, %v947_v8 }
 0x3f1   : > { %1125 = vperm.xlu0 %3766, %v991_v46   ;;  %1120 = vperm.xlu1 %3765, %v990_v57  }
 0x3f2   : > { %v953_v39 = vpop.permute.xlu1 %952  ;;  %v951_v52 = vpop.permute.xlu0 %950 }
 0x3f3   : > { %v993_v61 = vsub.f32 %v4693_v34, %v953_v39  ;;  %v992_v26 = vsub.f32 %v4699_v25, %v951_v52 }
 0x3f5   : > { %1135 = vperm.xlu0 %3766, %v993_v61   ;;  %1130 = vperm.xlu1 %3765, %v992_v26  }
 0x3f6   : > { %v957_v36 = vpop.permute.xlu1 %956  ;;  %v955_v50 = vpop.permute.xlu0 %954 }
 0x3f7   : > { %v995_v3 = vsub.f32 %v4707_v55, %v957_v36  ;;  %v994_v18 = vsub.f32 %v4713_v24, %v955_v50 }
 0x3f9   : > { %1145 = vperm.xlu0 %3766, %v995_v3   ;;  %1140 = vperm.xlu1 %3765, %v994_v18  }
 0x3fa   : > { %v961_v28 = vpop.permute.xlu1 %960  ;;  %v959_v8 = vpop.permute.xlu0 %958 }
 0x3fb   : > { %v997_v46 = vsub.f32 %v4723_v29, %v961_v28  ;;  %v996_v57 = vsub.f32 %v4729_v32, %v959_v8 }
 0x3fd   : > { %1155 = vperm.xlu0 %3766, %v997_v46   ;;  %1150 = vperm.xlu1 %3765, %v996_v57  }
 0x3fe   : > { %v965_v39 = vpop.permute.xlu1 %964  ;;  %v963_v52 = vpop.permute.xlu0 %962 }
 0x3ff   : > { %v999_v61 = vsub.f32 %v4739_v35, %v965_v39  ;;  %v998_v26 = vsub.f32 %v4745_v42, %v963_v52 }
 0x401   : > { %1165 = vperm.xlu0 %3766, %v999_v61   ;;  %1160 = vperm.xlu1 %3765, %v998_v26  }
 0x402   : > { %v969_v36 = vpop.permute.xlu1 %968  ;;  %v967_v50 = vpop.permute.xlu0 %966 }
 0x403   : > { %v1001_v3 = vsub.f32 %v4753_v59, %v969_v36  ;;  %v1000_v18 = vsub.f32 %v4759_v17, %v967_v50 }
 0x405   : > { %1175 = vperm.xlu0 %3766, %v1001_v3   ;;  %1170 = vperm.xlu1 %3765, %v1000_v18  }
 0x40e   : > { %v4930_v28 = vpop.permute.xlu1 %1344  ;;  %v4932_v8 = vpop.permute.xlu0 %1349 }
 0x40f   : > { %6968 = vst [vmem:[#allocation83_spill] sm:$0xff] %v4932_v8 }
 0x412   : > { %v4934_v46 = vpop.permute.xlu1 %1354  ;;  %v4936_v57 = vpop.permute.xlu0 %1359 }
 0x413   : > { %6969 = vst [vmem:[#allocation84_spill] sm:$0xff] %v4936_v57 }
 0x416   : > { %v4938_v39 = vpop.permute.xlu1 %1364  ;;  %v4940_v52 = vpop.permute.xlu0 %1369 }
 0x417   : > { %6970 = vst [vmem:[#allocation85_spill] sm:$0xff] %v4940_v52 }
 0x41a   : > { %v4942_v61 = vpop.permute.xlu1 %1374  ;;  %v4944_v26 = vpop.permute.xlu0 %1379 }
 0x41b   : > { %6971 = vst [vmem:[#allocation86_spill] sm:$0xff] %v4944_v26 }
 0x41e   : > { %v4946_v36 = vpop.permute.xlu1 %1384  ;;  %v4948_v50 = vpop.permute.xlu0 %1389 }
 0x41f   : > { %6972 = vst [vmem:[#allocation87_spill] sm:$0xff] %v4946_v36  ;;  %6973 = vst [vmem:[#allocation88_spill] sm:$0xff] %v4948_v50 }
 0x422   : > { %v4950_v3 = vpop.permute.xlu1 %1394  ;;  %v4952_v18 = vpop.permute.xlu0 %1399 }
 0x423   : > { %6974 = vst [vmem:[#allocation89_spill] sm:$0xff] %v4950_v3  ;;  %6975 = vst [vmem:[#allocation90_spill] sm:$0xff] %v4952_v18 }
 0x426   : > { %v4954_v8 = vpop.permute.xlu1 %1404  ;;  %v4956_v11 = vpop.permute.xlu0 %1409 }
 0x427   : > { %6976 = vst [vmem:[#allocation91_spill] sm:$0xff] %v4954_v8  ;;  %6977 = vst [vmem:[#allocation92_spill] sm:$0xff] %v4956_v11 }
 0x42a   : > { %v4958_v57 = vpop.permute.xlu1 %1414  ;;  %v4960_v30 = vpop.permute.xlu0 %1419 }
 0x42b   : > { %6978 = vst [vmem:[#allocation93_spill] sm:$0xff] %v4958_v57  ;;  %6979 = vst [vmem:[#allocation94_spill] sm:$0xff] %v4960_v30 }
 0x42e   : > { %v1279_v52 = vpop.permute.xlu1 %1278  ;;  %v1283_v27 = vpop.permute.xlu0 %1282 }
 0x42f   : > { %v1326_v26 = vsub.f32 %v4645_v37, %v1279_v52  ;;  %v1328_v8 = vsub.f32 %v4667_v9, %v1283_v27 }
 0x431   : > { %1440 = vperm.xlu1 %3765, %v1326_v26  }
 0x432   : > { %v1281_v36 = vpop.permute.xlu1 %1280  ;;  %v1287_v22 = vpop.permute.xlu0 %1286 }
 0x433   : > { %v1327_v50 = vsub.f32 %v4651_v41, %v1281_v36  ;;  %v1330_v40 = vsub.f32 %v4683_v13, %v1287_v22 }
 0x435   : > { %1445 = vperm.xlu1 %3765, %v1327_v50  }
 0x436   : > { %v1285_v3 = vpop.permute.xlu1 %1284  ;;  %v1291_v18 = vpop.permute.xlu0 %1290 }
 0x437   : > { %v1329_v57 = vsub.f32 %v4661_v43, %v1285_v3  ;;  %v1332_v36 = vsub.f32 %v4699_v25, %v1291_v18 }
 0x439   : > { %1450 = vperm.xlu1 %3765, %v1328_v8  }
 0x43a   : > { %v1289_v11 = vpop.permute.xlu1 %1288  ;;  %v1295_v48 = vpop.permute.xlu0 %1294 }
 0x43b   : > { %v1331_v26 = vsub.f32 %v4677_v1, %v1289_v11  ;;  %v1334_v8 = vsub.f32 %v4713_v24, %v1295_v48 }
 0x43d   : > { %1455 = vperm.xlu1 %3765, %v1329_v57  }
 0x43e   : > { %v1293_v30 = vpop.permute.xlu1 %1292  ;;  %v1299_v37 = vpop.permute.xlu0 %1298 }
 0x43f   : > { %v1333_v27 = vsub.f32 %v4693_v34, %v1293_v30  ;;  %v1336_v1 = vsub.f32 %v4729_v32, %v1299_v37 }
 0x441   : > { %1460 = vperm.xlu1 %3765, %v1330_v40  }
 0x442   : > { %v1297_v52 = vpop.permute.xlu1 %1296  ;;  %v1303_v50 = vpop.permute.xlu0 %1302 }
 0x443   : > { %v1335_v11 = vsub.f32 %v4707_v55, %v1297_v52  ;;  %v1338_v24 = vsub.f32 %v4745_v42, %v1303_v50 }
 0x445   : > { %1465 = vperm.xlu1 %3765, %v1331_v26   ;;  %v1082_v26 = vmul.f32 %v4867_v38, %v4228_v7  ;;  %v1084_v38 = vmul.f32 %v4875_v44, %v4265_v60 }
 0x446   : > { %v1301_v41 = vpop.permute.xlu1 %1300  ;;  %v1307_v43 = vpop.permute.xlu0 %1306 }
 0x447   : > { %v1337_v34 = vsub.f32 %v4723_v29, %v1301_v41  ;;  %v1340_v32 = vsub.f32 %v4759_v17, %v1307_v43  ;;  %v1096_v43 = vmul.f32 %v4912_v10, %v4424_v16 }
 0x449   : > { %1470 = vperm.xlu1 %3765, %v1332_v36   ;;  %v1083_v36 = vmul.f32 %v4865_v33, %v4221_v2 }
 0x44a   : > { %v1305_v9 = vpop.permute.xlu1 %1304  ;;  %v4973_v40 = vpop.permute.xlu0 %2227 }
 0x44b   : > { %6981 = vst [vmem:[#allocation96_spill] sm:$0xff] %v4973_v40  ;;  %v1339_v55 = vsub.f32 %v4739_v35, %v1305_v9  ;;  %v1085_v9 = vmul.f32 %v4873_v31, %v4259_v53  ;;  %v1086_v53 = vmul.f32 %v4881_v19, %v4292_v56  ;;  %v1087_v31 = vmul.f32 %v4879_v58, %v4284_v5 }
 0x44c   : > { %v1088_v56 = vmul.f32 %v4887_v62, %v4331_v47  ;;  %v1089_v58 = vmul.f32 %v4885_v14, %v4319_v12  ;;  %v1090_v47 = vmul.f32 %v4894_v23, %v4338_v63  ;;  %v1422_v12 = vmul.f32 %v4930_v28, %v4225_v6 }
 0x44d   : > { %1475 = vperm.xlu1 %3765, %v1333_v27   ;;  %v1424_v6 = vmul.f32 %v4934_v46, %v4263_v51  ;;  %v1092_v28 = vmul.f32 %v4900_v21, %v4364_v15  ;;  %v1426_v51 = vmul.f32 %v4938_v39, %v4289_v45  ;;  %v1428_v21 = vmul.f32 %v4942_v61, %v4324_v4  ;;  %v6990_v4 = vld [vmem:[#allocation13_spill] sm:$0xff]  ;;  %v6991_v61 = vld [vmem:[#allocation87_spill] sm:$0xff] }
 0x44e   : > { %v4971_v22 = vpop.permute.xlu1 %2099  ;;  %v4979_v25 = vpop.permute.xlu0 %2235 }
 0x44f   : > { %6980 = vst [vmem:[#allocation95_spill] sm:$0xff] %v4971_v22  ;;  %6983 = vst [vmem:[#allocation98_spill] sm:$0xff] %v4979_v25 }
 0x451   : > { %1480 = vperm.xlu1 %3765, %v1334_v8  }
 0x452   : > { %v4984_v48 = vpop.permute.xlu0 %2243 }
 0x453   : > { %v4977_v13 = vpop.permute.xlu1 %2247  ;;  %6985 = vst [vmem:[#allocation100_spill] sm:$0xff] %v4984_v48 }
 0x454   : > { %6982 = vst [vmem:[#allocation97_spill] sm:$0xff] %v4977_v13 }
 0x455   : > { %1485 = vperm.xlu1 %3765, %v1335_v11  }
 0x456   : > { %v4988_v3 = vpop.permute.xlu0 %2251 }
 0x457   : > { %v4982_v30 = vpop.permute.xlu1 %2259  ;;  %6986 = vst [vmem:[#allocation101_spill] sm:$0xff] %v4988_v3 }
 0x458   : > { %6984 = vst [vmem:[#allocation99_spill] sm:$0xff] %v4982_v30 }
 0x459   : > { %1490 = vperm.xlu1 %3765, %v1336_v1  }
 0x45a   : > { %v4991_v37 = vpop.permute.xlu0 %2255 }
 0x45b   : > { %v1309_v57 = vpop.permute.xlu1 %1308  ;;  %6987 = vst [vmem:[#allocation102_spill] sm:$0xff] %v4991_v37 }
 0x45c   : > { %v1341_v29 = vsub.f32 %v4753_v59, %v1309_v57 }
 0x45d   : > { %1495 = vperm.xlu1 %3765, %v1337_v34  }
 0x461   : > { %1500 = vperm.xlu1 %3765, %v1338_v24   ;;  %v1091_v24 = vmul.f32 %v4892_v20, %v4346_v49 }
 0x465   : > { %1505 = vperm.xlu1 %3765, %v1339_v55  }
 0x468   : > { %v1101_v18 = vpop.permute.xlu1 %1100  ;;  %v1106_v35 = vpop.permute.xlu0 %1105 }
 0x469   : > { %1510 = vperm.xlu1 %3765, %v1340_v32   ;;  %v4996_v42 = vadd.f32 %v1101_v18, %v1082_v26  ;;  %v5002_v17 = vadd.f32 %v1106_v35, %v1083_v36  ;;  %v6988_v26 = vld [vmem:[#allocation22_spill] sm:$0xff]  ;;  %v6989_v35 = vld [vmem:[#allocation81_spill] sm:$0xff]  ;;  %v1430_v36 = vmul.f32 %v6991_v61, %v6990_v4 }
 0x46c   : > { %v1111_v52 = vpop.permute.xlu1 %1110  ;;  %v1116_v33 = vpop.permute.xlu0 %1115 }
 0x46d   : > { %1515 = vperm.xlu1 %3765, %v1341_v29   ;;  %v5012_v2 = vadd.f32 %v1111_v52, %v1084_v38  ;;  %v5022_v8 = vadd.f32 %v1116_v33, %v1085_v9  ;;  %v1093_v29 = vmul.f32 %v4898_v54, %v4369_v0  ;;  %v6992_v38 = vld [vmem:[#allocation20_spill] sm:$0xff] }
 0x46e   : > { %v6993_v33 = vld [vmem:[#allocation80_spill] sm:$0xff] }
 0x46f   : > { %v1095_v9 = vmul.f32 %v6993_v33, %v6992_v38  ;;  %v7005_v38 = vld [vmem:[#allocation84_spill] sm:$0xff] }
 0x470   : > { %v1121_v41 = vpop.permute.xlu1 %1120  ;;  %v1126_v16 = vpop.permute.xlu0 %1125 }
 0x471   : > { %1536 = vrot.lane.b32.xlu1 %v4996_v42, %s3939_s6  ;;  %v5038_v10 = vadd.f32 %v1121_v41, %v1086_v53  ;;  %v5044_v11 = vadd.f32 %v1126_v16, %v1087_v31  ;;  %v1094_v41 = vmul.f32 %v6989_v35, %v6988_v26  ;;  %v6994_v53 = vld [vmem:[#allocation16_spill] sm:$0xff]  ;;  %v6995_v16 = vld [vmem:[#allocation89_spill] sm:$0xff]  ;;  %v7002_v26 = vld [vmem:[#allocation23_spill] sm:$0xff] }
 0x472   : > { %v1432_v31 = vmul.f32 %v6995_v16, %v6994_v53  ;;  %v7003_v35 = vld [vmem:[#allocation93_spill] sm:$0xff]  ;;  %v7007_v16 = vld [vmem:[#allocation12_spill] sm:$0xff] }
 0x474   : > { %v1131_v50 = vpop.permute.xlu1 %1130  ;;  %v1136_v5 = vpop.permute.xlu0 %1135 }
 0x475   : > { %1538 = vrot.lane.b32.xlu1 %v5002_v17, %s3939_s6  ;;  %v5054_v19 = vadd.f32 %v1131_v50, %v1088_v56  ;;  %v5060_v1 = vadd.f32 %v1136_v5, %v1089_v58 }
 0x478   : > { %v1141_v59 = vpop.permute.xlu1 %1140  ;;  %v1146_v62 = vpop.permute.xlu0 %1145 }
 0x479   : > { %1899 = vrot.lane.b32.xlu1 %v4996_v42, %s3940_s26  ;;  %v5072_v14 = vadd.f32 %v1141_v59, %v1090_v47  ;;  %v5080_v57 = vadd.f32 %v1146_v62, %v1091_v24  ;;  %v6997_v62 = vld [vmem:[#allocation82_spill] sm:$0xff]  ;;  %v6998_v24 = vld [vmem:[#allocation19_spill] sm:$0xff] }
 0x47c   : > { %v1151_v7 = vpop.permute.xlu1 %1150  ;;  %v1156_v32 = vpop.permute.xlu0 %1155 }
 0x47d   : > { %1901 = vrot.lane.b32.xlu1 %v5002_v17, %s3940_s26  ;;  %v5106_v46 = vadd.f32 %v1151_v7, %v1092_v28  ;;  %v5116_v15 = vadd.f32 %v1156_v32, %v1093_v29  ;;  %v7000_v29 = vld [vmem:[#allocation10_spill] sm:$0xff] }
 0x480   : > { %v5014_v27 = vpop.permute.xlu1 %1160  ;;  %v1166_v59 = vpop.permute.xlu0 %1165 }
 0x481   : > { %1540 = vrot.lane.b32.xlu1 %v5012_v2, %s3939_s6  ;;  %v5139_v50 = vadd.f32 %v5014_v27, %v1094_v41  ;;  %v1436_v41 = vmul.f32 %v7003_v35, %v7002_v26  ;;  %v7016_v35 = vld [vmem:[#allocation17_spill] sm:$0xff] }
 0x484   : > { %v1171_v60 = vpop.permute.xlu1 %1170  ;;  %v1176_v58 = vpop.permute.xlu0 %1175 }
 0x485   : > { %v5024_v44 = vadd.f32 %v1171_v60, %v1096_v43  ;;  %1542 = vrot.lane.b32.xlu1 %v5022_v8, %s3939_s6  ;;  %v5149_v60 = vadd.f32 %v1166_v59, %v1095_v9 }
 0x487   : > { %1564 = vrot.lane.b32.xlu0 %v5024_v44, %s3939_s6 }
 0x489   : > { %1903 = vrot.lane.b32.xlu1 %v5012_v2, %s3940_s26 }
 0x48b   : > { %1927 = vrot.lane.b32.xlu0 %v5024_v44, %s3940_s26 }
 0x48d   : > { %1905 = vrot.lane.b32.xlu1 %v5022_v8, %s3940_s26 }
 0x491   : > { %1544 = vrot.lane.b32.xlu1 %v5038_v10, %s3939_s6 }
 0x495   : > { %1546 = vrot.lane.b32.xlu1 %v5044_v11, %s3939_s6 }
 0x499   : > { %1907 = vrot.lane.b32.xlu1 %v5038_v10, %s3940_s26 }
 0x49d   : > { %1909 = vrot.lane.b32.xlu1 %v5044_v11, %s3940_s26 }
 0x4a1   : > { %1548 = vrot.lane.b32.xlu1 %v5054_v19, %s3939_s6 }
 0x4a5   : > { %1550 = vrot.lane.b32.xlu1 %v5060_v1, %s3939_s6 }
 0x4a9   : > { %1911 = vrot.lane.b32.xlu1 %v5054_v19, %s3940_s26 }
 0x4ad   : > { %1913 = vrot.lane.b32.xlu1 %v5060_v1, %s3940_s26 }
 0x4b0   : > { %v1441_v34 = vpop.permute.xlu1 %1440 }
 0x4b1   : > { %v5076_v55 = vadd.f32 %v1441_v34, %v1422_v12  ;;  %1552 = vrot.lane.b32.xlu1 %v5072_v14, %s3939_s6  ;;  %v6996_v12 = vld [vmem:[#allocation24_spill] sm:$0xff] }
 0x4b2   : > { %v1097_v34 = vmul.f32 %v6997_v62, %v6996_v12  ;;  %v7010_v62 = vld [vmem:[#allocation15_spill] sm:$0xff] }
 0x4b3   : > { %1568 = vrot.lane.b32.xlu0 %v5076_v55, %s3939_s6 }
 0x4b4   : > { %v5084_v63 = vpop.permute.xlu1 %1445  ;;  %v5171_v28 = vadd.f32 %v1176_v58, %v1097_v34  ;;  %v7011_v34 = vld [vmem:[#allocation86_spill] sm:$0xff] }
 0x4b5   : > { %1554 = vrot.lane.b32.xlu1 %v5080_v57, %s3939_s6 }
 0x4b7   : > { %1931 = vrot.lane.b32.xlu0 %v5076_v55, %s3940_s26 }
 0x4b8   : > { %v1451_v49 = vpop.permute.xlu1 %1450 }
 0x4b9   : > { %v5092_v23 = vadd.f32 %v1451_v49, %v1424_v6  ;;  %1915 = vrot.lane.b32.xlu1 %v5072_v14, %s3940_s26  ;;  %v6999_v6 = vld [vmem:[#allocation91_spill] sm:$0xff] }
 0x4ba   : > { %v1434_v49 = vmul.f32 %v6999_v6, %v6998_v24  ;;  %v1429_v24 = vmul.f32 %v7011_v34, %v7010_v62 }
 0x4bb   : > { %1572 = vrot.lane.b32.xlu0 %v5092_v23, %s3939_s6 }
 0x4bc   : > { %v5098_v20 = vpop.permute.xlu1 %1455 }
 0x4bd   : > { %1917 = vrot.lane.b32.xlu1 %v5080_v57, %s3940_s26 }
 0x4bf   : > { %1935 = vrot.lane.b32.xlu0 %v5092_v23, %s3940_s26 }
 0x4c0   : > { %v1461_v18 = vpop.permute.xlu1 %1460 }
 0x4c1   : > { %v5112_v52 = vadd.f32 %v1461_v18, %v1426_v51  ;;  %1556 = vrot.lane.b32.xlu1 %v5106_v46, %s3939_s6 }
 0x4c3   : > { %1576 = vrot.lane.b32.xlu0 %v5112_v52, %s3939_s6 }
 0x4c4   : > { %v1466_v45 = vpop.permute.xlu1 %1465 }
 0x4c5   : > { %1558 = vrot.lane.b32.xlu1 %v5116_v15, %s3939_s6 }
 0x4c7   : > { %1939 = vrot.lane.b32.xlu0 %v5112_v52, %s3940_s26 }
 0x4c8   : > { %v1471_v0 = vpop.permute.xlu1 %1470 }
 0x4c9   : > { %v5126_v54 = vadd.f32 %v1471_v0, %v1428_v21  ;;  %1919 = vrot.lane.b32.xlu1 %v5106_v46, %s3940_s26  ;;  %v7001_v21 = vld [vmem:[#allocation83_spill] sm:$0xff] }
 0x4ca   : > { %v1423_v0 = vmul.f32 %v7001_v21, %v7000_v29  ;;  %v7014_v29 = vld [vmem:[#allocation88_spill] sm:$0xff] }
 0x4cb   : > { %1580 = vrot.lane.b32.xlu0 %v5126_v54, %s3939_s6 }
 0x4cc   : > { %v1476_v39 = vpop.permute.xlu1 %1475  ;;  %v5188_v4 = vadd.f32 %v5084_v63, %v1423_v0 }
 0x4cd   : > { %1921 = vrot.lane.b32.xlu1 %v5116_v15, %s3940_s26  ;;  %v5229_v6 = vadd.f32 %v1476_v39, %v1429_v24  ;;  %v7023_v24 = vld [vmem:[#allocation21_spill] sm:$0xff] }
 0x4cf   : > { %1943 = vrot.lane.b32.xlu0 %v5126_v54, %s3940_s26 }
 0x4d0   : > { %v1481_v7 = vpop.permute.xlu1 %1480 }
 0x4d1   : > { %v5145_v43 = vadd.f32 %v1481_v7, %v1430_v36  ;;  %1560 = vrot.lane.b32.xlu1 %v5139_v50, %s3939_s6  ;;  %v7004_v7 = vld [vmem:[#allocation11_spill] sm:$0xff] }
 0x4d2   : > { %v1425_v33 = vmul.f32 %v7005_v38, %v7004_v7 }
 0x4d3   : > { %1584 = vrot.lane.b32.xlu0 %v5145_v43, %s3939_s6 }
 0x4d4   : > { %v1486_v27 = vpop.permute.xlu1 %1485  ;;  %v5203_v63 = vadd.f32 %v5098_v20, %v1425_v33  ;;  %v7019_v33 = vld [vmem:[#allocation18_spill] sm:$0xff] }
 0x4d5   : > { %1562 = vrot.lane.b32.xlu1 %v5149_v60, %s3939_s6 }
 0x4d7   : > { %1947 = vrot.lane.b32.xlu0 %v5145_v43, %s3940_s26 }
 0x4d8   : > { %v1491_v56 = vpop.permute.xlu1 %1490 }
 0x4d9   : > { %v5159_v5 = vadd.f32 %v1491_v56, %v1432_v31  ;;  %1923 = vrot.lane.b32.xlu1 %v5139_v50, %s3940_s26  ;;  %v7008_v31 = vld [vmem:[#allocation85_spill] sm:$0xff] }
 0x4da   : > { %v1427_v56 = vmul.f32 %v7008_v31, %v7007_v16  ;;  %v7020_v16 = vld [vmem:[#allocation92_spill] sm:$0xff] }
 0x4db   : > { %1588 = vrot.lane.b32.xlu0 %v5159_v5, %s3939_s6  ;;  %v1435_v31 = vmul.f32 %v7020_v16, %v7019_v33  ;;  %v1534_v33 = vlaneseq }
 0x4dc   : > { %v1496_v47 = vpop.permute.xlu1 %1495  ;;  %v5217_v58 = vadd.f32 %v1466_v45, %v1427_v56 }
 0x4dd   : > { %1925 = vrot.lane.b32.xlu1 %v5149_v60, %s3940_s26  ;;  %v1639_v3 = vshrl.u32 %v1534_v33, 7 }
 0x4df   : > { %1951 = vrot.lane.b32.xlu0 %v5159_v5, %s3940_s26  ;;  %v1640_v25 = vsub.s32 0, %v1639_v3 }
 0x4e0   : > { %v1501_v51 = vpop.permute.xlu1 %1500 }
 0x4e1   : > { %v5175_v32 = vadd.f32 %v1501_v51, %v1434_v49  ;;  %1566 = vrot.lane.b32.xlu1 %v5171_v28, %s3939_s6  ;;  %v7013_v51 = vld [vmem:[#allocation14_spill] sm:$0xff] }
 0x4e2   : > { %v1431_v21 = vmul.f32 %v7014_v29, %v7013_v51  ;;  %v7024_v51 = vld [vmem:[#allocation94_spill] sm:$0xff] }
 0x4e3   : > { %1592 = vrot.lane.b32.xlu0 %v5175_v32, %s3939_s6  ;;  %v1437_v29 = vmul.f32 %v7024_v51, %v7023_v24  ;;  %v5293_v24 = vand.u32 127, %v1534_v33 }
 0x4e4   : > { %v1506_v18 = vpop.permute.xlu1 %1505  ;;  %v5241_v0 = vadd.f32 %v1486_v27, %v1431_v21 }
 0x4e5   : > { %1929 = vrot.lane.b32.xlu1 %v5171_v28, %s3940_s26  ;;  %v5265_v56 = vadd.f32 %v1506_v18, %v1435_v31  ;;  %v1996_v30 = vadd.s32 2, %v5293_v24  ;;  %vm1600_vm4 = vcmp.lt.s32.totalorder %v5293_v24, 2  ;;  %vm1963_vm5 = vcmp.lt.s32.totalorder %v5293_v24, 126 }
 0x4e7   : > { %1955 = vrot.lane.b32.xlu0 %v5175_v32, %s3940_s26  ;;  %vm1998_vm3 = vcmp.lt.s32.totalorder %v1996_v30, 128 }
 0x4e8   : > { %v1511_v61 = vpop.permute.xlu1 %1510 }
 0x4e9   : > { %v5192_v36 = vadd.f32 %v1511_v61, %v1436_v41  ;;  %1570 = vrot.lane.b32.xlu1 %v5188_v4, %s3939_s6  ;;  %v7017_v41 = vld [vmem:[#allocation90_spill] sm:$0xff] }
 0x4ea   : > { %v1433_v61 = vmul.f32 %v7017_v41, %v7016_v35 }
 0x4eb   : > { %1596 = vrot.lane.b32.xlu0 %v5192_v36, %s3939_s6 }
 0x4ec   : > { %v1516_v59 = vpop.permute.xlu1 %1515  ;;  %v5253_v7 = vadd.f32 %v1496_v47, %v1433_v61 }
 0x4ed   : > { %1933 = vrot.lane.b32.xlu1 %v5188_v4, %s3940_s26  ;;  %v5279_v21 = vadd.f32 %v1516_v59, %v1437_v29  ;;  %v1633_v29 = vadd.s32 4294967294, %v5293_v24 }
 0x4ef   : > { %1959 = vrot.lane.b32.xlu0 %v5192_v36, %s3940_s26  ;;  %vm1634_vm2 = vcmp.ge.s32.totalorder %v1633_v29, 0 }
 0x4f0   : > { %v5207_v9 = vpop.permute.xlu1 %1536 }
 0x4f1   : > { %1574 = vrot.lane.b32.xlu1 %v5203_v63, %s3939_s6 }
 0x4f4   : > { %v5211_v53 = vpop.permute.xlu1 %1538 }
 0x4f5   : > { %7006 = vst [vmem:[#allocation22_spill] sm:$0xff] %v5211_v53  ;;  %1937 = vrot.lane.b32.xlu1 %v5203_v63, %s3940_s26 }
 0x4f8   : > { %v5219_v20 = vpop.permute.xlu1 %1899 }
 0x4f9   : > { %1578 = vrot.lane.b32.xlu1 %v5217_v58, %s3939_s6  ;;  %v5271_v47 = vpop.permute.xlu0 %1564 }
 0x4fa   : > { %7021 = vst [vmem:[#allocation80_spill] sm:$0xff] %v5271_v47 }
 0x4fc   : > { %v5223_v12 = vpop.permute.xlu1 %1901 }
 0x4fd   : > { %7009 = vst [vmem:[#allocation81_spill] sm:$0xff] %v5223_v12  ;;  %1941 = vrot.lane.b32.xlu1 %v5217_v58, %s3940_s26  ;;  %v5283_v18 = vpop.permute.xlu0 %1927  ;;  %v7039_v12 = vld [vmem:[#allocation34_spill] sm:$0xff] }
 0x4fe   : > { %7025 = vst [vmem:[#allocation89_spill] sm:$0xff] %v5283_v18  ;;  %v7030_v18 = vmov 0   ;;  %v5347_v53 = vmul.f32 %v7039_v12, %v5038_v10  ;;  %v7048_v10 = vld [vmem:[#allocation44_spill] sm:$0xff] }
 0x500   : > { %v5231_v49 = vpop.permute.xlu1 %1540  ;;  %7040 = vst [vmem:[#allocation11_spill] sm:$0xff] %v5347_v53  ;;  %v5367_v53 = vmul.f32 %v7048_v10, %v5072_v14 }
 0x501   : > { %1582 = vrot.lane.b32.xlu1 %v5229_v6, %s3939_s6 }
 0x502   : > { %7049 = vst [vmem:[#allocation86_spill] sm:$0xff] %v5367_v53 }
 0x504   : > { %v5235_v45 = vpop.permute.xlu1 %1542 }
 0x505   : > { %7012 = vst [vmem:[#allocation13_spill] sm:$0xff] %v5235_v45  ;;  %1945 = vrot.lane.b32.xlu1 %v5229_v6, %s3940_s26 }
 0x508   : > { %v5243_v26 = vpop.permute.xlu1 %1903 }
 0x509   : > { %1586 = vrot.lane.b32.xlu1 %v5241_v0, %s3939_s6 }
 0x50c   : > { %v5247_v39 = vpop.permute.xlu1 %1905 }
 0x50d   : > { %7015 = vst [vmem:[#allocation87_spill] sm:$0xff] %v5247_v39  ;;  %1949 = vrot.lane.b32.xlu1 %v5241_v0, %s3940_s26  ;;  %v7037_v39 = vld [vmem:[#allocation60_spill] sm:$0xff] }
 0x50e   : > { %v5340_v47 = vmul.f32 %v7037_v39, %v5022_v8 }
 0x510   : > { %v5255_v38 = vpop.permute.xlu1 %1544  ;;  %7038 = vst [vmem:[#allocation93_spill] sm:$0xff] %v5340_v47 }
 0x511   : > { %1590 = vrot.lane.b32.xlu1 %v5253_v7, %s3939_s6 }
 0x514   : > { %v5259_v27 = vpop.permute.xlu1 %1546 }
 0x515   : > { %7018 = vst [vmem:[#allocation20_spill] sm:$0xff] %v5259_v27  ;;  %1953 = vrot.lane.b32.xlu1 %v5253_v7, %s3940_s26 }
 0x518   : > { %v5267_v62 = vpop.permute.xlu1 %1907 }
 0x519   : > { %1594 = vrot.lane.b32.xlu1 %v5265_v56, %s3939_s6 }
 0x51c   : > { %v5273_v34 = vpop.permute.xlu1 %1909 }
 0x51d   : > { %7022 = vst [vmem:[#allocation16_spill] sm:$0xff] %v5273_v34  ;;  %1957 = vrot.lane.b32.xlu1 %v5265_v56, %s3940_s26 }
 0x520   : > { %v5281_v35 = vpop.permute.xlu1 %1548 }
 0x521   : > { %1598 = vrot.lane.b32.xlu1 %v5279_v21, %s3939_s6 }
 0x524   : > { %v5287_v41 = vpop.permute.xlu1 %1550 }
 0x525   : > { %7026 = vst [vmem:[#allocation24_spill] sm:$0xff] %v5287_v41  ;;  %1961 = vrot.lane.b32.xlu1 %v5279_v21, %s3940_s26  ;;  %v1569_v61 = vpop.permute.xlu0 %1568  ;;  %v1637_v41 = vsel %vm1634_vm2, 1, %v7030_v18 }
 0x526   : > { %v5311_v13 = vrot.slane %v1637_v41, %v1640_v25  ;;  %v1601_v3 = vsel %vm1600_vm4, %v5207_v9, %v1569_v61  ;;  %v7033_v41 = vld [vmem:[#allocation26_spill] sm:$0xff] }
 0x528   : > { %v5291_v16 = vpop.permute.xlu1 %1911  ;;  %vm1642_vm6 = vcmp.eq.s32.totalorder %v5311_v13, 1 }
 0x529   : > { %v1932_v31 = vpop.permute.xlu0 %1931  ;;  %v1644_v8 = vsel %vm1642_vm6, %v1601_v3, 0.0  ;;  %v7053_v3 = vld [vmem:[#allocation50_spill] sm:$0xff] }
 0x52a   : > { %v1980_v45 = vsel %vm1963_vm5, %v1932_v31, %v5219_v20  ;;  %v1964_v14 = vsel %vm1963_vm5, %v5219_v20, %v1932_v31 }
 0x52c   : > { %v5295_v59 = vpop.permute.xlu1 %1913 }
 0x52d   : > { %7027 = vst [vmem:[#allocation82_spill] sm:$0xff] %v5295_v59  ;;  %v1573_v51 = vpop.permute.xlu0 %1572  ;;  %v2000_v59 = vsel %vm1998_vm3, 1, %v7030_v18  ;;  %v1835_v18 = vmul.f32 %v7033_v41, %v4996_v42  ;;  %v7041_v42 = vld [vmem:[#allocation61_spill] sm:$0xff] }
 0x52e   : > { %v5316_v33 = vrot.slane %v2000_v59, %v1640_v25  ;;  %v7034_v25 = vld [vmem:[#allocation59_spill] sm:$0xff] }
 0x52f   : > { %v5332_v59 = vmul.f32 %v7034_v25, %v5002_v17  ;;  %v5351_v17 = vmul.f32 %v7041_v42, %v5044_v11  ;;  %v7050_v11 = vld [vmem:[#allocation63_spill] sm:$0xff] }
 0x530   : > { %v5299_v22 = vpop.permute.xlu1 %1552  ;;  %vm2005_vm7 = vcmp.eq.s32.totalorder %v5316_v33, 1 }
 0x531   : > { %7028 = vst [vmem:[#allocation19_spill] sm:$0xff] %v5299_v22  ;;  %v5301_v37 = vpop.permute.xlu0 %1935  ;;  %7035 = vst [vmem:[#allocation23_spill] sm:$0xff] %v5332_v59  ;;  %v7043_v59 = vld [vmem:[#allocation38_spill] sm:$0xff] }
 0x532   : > { %7042 = vst [vmem:[#allocation84_spill] sm:$0xff] %v5351_v17  ;;  %v5371_v17 = vmul.f32 %v7050_v11, %v5080_v57  ;;  %v2007_v57 = vsel %vm2005_vm7, %v1980_v45, 0.0  ;;  %v1836_v45 = vmul.f32 %v7033_v41, %v5076_v55  ;;  %v7063_v55 = vld [vmem:[#allocation27_spill] sm:$0xff] }
 0x533   : > { %v2103_v41 = vmul.f32 %v7063_v55, %v2007_v57 }
 0x534   : > { %v5303_v48 = vpop.permute.xlu1 %1554  ;;  %7051 = vst [vmem:[#allocation14_spill] sm:$0xff] %v5371_v17  ;;  %v7057_v17 = vld [vmem:[#allocation70_spill] sm:$0xff] }
 0x535   : > { %7029 = vst [vmem:[#allocation91_spill] sm:$0xff] %v5303_v48  ;;  %v5305_v40 = vpop.permute.xlu0 %1576  ;;  %v7036_v48 = vld [vmem:[#allocation30_spill] sm:$0xff] }
 0x538   : > { %v5309_v34 = vpop.permute.xlu1 %1915 }
 0x539   : > { %7031 = vst [vmem:[#allocation10_spill] sm:$0xff] %v5309_v34  ;;  %v5313_v27 = vpop.permute.xlu0 %1939  ;;  %v7046_v34 = vld [vmem:[#allocation62_spill] sm:$0xff] }
 0x53a   : > { %v5363_v22 = vmul.f32 %v7046_v34, %v5060_v1  ;;  %v7055_v1 = vld [vmem:[#allocation64_spill] sm:$0xff] }
 0x53c   : > { %v5319_v30 = vpop.permute.xlu1 %1917  ;;  %7047 = vst [vmem:[#allocation15_spill] sm:$0xff] %v5363_v22  ;;  %v5384_v22 = vmul.f32 %v7055_v1, %v5116_v15  ;;  %v7060_v15 = vld [vmem:[#allocation46_spill] sm:$0xff] }
 0x53d   : > { %7032 = vst [vmem:[#allocation83_spill] sm:$0xff] %v5319_v30  ;;  %v5325_v29 = vpop.permute.xlu0 %1580  ;;  %v5336_v30 = vmul.f32 %v7036_v48, %v5012_v2  ;;  %v5355_v2 = vmul.f32 %v7043_v59, %v5054_v19  ;;  %v1617_v19 = vsel %vm1600_vm4, %v1569_v61, %v5207_v9  ;;  %v5393_v9 = vmul.f32 %v7057_v17, %v5139_v50  ;;  %v7058_v61 = vld [vmem:[#allocation65_spill] sm:$0xff] }
 0x53e   : > { %7056 = vst [vmem:[#allocation90_spill] sm:$0xff] %v5384_v22  ;;  %v5397_v53 = vmul.f32 %v7058_v61, %v5149_v60  ;;  %v1740_v22 = vmul.f32 %v7060_v15, %v1644_v8  ;;  %v1643_v50 = vsel %vm1642_vm6, %v1617_v19, 0.0  ;;  %v1619_v60 = vsel %vm1600_vm4, %v1573_v51, %v5231_v49 }
 0x53f   : > { %7044 = vst [vmem:[#allocation12_spill] sm:$0xff] %v5355_v2  ;;  %v2006_v8 = vsel %vm2005_vm7, %v1964_v14, 0.0  ;;  %v5428_v19 = vmul.f32 %v7037_v39, %v5203_v63  ;;  %v1739_v63 = vmul.f32 %v7060_v15, %v1643_v50  ;;  %v1968_v15 = vsel %vm1963_vm5, %v5267_v62, %v5313_v27 }
 0x540   : > { %v5359_v47 = vpop.permute.xlu1 %1556  ;;  %v1868_v39 = vadd.f32 %v1836_v45, %v1740_v22  ;;  %v7066_v45 = vld [vmem:[#allocation32_spill] sm:$0xff] }
 0x541   : > { %7045 = vst [vmem:[#allocation85_spill] sm:$0xff] %v5359_v47  ;;  %v5376_v2 = vpop.permute.xlu0 %1943  ;;  %v5380_v47 = vmul.f32 %v7053_v3, %v5106_v46  ;;  %v7059_v46 = vld [vmem:[#allocation78_spill] sm:$0xff] }
 0x542   : > { %7052 = vst [vmem:[#allocation88_spill] sm:$0xff] %v5376_v2  ;;  %v7061_v2 = vld [vmem:[#allocation66_spill] sm:$0xff]  ;;  %v2135_v22 = vadd.f32 %v2103_v41, %v1868_v39 }
 0x543   : > { %7054 = vst [vmem:[#allocation17_spill] sm:$0xff] %v5380_v47  ;;  %v5401_v47 = vmul.f32 %v7059_v46, %v5024_v44  ;;  %v5406_v20 = vmul.f32 %v7061_v2, %v5171_v28  ;;  %v5419_v44 = vmul.f32 %v7034_v25, %v5188_v4  ;;  %v1840_v28 = vmul.f32 %v7036_v48, %v5092_v23 }
 0x544   : > { %v5415_v31 = vpop.permute.xlu1 %1558  ;;  %v1603_v4 = vsel %vm1600_vm4, %v5231_v49, %v1573_v51  ;;  %v1966_v48 = vsel %vm1963_vm5, %v5243_v26, %v5301_v37  ;;  %v5443_v25 = vmul.f32 %v7041_v42, %v5217_v58  ;;  %v5454_v49 = vmul.f32 %v7046_v34, %v5229_v6 }
 0x545   : > { %7062 = vst [vmem:[#allocation18_spill] sm:$0xff] %v5406_v20  ;;  %v5432_v20 = vmul.f32 %v7039_v12, %v5112_v52  ;;  %v1585_v23 = vpop.permute.xlu0 %1584  ;;  %v1647_v52 = vsel %vm1642_vm6, %v1619_v60, 0.0  ;;  %v5450_v12 = vmul.f32 %v7043_v59, %v5126_v54  ;;  %v5458_v51 = vmul.f32 %v7048_v10, %v5145_v43  ;;  %v7064_v10 = vld [vmem:[#allocation53_spill] sm:$0xff] }
 0x546   : > { %v2102_v58 = vmul.f32 %v7063_v55, %v2006_v8  ;;  %v1648_v14 = vsel %vm1642_vm6, %v1603_v4, 0.0  ;;  %v1982_v54 = vsel %vm1963_vm5, %v5301_v37, %v5243_v26  ;;  %v2010_v6 = vsel %vm2005_vm7, %v1966_v48, 0.0 }
 0x547   : > { %v5473_v43 = vmul.f32 %v7050_v11, %v5241_v0  ;;  %v5477_v34 = vmul.f32 %v7053_v3, %v5159_v5  ;;  %v5481_v59 = vmul.f32 %v7055_v1, %v5253_v7  ;;  %v1743_v57 = vmul.f32 %v7064_v10, %v1647_v52  ;;  %v7065_v3 = vld [vmem:[#allocation67_spill] sm:$0xff] }
 0x548   : > { %v5461_v42 = vpop.permute.xlu1 %1919  ;;  %v5486_v37 = vmul.f32 %v7057_v17, %v5175_v32  ;;  %v5490_v26 = vmul.f32 %v7058_v61, %v5265_v56  ;;  %v1867_v0 = vadd.f32 %v1835_v18, %v1739_v63  ;;  %v1621_v5 = vsel %vm1600_vm4, %v5305_v40, %v5255_v38 }
 0x549   : > { %v1744_v11 = vmul.f32 %v7064_v10, %v1648_v14  ;;  %v2011_v7 = vsel %vm2005_vm7, %v1982_v54, 0.0  ;;  %v2106_v1 = vmul.f32 %v7065_v3, %v2010_v6  ;;  %v1605_v32 = vsel %vm1600_vm4, %v5255_v38, %v5305_v40  ;;  %v1948_v56 = vpop.permute.xlu0 %1947  ;;  %v7069_v63 = vld [vmem:[#allocation88_spill] sm:$0xff]  ;;  %v7070_v6 = vld [vmem:[#allocation69_spill] sm:$0xff] }
 0x54a   : > { %v5508_v18 = vmul.f32 %v7059_v46, %v5192_v36  ;;  %v5510_v61 = vadd.f32 %v2102_v58, %v1867_v0  ;;  %v2263_v50 = vmul.f32 %v7066_v45, %v2135_v22  ;;  %v1871_v60 = vadd.f32 %v5336_v30, %v1743_v57  ;;  %v7071_v0 = vld [vmem:[#allocation19_spill] sm:$0xff] }
 0x54b   : > { %v1651_v40 = vsel %vm1642_vm6, %v1621_v5, 0.0  ;;  %v1984_v36 = vsel %vm1963_vm5, %v5313_v27, %v5267_v62  ;;  %v1607_v38 = vsel %vm1600_vm4, %v5281_v35, %v5325_v29  ;;  %v5530_v46 = vmul.f32 %v7061_v2, %v5279_v21  ;;  %v7068_v21 = vld [vmem:[#allocation54_spill] sm:$0xff] }
 0x54c   : > { %v5504_v17 = vpop.permute.xlu1 %1921  ;;  %v2107_v8 = vmul.f32 %v7065_v3, %v2011_v7  ;;  %v1652_v30 = vsel %vm1642_vm6, %v1605_v32, 0.0  ;;  %vm2167_vm8 = vcmp.ge.f32.partialorder %v2135_v22, 0.0  ;;  %v1872_v55 = vadd.f32 %v1840_v28, %v1744_v11  ;;  %v7072_v7 = vld [vmem:[#allocation55_spill] sm:$0xff]  ;;  %v7073_v32 = vld [vmem:[#allocation36_spill] sm:$0xff] }
 0x54d   : > { %7067 = vst [vmem:[#allocation92_spill] sm:$0xff] %v5530_v46  ;;  %v5535_v41 = vadd.f32 %v2106_v1, %v1871_v60  ;;  %v2014_v27 = vsel %vm2005_vm7, %v1968_v15, 0.0  ;;  %v1623_v62 = vsel %vm1600_vm4, %v5325_v29, %v5281_v35  ;;  %v1747_v2 = vmul.f32 %v7068_v21, %v1651_v40  ;;  %v1589_v58 = vpop.permute.xlu0 %1588  ;;  %v7075_v40 = vld [vmem:[#allocation10_spill] sm:$0xff]  ;;  %v7103_v46 = vld [vmem:[#allocation28_spill] sm:$0xff] }
 0x54e   : > { %v2015_v48 = vsel %vm2005_vm7, %v1984_v36, 0.0  ;;  %v1656_v28 = vsel %vm1642_vm6, %v1607_v38, 0.0  ;;  %v1986_v39 = vsel %vm1963_vm5, %v7069_v63, %v5291_v16  ;;  %v5556_v52 = vmul.f32 %v7066_v45, %v5510_v61  ;;  %v7074_v45 = vld [vmem:[#allocation11_spill] sm:$0xff] }
 0x54f   : > { %v1748_v35 = vmul.f32 %v7068_v21, %v1652_v30  ;;  %v1970_v29 = vsel %vm1963_vm5, %v5291_v16, %v7069_v63  ;;  %v5563_v14 = vsel %vm2167_vm8, %v2135_v22, %v2263_v50  ;;  %v5565_v54 = vadd.f32 %v2107_v8, %v1872_v55 }
 0x550   : > { %v5543_v4 = vpop.permute.xlu1 %1560  ;;  %v2110_v10 = vmul.f32 %v7070_v6, %v2014_v27  ;;  %v1655_v57 = vsel %vm1642_vm6, %v1623_v62, 0.0  ;;  %v1609_v5 = vsel %vm1600_vm4, %v7071_v0, %v1585_v23  ;;  %v2111_v11 = vmul.f32 %v7070_v6, %v2015_v48  ;;  %v7076_v27 = vld [vmem:[#allocation71_spill] sm:$0xff]  ;;  %v7078_v6 = vld [vmem:[#allocation85_spill] sm:$0xff] }
 0x551   : > { %v1752_v3 = vmul.f32 %v7072_v7, %v1656_v28  ;;  %v2019_v16 = vsel %vm2005_vm7, %v1986_v39, 0.0  ;;  %v1625_v22 = vsel %vm1600_vm4, %v1585_v23, %v7071_v0  ;;  %v2266_v15 = vmul.f32 %v7073_v32, %v5535_v41  ;;  %v1952_v63 = vpop.permute.xlu0 %1951 }
 0x552   : > { %v1875_v50 = vadd.f32 %v7074_v45, %v1747_v2  ;;  %v2018_v60 = vsel %vm2005_vm7, %v1970_v29, 0.0  ;;  %v1988_v36 = vsel %vm1963_vm5, %v1948_v56, %v7075_v40  ;;  %vm2166_vm9 = vcmp.ge.f32.partialorder %v5510_v61, 0.0 }
 0x553   : > { %v1876_v38 = vadd.f32 %v5432_v20, %v1748_v35  ;;  %v1751_v23 = vmul.f32 %v7072_v7, %v1655_v57  ;;  %v1660_v8 = vsel %vm1642_vm6, %v1609_v5, 0.0  ;;  %v1972_v30 = vsel %vm1963_vm5, %v7075_v40, %v1948_v56  ;;  %v7077_v56 = vld [vmem:[#allocation56_spill] sm:$0xff] }
 0x554   : > { %v5580_v1 = vpop.permute.xlu1 %1562  ;;  %v2142_v55 = vadd.f32 %v2110_v10, %v1875_v50  ;;  %v2115_v62 = vmul.f32 %v7076_v27, %v2019_v16  ;;  %v1659_v21 = vsel %vm1642_vm6, %v1625_v22, 0.0  ;;  %vm2171_vm10 = vcmp.ge.f32.partialorder %v5565_v54, 0.0  ;;  %v7079_v57 = vld [vmem:[#allocation12_spill] sm:$0xff] }
 0x555   : > { %v2143_v2 = vadd.f32 %v2111_v11, %v1876_v38  ;;  %v1880_v20 = vadd.f32 %v5450_v12, %v1752_v3  ;;  %v2114_v48 = vmul.f32 %v7076_v27, %v2018_v60  ;;  %v2023_v28 = vsel %vm2005_vm7, %v1988_v36, 0.0  ;;  %v7080_v3 = vld [vmem:[#allocation73_spill] sm:$0xff]  ;;  %v7081_v36 = vld [vmem:[#allocation40_spill] sm:$0xff] }
 0x556   : > { %v1756_v35 = vmul.f32 %v7077_v56, %v1660_v8  ;;  %v2022_v29 = vsel %vm2005_vm7, %v1972_v30, 0.0  ;;  %v1611_v10 = vsel %vm1600_vm4, %v7078_v6, %v1589_v58  ;;  %v1627_v12 = vsel %vm1600_vm4, %v1589_v58, %v7078_v6  ;;  %v7082_v30 = vld [vmem:[#allocation86_spill] sm:$0xff] }
 0x557   : > { %v1879_v0 = vadd.f32 %v7079_v57, %v1751_v23  ;;  %v1755_v5 = vmul.f32 %v7077_v56, %v1659_v21  ;;  %v2267_v11 = vmul.f32 %v7073_v32, %v5565_v54  ;;  %vm2170_vm11 = vcmp.ge.f32.partialorder %v5535_v41, 0.0  ;;  %v7084_v56 = vld [vmem:[#allocation48_spill] sm:$0xff] }
 0x558   : > { %v5606_v39 = vpop.permute.xlu1 %1923  ;;  %v2147_v7 = vadd.f32 %v2115_v62, %v1880_v20  ;;  %v2119_v16 = vmul.f32 %v7080_v3, %v2023_v28  ;;  %v1974_v22 = vsel %vm1963_vm5, %v5461_v42, %v1952_v63  ;;  %v1990_v58 = vsel %vm1963_vm5, %v1952_v63, %v5461_v42  ;;  %v7083_v20 = vld [vmem:[#allocation57_spill] sm:$0xff]  ;;  %v1593_v63 = vpop.permute.xlu0 %1592 }
 0x559   : > { %v2146_v45 = vadd.f32 %v2114_v48, %v1879_v0  ;;  %v2118_v50 = vmul.f32 %v7080_v3, %v2022_v29  ;;  %v1663_v60 = vsel %vm1642_vm6, %v1627_v12, 0.0  ;;  %v1664_v32 = vsel %vm1642_vm6, %v1611_v10, 0.0  ;;  %v7086_v12 = vld [vmem:[#allocation75_spill] sm:$0xff] }
 0x55a   : > { %v2270_v38 = vmul.f32 %v7081_v36, %v2142_v55  ;;  %v1884_v23 = vadd.f32 %v5458_v51, %v1756_v35  ;;  %vm2175_vm12 = vcmp.ge.f32.partialorder %v2143_v2, 0.0  ;;  %v2271_v8 = vmul.f32 %v7081_v36, %v2143_v2 }
 0x55b   : > { %v1883_v42 = vadd.f32 %v7082_v30, %v1755_v5  ;;  %v2026_v27 = vsel %vm2005_vm7, %v1974_v22, 0.0  ;;  %v2027_v62 = vsel %vm2005_vm7, %v1990_v58, 0.0  ;;  %vm2174_vm13 = vcmp.ge.f32.partialorder %v2142_v55, 0.0  ;;  %v7089_v22 = vld [vmem:[#allocation52_spill] sm:$0xff] }
 0x55c   : > { %v5634_v40 = vpop.permute.xlu1 %1925  ;;  %v2151_v21 = vadd.f32 %v2119_v16, %v1884_v23  ;;  %v1759_v48 = vmul.f32 %v7083_v20, %v1663_v60  ;;  %v1760_v28 = vmul.f32 %v7083_v20, %v1664_v32  ;;  %v2275_v51 = vmul.f32 %v7084_v56, %v2147_v7 }
 0x55d   : > { %v2274_v35 = vmul.f32 %v7084_v56, %v2146_v45  ;;  %v2150_v29 = vadd.f32 %v2118_v50, %v1883_v42  ;;  %v5654_v10 = vsel %vm2166_vm9, %v5510_v61, %v5556_v52  ;;  %vm2179_vm14 = vcmp.ge.f32.partialorder %v2147_v7, 0.0  ;;  %v7090_v50 = vld [vmem:[#allocation17_spill] sm:$0xff]  ;;  %v7094_v56 = vld [vmem:[#allocation74_spill] sm:$0xff] }
 0x55e   : > { %v2122_v57 = vmul.f32 %v7086_v12, %v2026_v27  ;;  %v2123_v0 = vmul.f32 %v7086_v12, %v2027_v62  ;;  %v5660_v5 = vmul.f32 %v5563_v14, %v5563_v14  ;;  %vm2178_vm15 = vcmp.ge.f32.partialorder %v2146_v45, 0.0 }
 0x55f   : > { %v5665_v3 = vsel %vm2171_vm10, %v5565_v54, %v2267_v11  ;;  %v5670_v61 = vsel %vm2170_vm11, %v5535_v41, %v2266_v15  ;;  %v5673_v52 = vsel %vm2175_vm12, %v2143_v2, %v2271_v8  ;;  %v5676_v16 = vsel %vm2174_vm13, %v2142_v55, %v2270_v38 }
 0x560   : > { %v5648_v6 = vpop.permute.xlu1 %1566  ;;  %7087 = vst [vmem:[#allocation94_spill] sm:$0xff] %v5665_v3  ;;  %7088 = vst [vmem:[#allocation26_spill] sm:$0xff] %v5670_v61  ;;  %v2279_v58 = vmul.f32 %v7089_v22, %v2151_v21  ;;  %v1887_v60 = vadd.f32 %v7090_v50, %v1759_v48  ;;  %v1888_v32 = vadd.f32 %v5477_v34, %v1760_v28  ;;  %vm2182_vm0 = vcmp.ge.f32.partialorder %v2150_v29, 0.0  ;;  %v7096_v50 = vld [vmem:[#allocation25_spill] sm:$0xff] }
 0x561   : > { %7085 = vst [vmem:[#allocation21_spill] sm:$0xff] %v5648_v6  ;;  %v5681_v36 = vsel %vm2179_vm14, %v2147_v7, %v2275_v51  ;;  %v2278_v54 = vmul.f32 %v7089_v22, %v2150_v29  ;;  %v5686_v41 = vsel %vm2178_vm15, %v2146_v45, %v2274_v35  ;;  %vm2183_vm2 = vcmp.ge.f32.partialorder %v2151_v21, 0.0  ;;  %v1956_v7 = vpop.permute.xlu0 %1955 }
 0x562   : > { %v2154_v15 = vadd.f32 %v2122_v57, %v1887_v60  ;;  %v2155_v2 = vadd.f32 %v2123_v0, %v1888_v32  ;;  %v1613_v55 = vsel %vm1600_vm4, %v5543_v4, %v1593_v63  ;;  %v1629_v34 = vsel %vm1600_vm4, %v1593_v63, %v5543_v4 }
 0x563   : > { %v5696_v38 = vmul.f32 %v5654_v10, %v5654_v10  ;;  %v5700_v45 = vmul.f32 %v5665_v3, %v5665_v3  ;;  %v5704_v23 = vmul.f32 %v5670_v61, %v5670_v61  ;;  %v5708_v8 = vmul.f32 %v5673_v52, %v5673_v52 }
 0x564   : > { %v5684_v11 = vpop.permute.xlu1 %1929  ;;  %v5712_v4 = vmul.f32 %v5676_v16, %v5676_v16  ;;  %v5716_v30 = vmul.f32 %v5681_v36, %v5681_v36  ;;  %v5720_v42 = vmul.f32 %v5686_v41, %v5686_v41  ;;  %v5722_v27 = vsel %vm2183_vm2, %v2151_v21, %v2279_v58  ;;  %v7095_v21 = vld [vmem:[#allocation22_spill] sm:$0xff] }
 0x565   : > { %7091 = vst [vmem:[#allocation59_spill] sm:$0xff] %v5684_v11  ;;  %7092 = vst [vmem:[#allocation30_spill] sm:$0xff] %v5722_v27  ;;  %v1667_v62 = vsel %vm1642_vm6, %v1629_v34, 0.0  ;;  %v1668_v20 = vsel %vm1642_vm6, %v1613_v55, 0.0  ;;  %v1976_v48 = vsel %vm1963_vm5, %v5606_v39, %v1956_v7  ;;  %v5732_v63 = vsel %vm2182_vm0, %v2150_v29, %v2278_v54  ;;  %v7097_v54 = vld [vmem:[#allocation9_spill] sm:$0xff] }
 0x566   : > { %7093 = vst [vmem:[#allocation60_spill] sm:$0xff] %v5732_v63  ;;  %v2282_v51 = vmul.f32 %v7094_v56, %v2154_v15  ;;  %v2283_v35 = vmul.f32 %v7094_v56, %v2155_v2  ;;  %v1992_v0 = vsel %vm1963_vm5, %v1956_v7, %v5606_v39  ;;  %vm2187_vm3 = vcmp.ge.f32.partialorder %v2155_v2, 0.0  ;;  %v7098_v56 = vld [vmem:[#allocation81_spill] sm:$0xff] }
 0x567   : > { %vm2186_vm8 = vcmp.ge.f32.partialorder %v2154_v15, 0.0  ;;  %v2030_v58 = vsel %vm2005_vm7, %v1976_v48, 0.0  ;;  %v1763_v55 = vmul.f32 %v7097_v54, %v1667_v62  ;;  %v1764_v34 = vmul.f32 %v7097_v54, %v1668_v20 }
 0x568   : > { %v1571_v28 = vpop.permute.xlu1 %1570  ;;  %v5757_v7 = vmul.f32 %v5722_v27, %v5722_v27  ;;  %v2031_v48 = vsel %vm2005_vm7, %v1992_v0, 0.0  ;;  %v5771_v20 = vsel %vm2187_vm3, %v2155_v2, %v2283_v35  ;;  %v5779_v0 = vsel %vm2186_vm8, %v2154_v15, %v2282_v51  ;;  %v1597_v15 = vpop.permute.xlu0 %1596 }
 0x569   : > { %v1602_v12 = vsel %vm1600_vm4, %v7095_v21, %v1571_v28  ;;  %v1618_v57 = vsel %vm1600_vm4, %v1571_v28, %v7095_v21  ;;  %v5761_v28 = vmul.f32 %v5732_v63, %v5732_v63  ;;  %7099 = vst [vmem:[#allocation34_spill] sm:$0xff] %v5771_v20  ;;  %7101 = vst [vmem:[#allocation61_spill] sm:$0xff] %v5779_v0 }
 0x56a   : > { %v1645_v29 = vsel %vm1642_vm6, %v1618_v57, 0.0  ;;  %v1646_v22 = vsel %vm1642_vm6, %v1602_v12, 0.0  ;;  %v7100_v12 = vld [vmem:[#allocation77_spill] sm:$0xff]  ;;  %v1891_v35 = vadd.f32 %v5393_v9, %v1763_v55 }
 0x56b   : > { %v1741_v60 = vmul.f32 %v7096_v50, %v1645_v29  ;;  %v1742_v32 = vmul.f32 %v7096_v50, %v1646_v22  ;;  %v2126_v57 = vmul.f32 %v7100_v12, %v2030_v58  ;;  %v7102_v50 = vld [vmem:[#allocation23_spill] sm:$0xff]  ;;  %v1892_v58 = vadd.f32 %v5486_v37, %v1764_v34  ;;  %v7106_v34 = vld [vmem:[#allocation29_spill] sm:$0xff] }
 0x56c   : > { %v1934_v39 = vpop.permute.xlu1 %1933 }
 0x56d   : > { %v1965_v21 = vsel %vm1963_vm5, %v7098_v56, %v1934_v39  ;;  %v1981_v62 = vsel %vm1963_vm5, %v1934_v39, %v7098_v56  ;;  %v1869_v54 = vadd.f32 %v7102_v50, %v1741_v60  ;;  %v1870_v11 = vadd.f32 %v5419_v44, %v1742_v32 }
 0x56e   : > { %v2008_v29 = vsel %vm2005_vm7, %v1965_v21, 0.0  ;;  %v2009_v22 = vsel %vm2005_vm7, %v1981_v62, 0.0  ;;  %v2127_v39 = vmul.f32 %v7100_v12, %v2031_v48  ;;  %v5790_v21 = vmul.f32 %v5771_v20, %v5771_v20  ;;  %v7104_v62 = vld [vmem:[#allocation13_spill] sm:$0xff] }
 0x56f   : > { %v2104_v6 = vmul.f32 %v7103_v46, %v2008_v29  ;;  %v2105_v2 = vmul.f32 %v7103_v46, %v2009_v22  ;;  %v5798_v46 = vadd.f32 %v2126_v57, %v1891_v35  ;;  %v7107_v57 = vld [vmem:[#allocation80_spill] sm:$0xff] }
 0x570   : > { %v1575_v56 = vpop.permute.xlu1 %1574  ;;  %v5811_v29 = vadd.f32 %v2127_v39, %v1892_v58  ;;  %v1631_v22 = vsel %vm1600_vm4, %v1597_v15, %v7107_v57 }
 0x571   : > { %v2136_v51 = vadd.f32 %v2104_v6, %v1869_v54  ;;  %v2137_v60 = vadd.f32 %v2105_v2, %v1870_v11  ;;  %v1604_v44 = vsel %vm1600_vm4, %v7104_v62, %v1575_v56  ;;  %v1620_v9 = vsel %vm1600_vm4, %v1575_v56, %v7104_v62  ;;  %v7105_v11 = vld [vmem:[#allocation41_spill] sm:$0xff]  ;;  %v7109_v62 = vld [vmem:[#allocation87_spill] sm:$0xff] }
 0x572   : > { %v1649_v37 = vsel %vm1642_vm6, %v1620_v9, 0.0  ;;  %v1650_v32 = vsel %vm1642_vm6, %v1604_v44, 0.0  ;;  %v5806_v6 = vmul.f32 %v5779_v0, %v5779_v0  ;;  %v7108_v2 = vld [vmem:[#allocation93_spill] sm:$0xff]  ;;  %vm2191_vm15 = vcmp.ge.f32.partialorder %v5811_v29, 0.0 }
 0x573   : > { %v2264_v55 = vmul.f32 %v7105_v11, %v2136_v51  ;;  %v1745_v48 = vmul.f32 %v7106_v34, %v1649_v37  ;;  %v1746_v12 = vmul.f32 %v7106_v34, %v1650_v32  ;;  %vm2169_vm9 = vcmp.ge.f32.partialorder %v2137_v60, 0.0 }
 0x574   : > { %v1938_v50 = vpop.permute.xlu1 %1937  ;;  %v2265_v54 = vmul.f32 %v7105_v11, %v2137_v60  ;;  %vm2168_vm10 = vcmp.ge.f32.partialorder %v2136_v51, 0.0  ;;  %v7110_v11 = vld [vmem:[#allocation31_spill] sm:$0xff]  ;;  %vm2190_vm0 = vcmp.ge.f32.partialorder %v5798_v46, 0.0 }
 0x575   : > { %v1873_v35 = vadd.f32 %v7108_v2, %v1745_v48  ;;  %v1874_v56 = vadd.f32 %v5428_v19, %v1746_v12  ;;  %v1967_v44 = vsel %vm1963_vm5, %v7109_v62, %v1938_v50  ;;  %v1983_v58 = vsel %vm1963_vm5, %v1938_v50, %v7109_v62 }
 0x576   : > { %v2012_v39 = vsel %vm2005_vm7, %v1967_v44, 0.0  ;;  %v2013_v9 = vsel %vm2005_vm7, %v1983_v58, 0.0  ;;  %v5829_v37 = vsel %vm2169_vm9, %v2137_v60, %v2265_v54  ;;  %v5831_v32 = vsel %vm2168_vm10, %v2136_v51, %v2264_v55  ;;  %v7111_v44 = vld [vmem:[#allocation20_spill] sm:$0xff] }
 0x577   : > { %v2108_v19 = vmul.f32 %v7110_v11, %v2012_v39  ;;  %v2109_v34 = vmul.f32 %v7110_v11, %v2013_v9  ;;  %v3570_v48 = vpack.c.bf16 %v5829_v37, %v5563_v14  ;;  %v3572_v12 = vpack.c.bf16 %v5831_v32, %v5654_v10  ;;  %v7113_v11 = vld [vmem:[#allocation33_spill] sm:$0xff] }
 0x578   : > { %v1615_v50 = vsel %vm1600_vm4, %v7107_v57, %v1597_v15  ;;  %v1671_v60 = vsel %vm1642_vm6, %v1631_v22, 0.0  ;;  %v1579_v54 = vpop.permute.xlu1 %1578  ;;  %v2400_v51 = vmul.f32 %v5829_v37, %v5829_v37  ;;  %v2399_v55 = vmul.f32 %v5831_v32, %v5831_v32 }
 0x579   : > { %v2140_v2 = vadd.f32 %v2108_v19, %v1873_v35  ;;  %v2141_v62 = vadd.f32 %v2109_v34, %v1874_v56  ;;  %v1606_v58 = vsel %vm1600_vm4, %v7111_v44, %v1579_v54  ;;  %v1622_v15 = vsel %vm1600_vm4, %v1579_v54, %v7111_v44  ;;  %3571 = vmatprep.subr.bf16.mxu0 %v3570_v48  ;;  %v7112_v56 = vld [vmem:[#allocation43_spill] sm:$0xff]  ;;  %v7114_v48 = vld [vmem:[#allocation97_spill] sm:$0xff] }
 0x57a   : > { %v1653_v57 = vsel %vm1642_vm6, %v1622_v15, 0.0  ;;  %v1654_v22 = vsel %vm1642_vm6, %v1606_v58, 0.0  ;;  %3573 = vmatpush1.bf16.msra.mxu0 %v3572_v12  ;;  %v3602_v39 = vpack.c.bf16 %v2400_v51, %v5660_v5  ;;  %v3604_v35 = vpack.c.bf16 %v2399_v55, %v5696_v38  ;;  %v7115_v38 = vld [vmem:[#allocation84_spill] sm:$0xff] }
 0x57b   : > { %v2268_v9 = vmul.f32 %v7112_v56, %v2140_v2  ;;  %v1749_v19 = vmul.f32 %v7113_v11, %v1653_v57  ;;  %v1750_v34 = vmul.f32 %v7113_v11, %v1654_v22  ;;  %vm2173_vm11 = vcmp.ge.f32.partialorder %v2141_v62, 0.0  ;;  %v7116_v58 = vld [vmem:[#allocation16_spill] sm:$0xff] }
 0x57c   : > { %v5865_v54 = vmul.f32 %v7114_v48, %v5798_v46  ;;  %v1672_v44 = vsel %vm1642_vm6, %v1615_v50, 0.0  ;;  %3603 = vmatprep.subr.bf16.mxu1 %v3602_v39  ;;  %v1942_v12 = vpop.permute.xlu1 %1941  ;;  %v2269_v5 = vmul.f32 %v7112_v56, %v2141_v62  ;;  %vm2172_vm12 = vcmp.ge.f32.partialorder %v2140_v2, 0.0 }
 0x57d   : > { %v1877_v51 = vadd.f32 %v7115_v38, %v1749_v19  ;;  %v1878_v55 = vadd.f32 %v5443_v25, %v1750_v34  ;;  %3605 = vmatpush1.bf16.msra.mxu1 %v3604_v35  ;;  %v1969_v15 = vsel %vm1963_vm5, %v7116_v58, %v1942_v12  ;;  %v1985_v57 = vsel %vm1963_vm5, %v1942_v12, %v7116_v58  ;;  %v7117_v25 = vld [vmem:[#allocation35_spill] sm:$0xff]  ;;  %v7118_v38 = vld [vmem:[#allocation58_spill] sm:$0xff] }
 0x57e   : > { %v2016_v50 = vsel %vm2005_vm7, %v1969_v15, 0.0  ;;  %v2017_v22 = vsel %vm2005_vm7, %v1985_v57, 0.0  ;;  %v5882_v39 = vsel %vm2173_vm11, %v2141_v62, %v2269_v5  ;;  %v5884_v56 = vsel %vm2172_vm12, %v2140_v2, %v2268_v9  ;;  %v7119_v57 = vld [vmem:[#allocation24_spill] sm:$0xff] }
 0x57f   : > { %v2112_v35 = vmul.f32 %v7117_v25, %v2016_v50  ;;  %v2113_v11 = vmul.f32 %v7117_v25, %v2017_v22  ;;  %v3574_v19 = vpack.c.bf16 %v5882_v39, %v5665_v3  ;;  %v3576_v34 = vpack.c.bf16 %v5884_v56, %v5670_v61 }
 0x580   : > { %v5894_v12 = vmul.f32 %v7114_v48, %v5811_v29  ;;  %v1767_v58 = vmul.f32 %v7118_v38, %v1671_v60  ;;  %v1583_v62 = vpop.permute.xlu1 %1582  ;;  %v2404_v2 = vmul.f32 %v5882_v39, %v5882_v39  ;;  %v2403_v9 = vmul.f32 %v5884_v56, %v5884_v56 }
 0x581   : > { %v2144_v5 = vadd.f32 %v2112_v35, %v1877_v51  ;;  %v2145_v15 = vadd.f32 %v2113_v11, %v1878_v55  ;;  %v1608_v50 = vsel %vm1600_vm4, %v7119_v57, %v1583_v62  ;;  %v1624_v48 = vsel %vm1600_vm4, %v1583_v62, %v7119_v57  ;;  %3575 = vmatprep.subr.bf16.mxu0 %v3574_v19  ;;  %v7120_v55 = vld [vmem:[#allocation45_spill] sm:$0xff] }
 0x582   : > { %v1657_v60 = vsel %vm1642_vm6, %v1624_v48, 0.0  ;;  %v1658_v22 = vsel %vm1642_vm6, %v1608_v50, 0.0  ;;  %3577 = vmatpush1.bf16.msra.mxu0 %v3576_v34  ;;  %v3606_v25 = vpack.c.bf16 %v2404_v2, %v5700_v45  ;;  %v3608_v51 = vpack.c.bf16 %v2403_v9, %v5704_v23  ;;  %v7121_v11 = vld [vmem:[#allocation37_spill] sm:$0xff]  ;;  %v1960_v34 = vpop.permute.xlu0 %1959  ;;  %v7122_v45 = vld [vmem:[#allocation15_spill] sm:$0xff]  ;;  %v7123_v9 = vld [vmem:[#allocation82_spill] sm:$0xff] }
 0x583   : > { %v2272_v35 = vmul.f32 %v7120_v55, %v2144_v5  ;;  %v1753_v61 = vmul.f32 %v7121_v11, %v1657_v60  ;;  %v1754_v3 = vmul.f32 %v7121_v11, %v1658_v22  ;;  %vm2177_vm13 = vcmp.ge.f32.partialorder %v2145_v15, 0.0  ;;  %v7125_v11 = vld [vmem:[#allocation89_spill] sm:$0xff] }
 0x584   : > { %v1768_v19 = vmul.f32 %v7118_v38, %v1672_v44  ;;  %3607 = vmatprep.subr.bf16.mxu1 %v3606_v25  ;;  %v1946_v62 = vpop.permute.xlu1 %1945  ;;  %v2273_v57 = vmul.f32 %v7120_v55, %v2145_v15  ;;  %vm2176_vm14 = vcmp.ge.f32.partialorder %v2144_v5, 0.0  ;;  %v5942_v55 = vadd.f32 %v5401_v47, %v1767_v58 }
 0x585   : > { %v1881_v2 = vadd.f32 %v7122_v45, %v1753_v61  ;;  %v1882_v23 = vadd.f32 %v5454_v49, %v1754_v3  ;;  %3609 = vmatpush1.bf16.msra.mxu1 %v3608_v51  ;;  %v1971_v50 = vsel %vm1963_vm5, %v7123_v9, %v1946_v62  ;;  %v1987_v44 = vsel %vm1963_vm5, %v1946_v62, %v7123_v9  ;;  %v7124_v49 = vld [vmem:[#allocation39_spill] sm:$0xff] }
 0x586   : > { %v2020_v38 = vsel %vm2005_vm7, %v1971_v50, 0.0  ;;  %v2021_v48 = vsel %vm2005_vm7, %v1987_v44, 0.0  ;;  %v5931_v60 = vsel %vm2177_vm13, %v2145_v15, %v2273_v57  ;;  %v5933_v61 = vsel %vm2176_vm14, %v2144_v5, %v2272_v35  ;;  %v7126_v9 = vld [vmem:[#allocation91_spill] sm:$0xff] }
 0x587   : > { %v2116_v3 = vmul.f32 %v7124_v49, %v2020_v38  ;;  %v2117_v22 = vmul.f32 %v7124_v49, %v2021_v48  ;;  %v3578_v25 = vpack.c.bf16 %v5931_v60, %v5673_v52  ;;  %v3580_v51 = vpack.c.bf16 %v5933_v61, %v5676_v16  ;;  %v7128_v49 = vld [vmem:[#allocation42_spill] sm:$0xff] }
 0x588   : > { %v1978_v15 = vsel %vm1963_vm5, %v7125_v11, %v1960_v34  ;;  %v1587_v62 = vpop.permute.xlu1 %1586  ;;  %v2408_v5 = vmul.f32 %v5931_v60, %v5931_v60  ;;  %v2407_v35 = vmul.f32 %v5933_v61, %v5933_v61 }
 0x589   : > { %v2148_v57 = vadd.f32 %v2116_v3, %v1881_v2  ;;  %v2149_v45 = vadd.f32 %v2117_v22, %v1882_v23  ;;  %v1610_v47 = vsel %vm1600_vm4, %v7126_v9, %v1587_v62  ;;  %v1626_v58 = vsel %vm1600_vm4, %v1587_v62, %v7126_v9  ;;  %3579 = vmatprep.subr.bf16.mxu0 %v3578_v25  ;;  %v7127_v23 = vld [vmem:[#allocation96_spill] sm:$0xff] }
 0x58a   : > { %v1661_v50 = vsel %vm1642_vm6, %v1626_v58, 0.0  ;;  %v1662_v44 = vsel %vm1642_vm6, %v1610_v47, 0.0  ;;  %3581 = vmatpush1.bf16.msra.mxu0 %v3580_v51  ;;  %v3610_v38 = vpack.c.bf16 %v2408_v5, %v5708_v8  ;;  %v3612_v2 = vpack.c.bf16 %v2407_v35, %v5712_v4  ;;  %v7130_v4 = vld [vmem:[#allocation14_spill] sm:$0xff]  ;;  %v7131_v35 = vld [vmem:[#allocation83_spill] sm:$0xff] }
 0x58b   : > { %v2276_v48 = vmul.f32 %v7127_v23, %v2148_v57  ;;  %v1757_v3 = vmul.f32 %v7128_v49, %v1661_v50  ;;  %v1758_v22 = vmul.f32 %v7128_v49, %v1662_v44  ;;  %vm2181_vm2 = vcmp.ge.f32.partialorder %v2149_v45, 0.0 }
 0x58c   : > { %v1994_v25 = vsel %vm1963_vm5, %v1960_v34, %v7125_v11  ;;  %3611 = vmatprep.subr.bf16.mxu1 %v3610_v38  ;;  %v1950_v62 = vpop.permute.xlu1 %1949  ;;  %v2277_v9 = vmul.f32 %v7127_v23, %v2149_v45  ;;  %vm2180_vm3 = vcmp.ge.f32.partialorder %v2148_v57, 0.0  ;;  %v5975_v8 = vsel %vm2191_vm15, %v5811_v29, %v5894_v12 }
 0x58d   : > { %7129 = vst [vmem:[#allocation38_spill] sm:$0xff] %v5975_v8  ;;  %v1885_v51 = vadd.f32 %v7130_v4, %v1757_v3  ;;  %v1886_v5 = vadd.f32 %v5473_v43, %v1758_v22  ;;  %3613 = vmatpush1.bf16.msra.mxu1 %v3612_v2  ;;  %v1973_v34 = vsel %vm1963_vm5, %v7131_v35, %v1950_v62  ;;  %v7132_v43 = vld [vmem:[#allocation47_spill] sm:$0xff]  ;;  %v2034_v49 = vsel %vm2005_vm7, %v1978_v15, 0.0 }
 0x58e   : > { %v1989_v11 = vsel %vm1963_vm5, %v1950_v62, %v7131_v35  ;;  %v2024_v47 = vsel %vm2005_vm7, %v1973_v34, 0.0  ;;  %v5989_v12 = vsel %vm2181_vm2, %v2149_v45, %v2277_v9  ;;  %v5991_v58 = vsel %vm2180_vm3, %v2148_v57, %v2276_v48  ;;  %v7134_v35 = vld [vmem:[#allocation49_spill] sm:$0xff] }
 0x58f   : > { %v2025_v29 = vsel %vm2005_vm7, %v1989_v11, 0.0  ;;  %v2120_v50 = vmul.f32 %v7132_v43, %v2024_v47  ;;  %v3582_v38 = vpack.c.bf16 %v5989_v12, %v5681_v36  ;;  %v3584_v2 = vpack.c.bf16 %v5991_v58, %v5686_v41 }
 0x590   : > { %v2121_v44 = vmul.f32 %v7132_v43, %v2025_v29  ;;  %v1896_v23 = vadd.f32 %v5508_v18, %v1768_v19  ;;  %v1591_v3 = vpop.permute.xlu1 %1590  ;;  %v2412_v57 = vmul.f32 %v5989_v12, %v5989_v12  ;;  %v2411_v45 = vmul.f32 %v5991_v58, %v5991_v58 }
 0x591   : > { %v2152_v48 = vadd.f32 %v2120_v50, %v1885_v51  ;;  %v1612_v62 = vsel %vm1600_vm4, %v5415_v31, %v1591_v3  ;;  %v1628_v18 = vsel %vm1600_vm4, %v1591_v3, %v5415_v31  ;;  %3583 = vmatprep.subr.bf16.mxu0 %v3582_v38  ;;  %v7133_v51 = vld [vmem:[#allocation98_spill] sm:$0xff]  ;;  %v2035_v31 = vsel %vm2005_vm7, %v1994_v25, 0.0 }
 0x592   : > { %v2153_v22 = vadd.f32 %v2121_v44, %v1886_v5  ;;  %v1665_v19 = vsel %vm1642_vm6, %v1628_v18, 0.0  ;;  %v1666_v15 = vsel %vm1642_vm6, %v1612_v62, 0.0  ;;  %3585 = vmatpush1.bf16.msra.mxu0 %v3584_v2  ;;  %v3614_v9 = vpack.c.bf16 %v2412_v57, %v5716_v30  ;;  %v7138_v62 = vld [vmem:[#allocation79_spill] sm:$0xff] }
 0x593   : > { %v3616_v4 = vpack.c.bf16 %v2411_v45, %v5720_v42  ;;  %v2280_v5 = vmul.f32 %v7133_v51, %v2152_v48  ;;  %v1761_v34 = vmul.f32 %v7134_v35, %v1665_v19  ;;  %v1762_v11 = vmul.f32 %v7134_v35, %v1666_v15  ;;  %v7136_v42 = vld [vmem:[#allocation90_spill] sm:$0xff] }
 0x594   : > { %vm2185_vm8 = vcmp.ge.f32.partialorder %v2153_v22, 0.0  ;;  %3615 = vmatprep.subr.bf16.mxu1 %v3614_v9  ;;  %v1954_v47 = vpop.permute.xlu1 %1953  ;;  %v2281_v29 = vmul.f32 %v7133_v51, %v2153_v22  ;;  %vm2184_vm9 = vcmp.ge.f32.partialorder %v2152_v48, 0.0  ;;  %v6028_v30 = vsel %vm2190_vm0, %v5798_v46, %v5865_v54 }
 0x595   : > { %7135 = vst [vmem:[#allocation62_spill] sm:$0xff] %v6028_v30  ;;  %v1889_v43 = vadd.f32 %v7136_v42, %v1761_v34  ;;  %v1890_v50 = vadd.f32 %v5481_v59, %v1762_v11  ;;  %3617 = vmatpush1.bf16.msra.mxu1 %v3616_v4  ;;  %v1975_v25 = vsel %vm1963_vm5, %v5504_v17, %v1954_v47  ;;  %v7137_v59 = vld [vmem:[#allocation51_spill] sm:$0xff] }
 0x596   : > { %v1991_v44 = vsel %vm1963_vm5, %v1954_v47, %v5504_v17  ;;  %v2028_v38 = vsel %vm2005_vm7, %v1975_v25, 0.0  ;;  %v6042_v54 = vsel %vm2185_vm8, %v2153_v22, %v2281_v29  ;;  %v6044_v2 = vsel %vm2184_vm9, %v2152_v48, %v2280_v5  ;;  %v7140_v29 = vld [vmem:[#allocation68_spill] sm:$0xff] }
 0x597   : > { %v2029_v46 = vsel %vm2005_vm7, %v1991_v44, 0.0  ;;  %v2124_v3 = vmul.f32 %v7137_v59, %v2028_v38  ;;  %v3586_v45 = vpack.c.bf16 %v6042_v54, %v5722_v27  ;;  %v3588_v17 = vpack.c.bf16 %v6044_v2, %v5732_v63 }
 0x598   : > { %v2125_v57 = vmul.f32 %v7137_v59, %v2029_v46  ;;  %v2130_v18 = vmul.f32 %v7138_v62, %v2034_v49  ;;  %v2131_v19 = vmul.f32 %v7138_v62, %v2035_v31  ;;  %v1595_v15 = vpop.permute.xlu1 %1594  ;;  %v2416_v22 = vmul.f32 %v6042_v54, %v6042_v54  ;;  %v7139_v31 = vld [vmem:[#allocation100_spill] sm:$0xff] }
 0x599   : > { %v2415_v48 = vmul.f32 %v6044_v2, %v6044_v2  ;;  %v2156_v9 = vadd.f32 %v2124_v3, %v1889_v43  ;;  %v1614_v51 = vsel %vm1600_vm4, %v5580_v1, %v1595_v15  ;;  %v1630_v5 = vsel %vm1600_vm4, %v1595_v15, %v5580_v1  ;;  %3587 = vmatprep.subr.bf16.mxu0 %v3586_v45 }
 0x59a   : > { %v2157_v4 = vadd.f32 %v2125_v57, %v1890_v50  ;;  %v1669_v49 = vsel %vm1642_vm6, %v1630_v5, 0.0  ;;  %v1670_v35 = vsel %vm1642_vm6, %v1614_v51, 0.0  ;;  %3589 = vmatpush1.bf16.msra.mxu0 %v3588_v17  ;;  %v3618_v34 = vpack.c.bf16 %v2416_v22, %v5757_v7  ;;  %v7144_v17 = vld [vmem:[#allocation102_spill] sm:$0xff] }
 0x59b   : > { %v3620_v11 = vpack.c.bf16 %v2415_v48, %v5761_v28  ;;  %v2284_v47 = vmul.f32 %v7139_v31, %v2156_v9  ;;  %v1765_v42 = vmul.f32 %v7140_v29, %v1669_v49  ;;  %v1766_v43 = vmul.f32 %v7140_v29, %v1670_v35 }
 0x59c   : > { %vm2189_vm10 = vcmp.ge.f32.partialorder %v2157_v4, 0.0  ;;  %v6074_v1 = vadd.f32 %v2130_v18, %v5942_v55  ;;  %v6076_v50 = vadd.f32 %v2131_v19, %v1896_v23  ;;  %3619 = vmatprep.subr.bf16.mxu1 %v3618_v34  ;;  %v1958_v25 = vpop.permute.xlu1 %1957  ;;  %v2285_v44 = vmul.f32 %v7139_v31, %v2157_v4 }
 0x59d   : > { %vm2188_vm11 = vcmp.ge.f32.partialorder %v2156_v9, 0.0  ;;  %v1893_v7 = vadd.f32 %v5397_v53, %v1765_v42  ;;  %v1894_v28 = vadd.f32 %v5490_v26, %v1766_v43  ;;  %3621 = vmatpush1.bf16.msra.mxu1 %v3620_v11  ;;  %v1977_v38 = vsel %vm1963_vm5, %v5634_v40, %v1958_v25  ;;  %v7143_v26 = vld [vmem:[#allocation72_spill] sm:$0xff]  ;;  %v7146_v11 = vld [vmem:[#allocation101_spill] sm:$0xff] }
 0x59e   : > { %v1993_v55 = vsel %vm1963_vm5, %v1958_v25, %v5634_v40  ;;  %v2032_v23 = vsel %vm2005_vm7, %v1977_v38, 0.0  ;;  %v6091_v59 = vsel %vm2189_vm10, %v2157_v4, %v2285_v44  ;;  %v6093_v53 = vsel %vm2188_vm11, %v2156_v9, %v2284_v47  ;;  %v7145_v9 = vld [vmem:[#allocation21_spill] sm:$0xff]  ;;  %v7147_v47 = vld [vmem:[#allocation76_spill] sm:$0xff] }
 0x59f   : > { %v2033_v46 = vsel %vm2005_vm7, %v1993_v55, 0.0  ;;  %7141 = vst [vmem:[#allocation44_spill] sm:$0xff] %v6091_v59  ;;  %7142 = vst [vmem:[#allocation63_spill] sm:$0xff] %v6093_v53  ;;  %v2128_v3 = vmul.f32 %v7143_v26, %v2032_v23  ;;  %v3590_v45 = vpack.c.bf16 %v6091_v59, %v5771_v20  ;;  %v3592_v40 = vpack.c.bf16 %v6093_v53, %v5779_v0 }
 0x5a0   : > { %v2129_v57 = vmul.f32 %v7143_v26, %v2033_v46  ;;  %vm2194_vm12 = vcmp.ge.f32.partialorder %v6074_v1, 0.0  ;;  %v2290_v62 = vmul.f32 %v7144_v17, %v6074_v1  ;;  %v1599_v18 = vpop.permute.xlu1 %1598  ;;  %v2420_v19 = vmul.f32 %v6091_v59, %v6091_v59 }
 0x5a1   : > { %v2419_v15 = vmul.f32 %v6093_v53, %v6093_v53  ;;  %v2160_v22 = vadd.f32 %v2128_v3, %v1893_v7  ;;  %v1616_v4 = vsel %vm1600_vm4, %v7145_v9, %v1599_v18  ;;  %v1632_v51 = vsel %vm1600_vm4, %v1599_v18, %v7145_v9  ;;  %3591 = vmatprep.subr.bf16.mxu0 %v3590_v45 }
 0x5a2   : > { %v2161_v48 = vadd.f32 %v2129_v57, %v1894_v28  ;;  %v1673_v5 = vsel %vm1642_vm6, %v1632_v51, 0.0  ;;  %v1674_v49 = vsel %vm1642_vm6, %v1616_v4, 0.0  ;;  %3593 = vmatpush1.bf16.msra.mxu0 %v3592_v40  ;;  %v3622_v35 = vpack.c.bf16 %v2420_v19, %v5790_v21  ;;  %v7148_v21 = vld [vmem:[#allocation18_spill] sm:$0xff]  ;;  %v7150_v28 = vld [vmem:[#allocation59_spill] sm:$0xff] }
 0x5a3   : > { %v3624_v34 = vpack.c.bf16 %v2419_v15, %v5806_v6  ;;  %v2288_v31 = vmul.f32 %v7146_v11, %v2160_v22  ;;  %v1769_v29 = vmul.f32 %v7147_v47, %v1673_v5  ;;  %v1770_v42 = vmul.f32 %v7147_v47, %v1674_v49  ;;  %v7149_v6 = vld [vmem:[#allocation92_spill] sm:$0xff]  ;;  %v7153_v57 = vld [vmem:[#allocation95_spill] sm:$0xff] }
 0x5a4   : > { %vm2193_vm13 = vcmp.ge.f32.partialorder %v2161_v48, 0.0  ;;  %v2291_v43 = vmul.f32 %v7144_v17, %v6076_v50  ;;  %3623 = vmatprep.subr.bf16.mxu1 %v3622_v35  ;;  %v1962_v25 = vpop.permute.xlu1 %1961  ;;  %v2289_v13 = vmul.f32 %v7146_v11, %v2161_v48  ;;  %vm2192_vm4 = vcmp.ge.f32.partialorder %v2160_v22, 0.0  ;;  %v7156_v49 = vld [vmem:[#allocation99_spill] sm:$0xff] }
 0x5a5   : > { %vm2195_vm6 = vcmp.ge.f32.partialorder %v6076_v50, 0.0  ;;  %v1897_v44 = vadd.f32 %v7148_v21, %v1769_v29  ;;  %v1898_v7 = vadd.f32 %v7149_v6, %v1770_v42  ;;  %3625 = vmatpush1.bf16.msra.mxu1 %v3624_v34  ;;  %v1979_v38 = vsel %vm1963_vm5, %v7150_v28, %v1962_v25 }
 0x5a6   : > { %v1995_v55 = vsel %vm1963_vm5, %v1962_v25, %v7150_v28  ;;  %v2036_v23 = vsel %vm2005_vm7, %v1979_v38, 0.0  ;;  %v6139_v26 = vsel %vm2193_vm13, %v2161_v48, %v2289_v13  ;;  %v6141_v3 = vsel %vm2192_vm4, %v2160_v22, %v2288_v31 }
 0x5a7   : > { %v2037_v46 = vsel %vm2005_vm7, %v1995_v55, 0.0  ;;  %7151 = vst [vmem:[#allocation50_spill] sm:$0xff] %v6139_v26  ;;  %7152 = vst [vmem:[#allocation64_spill] sm:$0xff] %v6141_v3  ;;  %v2132_v45 = vmul.f32 %v7153_v57, %v2036_v23  ;;  %v3594_v17 = vpack.c.bf16 %v6139_v26, %v5975_v8  ;;  %v3596_v24 = vpack.c.bf16 %v6141_v3, %v6028_v30 }
 0x5a8   : > { %v2133_v40 = vmul.f32 %v7153_v57, %v2037_v46  ;;  %v2422_v18 = vmul.f32 %v5975_v8, %v5975_v8  ;;  %v2424_v33 = vmul.f32 %v6139_v26, %v6139_v26  ;;  %v2421_v19 = vmul.f32 %v6028_v30, %v6028_v30 }
 0x5a9   : > { %v2423_v15 = vmul.f32 %v6141_v3, %v6141_v3  ;;  %v2164_v22 = vadd.f32 %v2132_v45, %v1897_v44  ;;  %3595 = vmatprep.subr.bf16.mxu0 %v3594_v17  ;;  %v6160_v51 = vsel %vm2195_vm6, %v6076_v50, %v2291_v43  ;;  %v6165_v5 = vsel %vm2194_vm12, %v6074_v1, %v2290_v62 }
 0x5aa   : > { %v2165_v48 = vadd.f32 %v2133_v40, %v1898_v7  ;;  %3597 = vmatpush1.bf16.msra.mxu0 %v3596_v24  ;;  %v3626_v9 = vpack.c.bf16 %v2424_v33, %v2422_v18  ;;  %7154 = vst [vmem:[#allocation70_spill] sm:$0xff] %v6160_v51  ;;  %7155 = vst [vmem:[#allocation65_spill] sm:$0xff] %v6165_v5  ;;  %v2426_v50 = vmul.f32 %v6160_v51, %v6160_v51  ;;  %v7159_v13 = vmov 1.0  }
 0x5ab   : > { %v3628_v4 = vpack.c.bf16 %v2423_v15, %v2421_v19  ;;  %v2292_v35 = vmul.f32 %v7156_v49, %v2164_v22  ;;  %vm2196_vm7 = vcmp.ge.f32.partialorder %v2164_v22, 0.0  ;;  %v2425_v47 = vmul.f32 %v6165_v5, %v6165_v5 }
 0x5ac   : > { %vm2197_vm5 = vcmp.ge.f32.partialorder %v2165_v48, 0.0  ;;  %v2293_v34 = vmul.f32 %v7156_v49, %v2165_v48  ;;  %3627 = vmatprep.subr.bf16.mxu1 %v3626_v9  ;;  %v7160_v21 = vmov 0  }
 0x5ad   : > { %3629 = vmatpush1.bf16.msra.mxu1 %v3628_v4  ;;  %v6171_v31 = vsel %vm2196_vm7, %v2164_v22, %v2292_v35  ;;  %v3941_v35 = vmov 4  }
 0x5ae   : > { %v6169_v11 = vsel %vm2197_vm5, %v2165_v48, %v2293_v34  ;;  %7158 = vst [vmem:[#allocation46_spill] sm:$0xff] %v6171_v31  ;;  %v3600_v62 = vpack.c.bf16 %v6171_v31, %v6165_v5  ;;  %v2427_v42 = vmul.f32 %v6171_v31, %v6171_v31  ;;  %3768 = vset.pattern.permute.xlu0 %v3941_v35 }
 0x5af   : > { %7157 = vst [vmem:[#allocation78_spill] sm:$0xff] %v6169_v11  ;;  %v3598_v1 = vpack.c.bf16 %v6169_v11, %v6160_v51  ;;  %v2428_v29 = vmul.f32 %v6169_v11, %v6169_v11  ;;  %3767 = vset.pattern.permute.xlu1 %v3941_v35  ;;  %v6259_v35 = vld [vmem:[%s6751_s2 + $0x38] sm:$0xff] }
 0x5b0   : > { %v3632_v25 = vpack.c.bf16 %v2427_v42, %v2425_v47 }
 0x5b1   : > { %3599 = vmatprep.subr.bf16.mxu0 %v3598_v1  ;;  %v3630_v43 = vpack.c.bf16 %v2428_v29, %v2426_v50 }
 0x5b2   : > { %3601 = vmatpush1.bf16.msra.mxu0 %v3600_v62 }
 0x5b3   : > { %3631 = vmatprep.subr.bf16.mxu1 %v3630_v43 }
 0x5b4   : > { %3633 = vmatpush1.bf16.msra.mxu1 %v3632_v25 }
 0x5b5   : > { %2391 = vmatmul.mubr.f32.vlgmr.msra.gmra.mrb[16].mxu0 %v7159_v13 }
 0x5b6   : > { %3256 = vmatprep.mubr.bf16.mxu0 %v7160_v21 }
 0x5b7   : > { %2494 = vmatmul.mubr.f32.vlgmr.msra.gmra.mrb[20].mxu1 %v7159_v13 }
 0x688   : > { %v2392_v44 = vpop.f32.mrb[16].mxu0 }
 0x689   : > { %v2500_v6 = vsel %vm853_vm1, %v2392_v44, 0.0  ;;  %v2394_v7 = vpop.f32.mrb[17].mxu0 }
 0x68a   : > { %v2495_v28 = vpop.f32.mrb[20].mxu1  ;;  %2501 = vadd.xlane.f32.xlu0 %v2500_v6  ;;  %v2840_v23 = vsel %vm853_vm1, %v2394_v7, 0.0 }
 0x68b   : > { %v2513_v38 = vsel %vm853_vm1, %v2495_v28, 0.0  ;;  %v2497_v55 = vpop.f32.mrb[21].mxu1 }
 0x68c   : > { %2514 = vadd.xlane.f32.xlu1 %v2513_v38  ;;  %v2853_v46 = vsel %vm853_vm1, %v2497_v55, 0.0 }
 0x68e   : > { %2841 = vadd.xlane.f32.xlu0 %v2840_v23 }
 0x692   : > { %2854 = vadd.xlane.f32.xlu0 %v2853_v46  ;;  %v6207_v46 = vld [vmem:[%s6751_s2] sm:$0xff] }
 0x717   : > { %v2502_v57 = vpop.xlane.xlu0 %2501 }
 0x718   : > { %v2503_v45 = vrot.slane %v2502_v57, 4 }
 0x719   : > { %v2515_v40 = vpop.xlane.xlu1 %2514 }
 0x71a   : > { %v2504_v17 = vadd.f32 %v2503_v45, %v2502_v57  ;;  %v2516_v24 = vrot.slane %v2515_v40, 4  ;;  %v6214_v45 = vld [vmem:[%s6751_s2 + $0x8] sm:$0xff] }
 0x71b   : > { %v2842_v34 = vpop.xlane.xlu0 %2841 }
 0x71c   : > { %v2505_v18 = vrot.slane %v2504_v17, 2  ;;  %v2517_v33 = vadd.f32 %v2516_v24, %v2515_v40  ;;  %v2843_v47 = vrot.slane %v2842_v34, 4 }
 0x71e   : > { %v2506_v19 = vadd.f32 %v2505_v18, %v2504_v17  ;;  %v2518_v15 = vrot.slane %v2517_v33, 2  ;;  %v2844_v62 = vadd.f32 %v2843_v47, %v2842_v34  ;;  %v6223_v17 = vld [vmem:[%s6751_s2 + $0x10] sm:$0xff]  ;;  %v6230_v18 = vld [vmem:[%s6751_s2 + $0x18] sm:$0xff] }
 0x71f   : > { %v2855_v50 = vpop.xlane.xlu0 %2854 }
 0x720   : > { %v2507_v22 = vrot.slane %v2506_v19, 1  ;;  %v2519_v48 = vadd.f32 %v2518_v15, %v2517_v33  ;;  %v2856_v1 = vrot.slane %v2855_v50, 4  ;;  %v2845_v42 = vrot.slane %v2844_v62, 2 }
 0x722   : > { %v2508_v9 = vadd.f32 %v2507_v22, %v2506_v19  ;;  %v2520_v4 = vrot.slane %v2519_v48, 1  ;;  %v2857_v29 = vadd.f32 %v2856_v1, %v2855_v50  ;;  %v2846_v13 = vadd.f32 %v2845_v42, %v2844_v62  ;;  %v6238_v19 = vld [vmem:[%s6751_s2 + $0x20] sm:$0xff]  ;;  %v6245_v22 = vld [vmem:[%s6751_s2 + $0x28] sm:$0xff] }
 0x723   : > { %v6268_v50 = vld [vmem:[%s6751_s2 + $0x40] sm:$0xff]  ;;  %v6275_v1 = vld [vmem:[%s6751_s2 + $0x48] sm:$0xff] }
 0x724   : > { %3651 = vpush %v2508_v9  ;;  %v2521_v49 = vadd.f32 %v2520_v4, %v2519_v48  ;;  %v2858_v43 = vrot.slane %v2857_v29, 2  ;;  %v2847_v6 = vrot.slane %v2846_v13, 1  ;;  %v6252_v4 = vld [vmem:[%s6751_s2 + $0x30] sm:$0xff] }
 0x726   : > { %3653 = vpush %v2521_v49  ;;  %v2859_v44 = vadd.f32 %v2858_v43, %v2857_v29  ;;  %v2848_v38 = vadd.f32 %v2847_v6, %v2846_v13 }
 0x728   : > { %v2860_v7 = vrot.slane %v2859_v44, 1 }
 0x72a   : > { %v2861_v55 = vadd.f32 %v2860_v7, %v2859_v44 }
 0x755   : > { %s3652_s10 = spop %3651 }
 0x756   : > { %s6192_s11 = smul.f32 6.1035156e-05, %s3652_s10 }
 0x757   : > { %s3654_s15 = spop %3653 }
 0x758   : > { %s2526_s16 = smul.f32 %s6192_s11, %s6192_s11 }
 0x759   : > { %s2525_s23 = smul.f32 6.1035156e-05, %s3654_s15 }
 0x75b   : > { %s2527_s25 = ssub.f32 %s2525_s23, %s2526_s16 }
 0x75d   : > { %s2528_s30 = smax.f32 %s3936_s17, %s2527_s25 }
 0x75e   : > { %s2529_s7 = sadd.f32 1e-16, %s2528_s30 }
 0x760   : > { %v2530_v25 = vstv %s2529_s7 }
 0x761   : > { %3788 = vrsqrt.f32 %v2530_v25 }
 0x76b   : > { %v3789_v28 = vpop.eup %3788 }
 0x76c   : > { %3655 = vpush %v3789_v28 }
 0x76d   : > { %3657 = vpush %v2848_v38 }
 0x76e   : > { %3659 = vpush %v2861_v55 }
 0x79d   : > { %s6197_s8 = spop %3655 }
 0x79e   : > { %v6200_v23 = vstv %s6197_s8  ;;  %s3658_s6 = spop %3657 }
 0x79f   : > { %s6202_s26 = smul.f32 6.1035156e-05, %s3658_s6  ;;  %s3660_s10 = spop %3659  ;;  %v2534_v57 = vmul.f32 %v6207_v46, %v6200_v23  ;;  %v2535_v40 = vmul.f32 %v6214_v45, %v6200_v23  ;;  %v2536_v24 = vmul.f32 %v6223_v17, %v6200_v23  ;;  %v2537_v33 = vmul.f32 %v6230_v18, %v6200_v23 }
 0x7a0   : > { %s2865_s30 = smul.f32 6.1035156e-05, %s3660_s10  ;;  %v2538_v15 = vmul.f32 %v6238_v19, %v6200_v23  ;;  %v2539_v48 = vmul.f32 %v6245_v22, %v6200_v23  ;;  %v2540_v49 = vmul.f32 %v6252_v4, %v6200_v23  ;;  %v2541_v34 = vmul.f32 %v6259_v35, %v6200_v23 }
 0x7a1   : > { %s2866_s7 = smul.f32 %s6202_s26, %s6202_s26  ;;  %2650 = vperm.xlu1 %3767, %v2534_v57   ;;  %2655 = vperm.xlu0 %3768, %v2535_v40   ;;  %v2542_v47 = vmul.f32 %v6268_v50, %v6200_v23  ;;  %v2543_v62 = vmul.f32 %v6275_v1, %v6200_v23  ;;  %v6299_v57 = vld [vmem:[%s6751_s2 + $0x50] sm:$0xff] }
 0x7a3   : > { %s2867_s6 = ssub.f32 %s2865_s30, %s2866_s7 }
 0x7a5   : > { %s2868_s10 = smax.f32 %s3936_s17, %s2867_s6  ;;  %2660 = vperm.xlu1 %3767, %v2536_v24   ;;  %2665 = vperm.xlu0 %3768, %v2537_v33   ;;  %v6308_v33 = vld [vmem:[%s6751_s2 + $0x60] sm:$0xff]  ;;  %s3332_s6 = scalar_lea.sflag [#allocation4], %s4035_s12 }
 0x7a6   : > { %s2869_s30 = sadd.f32 1e-16, %s2868_s10  ;;  %s3943_s10 = smov [#allocation3]  }
 0x7a8   : > { %v2870_v9 = vstv %s2869_s30  ;;  %s2550_s30 = smul.f32 %s6197_s8, %s6192_s11  ;;  %s260_s11 = scalar_lea.vmem [#allocation3], %s3473_s13 }
 0x7a9   : > { %3790 = vrsqrt.f32 %v2870_v9  ;;  %2670 = vperm.xlu1 %3767, %v2538_v15   ;;  %2675 = vperm.xlu0 %3768, %v2539_v48   ;;  %v6316_v48 = vld [vmem:[%s6751_s2 + $0x58] sm:$0xff] }
 0x7aa   : > { %v2551_v29 = vstv %s2550_s30  ;;  %s3836_s30 = sshll.u32 %s3943_s10, 4  ;;  %s3837_s30 = int_to_ptr.vmem [resolvable:$false] %s3836_s30 }
 0x7ab   : > { %v2552_v43 = vmul.f32 %v6207_v46, %v2551_v29  ;;  %v2554_v25 = vmul.f32 %v6223_v17, %v2551_v29  ;;  %v2553_v13 = vmul.f32 %v6214_v45, %v2551_v29  ;;  %v2556_v44 = vmul.f32 %v6238_v19, %v2551_v29  ;;  %s3838_s7 = scalar_lea.vmem %s3837_s30, 2048 }
 0x7ac   : > { %v2555_v6 = vmul.f32 %v6230_v18, %v2551_v29  ;;  %v2558_v7 = vmul.f32 %v6252_v4, %v2551_v29  ;;  %v2557_v28 = vmul.f32 %v6245_v22, %v2551_v29  ;;  %v2560_v38 = vmul.f32 %v6268_v50, %v2551_v29 }
 0x7ad   : > { %2680 = vperm.xlu1 %3767, %v2540_v49   ;;  %2685 = vperm.xlu0 %3768, %v2541_v34   ;;  %v2559_v55 = vmul.f32 %v6259_v35, %v2551_v29  ;;  %v2562_v40 = vmul.f32 %v6299_v57, %v2551_v29  ;;  %v2561_v24 = vmul.f32 %v6275_v1, %v2551_v29  ;;  %v6322_v49 = vld [vmem:[%s6751_s2 + $0x70] sm:$0xff] }
 0x7ae   : > { %v2564_v15 = vmul.f32 %v6308_v33, %v2551_v29  ;;  %v2563_v9 = vmul.f32 %v6316_v48, %v2551_v29  ;;  %v2566_v34 = vmul.f32 %v6322_v49, %v2551_v29 }
 0x7b1   : > { %2690 = vperm.xlu1 %3767, %v2542_v47   ;;  %2695 = vperm.xlu0 %3768, %v2543_v62   ;;  %v6330_v47 = vld [vmem:[%s6751_s2 + $0x68] sm:$0xff] }
 0x7b2   : > { %v2565_v62 = vmul.f32 %v6330_v47, %v2551_v29 }
 0x7b3   : > { %v3791_v42 = vpop.eup %3790 }
 0x7b4   : > { %3661 = vpush %v3791_v42  ;;  %v6337_v42 = vld [vmem:[%s6751_s2 + $0x78] sm:$0xff] }
 0x7b5   : > { %2584 = vrot.lane.b32.xlu1 %v2552_v43, %s3937_s9  ;;  %2588 = vrot.lane.b32.xlu0 %v2554_v25, %s3937_s9  ;;  %v2567_v43 = vmul.f32 %v6337_v42, %v2551_v29 }
 0x7b9   : > { %2586 = vrot.lane.b32.xlu1 %v2553_v13, %s3937_s9  ;;  %2592 = vrot.lane.b32.xlu0 %v2556_v44, %s3937_s9 }
 0x7bd   : > { %2590 = vrot.lane.b32.xlu1 %v2555_v6, %s3937_s9  ;;  %2596 = vrot.lane.b32.xlu0 %v2558_v7, %s3937_s9 }
 0x7c1   : > { %2594 = vrot.lane.b32.xlu1 %v2557_v28, %s3937_s9  ;;  %2600 = vrot.lane.b32.xlu0 %v2560_v38, %s3937_s9 }
 0x7c5   : > { %2598 = vrot.lane.b32.xlu1 %v2559_v55, %s3937_s9  ;;  %2604 = vrot.lane.b32.xlu0 %v2562_v40, %s3937_s9 }
 0x7c9   : > { %2602 = vrot.lane.b32.xlu1 %v2561_v24, %s3937_s9  ;;  %2608 = vrot.lane.b32.xlu0 %v2564_v15, %s3937_s9 }
 0x7cd   : > { %2606 = vrot.lane.b32.xlu1 %v2563_v9, %s3937_s9  ;;  %2612 = vrot.lane.b32.xlu0 %v2566_v34, %s3937_s9 }
 0x7d1   : > { %2610 = vrot.lane.b32.xlu1 %v2565_v62, %s3937_s9 }
 0x7d5   : > { %2614 = vrot.lane.b32.xlu1 %v2567_v43, %s3937_s9 }
 0x7e5   : > { %s3662_s8 = spop %3661 }
 0x7e6   : > { %v6341_v25 = vstv %s3662_s8  ;;  %s2890_s17 = smul.f32 %s3662_s8, %s6202_s26  ;;  %s3350_s8 = sshll.u32 %s260_s11, 4  ;;  %s6656_s8 = int_to_ptr.vmem [resolvable:$true] %s3350_s8 }
 0x7e7   : > { %v2875_v13 = vmul.f32 %v6214_v45, %v6341_v25  ;;  %v2874_v44 = vmul.f32 %v6207_v46, %v6341_v25  ;;  %v2877_v6 = vmul.f32 %v6230_v18, %v6341_v25  ;;  %v2876_v29 = vmul.f32 %v6223_v17, %v6341_v25  ;;  %s3832_s25 = scalar_lea.vmem %s6656_s8, 1024  ;;  %p3839_p2 = scmp.lt.s32.totalorder %s6656_s8, %s3837_s30 }
 0x7e8   : > { %v2879_v7 = vmul.f32 %v6245_v22, %v6341_v25  ;;  %v2878_v28 = vmul.f32 %v6238_v19, %v6341_v25  ;;  %v2881_v38 = vmul.f32 %v6259_v35, %v6341_v25  ;;  %v2880_v55 = vmul.f32 %v6252_v4, %v6341_v25  ;;  %p3833_p13 = scmp.ne.s32.totalorder %s6656_s8, %s3832_s25  ;;  %p3840_p3 = scmp.lt.s32.totalorder %s3838_s7, %s3832_s25 }
 0x7e9   : > { %2995 = vperm.xlu1 %3767, %v2875_v13   ;;  %2990 = vperm.xlu0 %3768, %v2874_v44   ;;  %v2883_v40 = vmul.f32 %v6275_v1, %v6341_v25  ;;  %v2882_v24 = vmul.f32 %v6268_v50, %v6341_v25  ;;  %v6364_v15 = vstv %s2890_s17  ;;  %s6652_s17 = sshll.u32 %s3465_s22, 8 }
 0x7ea   : > { %v2892_v9 = vmul.f32 %v6207_v46, %v6364_v15  ;;  %v2893_v34 = vmul.f32 %v6214_v45, %v6364_v15  ;;  %v2895_v62 = vmul.f32 %v6230_v18, %v6364_v15  ;;  %v2894_v43 = vmul.f32 %v6223_v17, %v6364_v15  ;;  %s6664_s26 = scalar_lea.hbm %s6753_s4, %s6652_s17  ;;  %p3834_p0 = pnand %p3833_p13, %p4016_p6 }
 0x7eb   : > { %v2897_v13 = vmul.f32 %v6245_v22, %v6364_v15  ;;  %v2896_v44 = vmul.f32 %v6238_v19, %v6364_v15  ;;  %p3841_p4 = por %p3840_p3, %p3839_p2 }
 0x7ec   : > { %p3835_p1 = pneg %p3834_p0 }
 0x7ed   : > { %3005 = vperm.xlu1 %3767, %v2877_v6   ;;  %3000 = vperm.xlu0 %3768, %v2876_v29   ;;  %v2899_v6 = vmul.f32 %v6259_v35, %v6364_v15  ;;  %v2898_v29 = vmul.f32 %v6252_v4, %v6364_v15 }
 0x7ee   : > { %p3842_p5 = pnand %p3841_p4, %p3835_p1 }
 0x7f1   : > { %3015 = vperm.xlu1 %3767, %v2879_v7   ;;  %3010 = vperm.xlu0 %3768, %v2878_v28   ;;  %v2901_v7 = vmul.f32 %v6275_v1, %v6364_v15  ;;  %v2900_v28 = vmul.f32 %v6268_v50, %v6364_v15 }
 0x7f5   : > { %3025 = vperm.xlu1 %3767, %v2881_v38   ;;  %3020 = vperm.xlu0 %3768, %v2880_v55   ;;  %v2903_v38 = vmul.f32 %v6316_v48, %v6364_v15  ;;  %v2902_v55 = vmul.f32 %v6299_v57, %v6364_v15 }
 0x7f9   : > { %3035 = vperm.xlu1 %3767, %v2883_v40   ;;  %3030 = vperm.xlu0 %3768, %v2882_v24   ;;  %v2905_v40 = vmul.f32 %v6330_v47, %v6364_v15  ;;  %v2904_v24 = vmul.f32 %v6308_v33, %v6364_v15 }
 0x7fd   : > { %2924 = vrot.lane.b32.xlu1 %v2892_v9, %s3937_s9  ;;  %2926 = vrot.lane.b32.xlu0 %v2893_v34, %s3937_s9  ;;  %v2885_v9 = vmul.f32 %v6316_v48, %v6341_v25  ;;  %v2906_v34 = vmul.f32 %v6322_v49, %v6364_v15 }
 0x801   : > { %2930 = vrot.lane.b32.xlu1 %v2895_v62, %s3937_s9  ;;  %2928 = vrot.lane.b32.xlu0 %v2894_v43, %s3937_s9  ;;  %v2544_v62 = vmul.f32 %v6299_v57, %v6200_v23  ;;  %v2884_v43 = vmul.f32 %v6299_v57, %v6341_v25 }
 0x805   : > { %2934 = vrot.lane.b32.xlu1 %v2897_v13, %s3937_s9  ;;  %2932 = vrot.lane.b32.xlu0 %v2896_v44, %s3937_s9  ;;  %v2887_v13 = vmul.f32 %v6330_v47, %v6341_v25  ;;  %v2545_v44 = vmul.f32 %v6316_v48, %v6200_v23 }
 0x809   : > { %2938 = vrot.lane.b32.xlu1 %v2899_v6, %s3937_s9  ;;  %2936 = vrot.lane.b32.xlu0 %v2898_v29, %s3937_s9 }
 0x80d   : > { %2942 = vrot.lane.b32.xlu1 %v2901_v7, %s3937_s9  ;;  %2940 = vrot.lane.b32.xlu0 %v2900_v28, %s3937_s9  ;;  %v2546_v7 = vmul.f32 %v6308_v33, %v6200_v23  ;;  %v2886_v28 = vmul.f32 %v6308_v33, %v6341_v25 }
 0x811   : > { %2946 = vrot.lane.b32.xlu1 %v2903_v38, %s3937_s9  ;;  %2944 = vrot.lane.b32.xlu0 %v2902_v55, %s3937_s9 }
 0x815   : > { %2950 = vrot.lane.b32.xlu1 %v2905_v40, %s3937_s9  ;;  %2948 = vrot.lane.b32.xlu0 %v2904_v24, %s3937_s9  ;;  %v2889_v40 = vmul.f32 %v6337_v42, %v6341_v25  ;;  %v2547_v24 = vmul.f32 %v6330_v47, %v6200_v23 }
 0x819   : > { %3045 = vperm.xlu1 %3767, %v2885_v9   ;;  %2952 = vrot.lane.b32.xlu0 %v2906_v34, %s3937_s9 }
 0x81d   : > { %2700 = vperm.xlu1 %3767, %v2544_v62   ;;  %3040 = vperm.xlu0 %3768, %v2884_v43   ;;  %v2548_v62 = vmul.f32 %v6322_v49, %v6200_v23  ;;  %v2888_v43 = vmul.f32 %v6322_v49, %v6341_v25 }
 0x820   : > { %v6421_v6 = vpop.permute.xlu1 %2650  ;;  %v6423_v29 = vpop.permute.xlu0 %2655 }
 0x821   : > { %3055 = vperm.xlu1 %3767, %v2887_v13   ;;  %2705 = vperm.xlu0 %3768, %v2545_v44  }
 0x824   : > { %v6429_v38 = vpop.permute.xlu1 %2660  ;;  %v6431_v55 = vpop.permute.xlu0 %2665 }
 0x825   : > { %2710 = vperm.xlu1 %3767, %v2546_v7   ;;  %3050 = vperm.xlu0 %3768, %v2886_v28   ;;  %v2907_v7 = vmul.f32 %v6337_v42, %v6364_v15  ;;  %v2549_v28 = vmul.f32 %v6337_v42, %v6200_v23 }
 0x828   : > { %v6437_v9 = vpop.permute.xlu1 %2670  ;;  %v6439_v34 = vpop.permute.xlu0 %2675 }
 0x829   : > { %3065 = vperm.xlu1 %3767, %v2889_v40   ;;  %2715 = vperm.xlu0 %3768, %v2547_v24   ;;  %v3942_v24 = vmov 5  }
 0x82c   : > { %v6445_v13 = vpop.permute.xlu1 %2680  ;;  %v6447_v44 = vpop.permute.xlu0 %2685 }
 0x82d   : > { %2720 = vperm.xlu1 %3767, %v2548_v62   ;;  %3060 = vperm.xlu0 %3768, %v2888_v43  }
 0x830   : > { %v6453_v40 = vpop.permute.xlu1 %2690  ;;  %v6456_v25 = vpop.permute.xlu0 %2695 }
 0x831   : > { %7161 = vst [vmem:[#allocation66_spill] sm:$0xff] %v6453_v40  ;;  %2954 = vrot.lane.b32.xlu1 %v2907_v7, %s3937_s9  ;;  %2725 = vperm.xlu0 %3768, %v2549_v28   ;;  %s3638_s9 = smul.u32 80, %s4035_s12 }
 0x832   : > { %3769 = vset.pattern.permute.xlu1 %v3942_v24 }
 0x834   : > { %v2585_v21 = vpop.permute.xlu1 %2584  ;;  %v2589_v5 = vpop.permute.xlu0 %2588 }
 0x835   : > { %v2632_v62 = vsub.f32 %v6207_v46, %v2585_v21  ;;  %3770 = vset.pattern.permute.xlu0 %v3942_v24  ;;  %v2634_v23 = vsub.f32 %v6223_v17, %v2589_v5 }
 0x837   : > { %2746 = vperm.xlu1 %3769, %v2632_v62  }
 0x838   : > { %v2587_v43 = vpop.permute.xlu1 %2586  ;;  %v2593_v28 = vpop.permute.xlu0 %2592 }
 0x839   : > { %v2633_v15 = vsub.f32 %v6214_v45, %v2587_v43  ;;  %v2636_v11 = vsub.f32 %v6238_v19, %v2593_v28 }
 0x83b   : > { %2751 = vperm.xlu1 %3769, %v2633_v15  }
 0x83c   : > { %v2591_v51 = vpop.permute.xlu1 %2590  ;;  %v2597_v24 = vpop.permute.xlu0 %2596 }
 0x83d   : > { %v2635_v7 = vsub.f32 %v6230_v18, %v2591_v51  ;;  %v2638_v43 = vsub.f32 %v6252_v4, %v2597_v24 }
 0x83f   : > { %2756 = vperm.xlu1 %3769, %v2634_v23  }
 0x840   : > { %v2595_v31 = vpop.permute.xlu1 %2594  ;;  %v2601_v15 = vpop.permute.xlu0 %2600 }
 0x841   : > { %v2637_v21 = vsub.f32 %v6245_v22, %v2595_v31  ;;  %v2640_v51 = vsub.f32 %v6268_v50, %v2601_v15 }
 0x843   : > { %2761 = vperm.xlu1 %3769, %v2635_v7  }
 0x844   : > { %v2599_v62 = vpop.permute.xlu1 %2598  ;;  %v2605_v7 = vpop.permute.xlu0 %2604 }
 0x845   : > { %v2639_v5 = vsub.f32 %v6259_v35, %v2599_v62  ;;  %v2642_v31 = vsub.f32 %v6299_v57, %v2605_v7 }
 0x847   : > { %2766 = vperm.xlu1 %3769, %v2636_v11  }
 0x848   : > { %v2603_v23 = vpop.permute.xlu1 %2602 }
 0x849   : > { %v2641_v11 = vsub.f32 %v6275_v1, %v2603_v23 }
 0x84b   : > { %2771 = vperm.xlu1 %3769, %v2637_v21   ;;  %v2609_v21 = vpop.permute.xlu0 %2608 }
 0x84c   : > { %v2607_v28 = vpop.permute.xlu1 %2606 }
 0x84d   : > { %v2643_v24 = vsub.f32 %v6316_v48, %v2607_v28 }
 0x84f   : > { %2776 = vperm.xlu1 %3769, %v2638_v43   ;;  %v6470_v62 = vpop.permute.xlu0 %2612 }
 0x850   : > { %v2611_v30 = vpop.permute.xlu1 %2610 }
 0x851   : > { %v2645_v23 = vsub.f32 %v6330_v47, %v2611_v30 }
 0x853   : > { %2781 = vperm.xlu1 %3769, %v2639_v5   ;;  %v2644_v5 = vsub.f32 %v6308_v33, %v2609_v21 }
 0x854   : > { %v6472_v43 = vpop.permute.xlu1 %2614 }
 0x857   : > { %2786 = vperm.xlu1 %3769, %v2640_v51  }
 0x85b   : > { %2791 = vperm.xlu1 %3769, %v2641_v11  }
 0x85f   : > { %2796 = vperm.xlu1 %3769, %v2642_v31  }
 0x863   : > { %2801 = vperm.xlu1 %3769, %v2643_v24  }
 0x867   : > { %2806 = vperm.xlu1 %3769, %v2644_v5  }
 0x868   : > { %v6475_v15 = vpop.permute.xlu1 %2995  ;;  %v6477_v51 = vpop.permute.xlu0 %2990 }
 0x86b   : > { %2811 = vperm.xlu1 %3769, %v2645_v23  }
 0x86c   : > { %v6480_v7 = vpop.permute.xlu1 %3005  ;;  %v6482_v11 = vpop.permute.xlu0 %3000 }
 0x870   : > { %v6484_v28 = vpop.permute.xlu1 %3015  ;;  %v6486_v31 = vpop.permute.xlu0 %3010 }
 0x874   : > { %v6488_v24 = vpop.permute.xlu1 %3025  ;;  %v6490_v8 = vpop.permute.xlu0 %3020 }
 0x878   : > { %v6492_v21 = vpop.permute.xlu1 %3035  ;;  %v6494_v5 = vpop.permute.xlu0 %3030 }
 0x879   : > { %7162 = vst [vmem:[#allocation27_spill] sm:$0xff] %v6494_v5 }
 0x87c   : > { %v2925_v26 = vpop.permute.xlu1 %2924  ;;  %v2927_v3 = vpop.permute.xlu0 %2926 }
 0x87d   : > { %v2972_v30 = vsub.f32 %v6207_v46, %v2925_v26  ;;  %v2973_v23 = vsub.f32 %v6214_v45, %v2927_v3 }
 0x87f   : > { %3086 = vperm.xlu1 %3769, %v2972_v30   ;;  %3091 = vperm.xlu0 %3770, %v2973_v23  }
 0x880   : > { %v2931_v0 = vpop.permute.xlu1 %2930  ;;  %v2929_v20 = vpop.permute.xlu0 %2928 }
 0x881   : > { %v2975_v59 = vsub.f32 %v6230_v18, %v2931_v0  ;;  %v2974_v53 = vsub.f32 %v6223_v17, %v2929_v20 }
 0x883   : > { %3101 = vperm.xlu0 %3770, %v2975_v59   ;;  %3096 = vperm.xlu1 %3769, %v2974_v53  }
 0x884   : > { %v2935_v40 = vpop.permute.xlu1 %2934  ;;  %v2933_v63 = vpop.permute.xlu0 %2932 }
 0x885   : > { %v2977_v5 = vsub.f32 %v6245_v22, %v2935_v40  ;;  %v2976_v27 = vsub.f32 %v6238_v19, %v2933_v63 }
 0x887   : > { %3111 = vperm.xlu0 %3770, %v2977_v5   ;;  %3106 = vperm.xlu1 %3769, %v2976_v27  }
 0x888   : > { %v2939_v26 = vpop.permute.xlu1 %2938  ;;  %v2937_v3 = vpop.permute.xlu0 %2936 }
 0x889   : > { %v2979_v46 = vsub.f32 %v6259_v35, %v2939_v26  ;;  %v2978_v45 = vsub.f32 %v6252_v4, %v2937_v3 }
 0x88b   : > { %3121 = vperm.xlu0 %3770, %v2979_v46   ;;  %3116 = vperm.xlu1 %3769, %v2978_v45  }
 0x88c   : > { %v2943_v0 = vpop.permute.xlu1 %2942  ;;  %v2941_v20 = vpop.permute.xlu0 %2940 }
 0x88d   : > { %v2981_v59 = vsub.f32 %v6275_v1, %v2943_v0  ;;  %v2980_v53 = vsub.f32 %v6268_v50, %v2941_v20 }
 0x88f   : > { %3131 = vperm.xlu0 %3770, %v2981_v59   ;;  %3126 = vperm.xlu1 %3769, %v2980_v53  }
 0x890   : > { %v2947_v17 = vpop.permute.xlu1 %2946  ;;  %v2945_v63 = vpop.permute.xlu0 %2944 }
 0x891   : > { %v2983_v27 = vsub.f32 %v6316_v48, %v2947_v17  ;;  %v2982_v18 = vsub.f32 %v6299_v57, %v2945_v63  ;;  %v2646_v57 = vsub.f32 %v6322_v49, %v6470_v62 }
 0x893   : > { %3141 = vperm.xlu0 %3770, %v2983_v27   ;;  %3136 = vperm.xlu1 %3769, %v2982_v18  }
 0x894   : > { %v2951_v19 = vpop.permute.xlu1 %2950  ;;  %v2949_v22 = vpop.permute.xlu0 %2948 }
 0x895   : > { %v2985_v4 = vsub.f32 %v6330_v47, %v2951_v19  ;;  %v2984_v35 = vsub.f32 %v6308_v33, %v2949_v22  ;;  %v2647_v47 = vsub.f32 %v6337_v42, %v6472_v43 }
 0x897   : > { %3151 = vperm.xlu0 %3770, %v2985_v4   ;;  %3146 = vperm.xlu1 %3769, %v2984_v35  }
 0x898   : > { %v6510_v1 = vpop.permute.xlu1 %3045  ;;  %v2953_v50 = vpop.permute.xlu0 %2952 }
 0x899   : > { %v2986_v40 = vsub.f32 %v6322_v49, %v2953_v50 }
 0x89b   : > { %3156 = vperm.xlu1 %3769, %v2986_v40  }
 0x89c   : > { %v6513_v5 = vpop.permute.xlu1 %2700  ;;  %v6530_v53 = vpop.permute.xlu0 %3040 }
 0x89f   : > { %2816 = vperm.xlu1 %3769, %v2646_v57   ;;  %v2729_v57 = vmul.f32 %v6423_v29, %v5831_v32  ;;  %v3071_v32 = vmul.f32 %v6480_v7, %v5882_v39  ;;  %v7170_v29 = vld [vmem:[#allocation94_spill] sm:$0xff]  ;;  %v3073_v39 = vmul.f32 %v6484_v28, %v5931_v60  ;;  %v3072_v7 = vmul.f32 %v6486_v31, %v5673_v52 }
 0x8a0   : > { %v6517_v48 = vpop.permute.xlu1 %3055  ;;  %v6534_v63 = vpop.permute.xlu0 %2705  ;;  %v3075_v60 = vmul.f32 %v6488_v24, %v5989_v12  ;;  %v3074_v52 = vmul.f32 %v6490_v8, %v5681_v36  ;;  %v3077_v36 = vmul.f32 %v6492_v21, %v6042_v54  ;;  %v7172_v8 = vld [vmem:[#allocation30_spill] sm:$0xff]  ;;  %v7173_v12 = vld [vmem:[#allocation27_spill] sm:$0xff]  ;;  %v7177_v21 = vld [vmem:[#allocation44_spill] sm:$0xff] }
 0x8a1   : > { %v3076_v24 = vmul.f32 %v7173_v12, %v7172_v8 }
 0x8a3   : > { %2821 = vperm.xlu1 %3769, %v2647_v47   ;;  %v3069_v47 = vmul.f32 %v6475_v15, %v5829_v37  ;;  %v3070_v37 = vmul.f32 %v6482_v11, %v7170_v29 }
 0x8a4   : > { %v6521_v33 = vpop.permute.xlu1 %2710  ;;  %v6538_v18 = vpop.permute.xlu0 %3050 }
 0x8a5   : > { %7163 = vst [vmem:[#allocation53_spill] sm:$0xff] %v6521_v33 }
 0x8a8   : > { %v6523_v30 = vpop.permute.xlu1 %3065  ;;  %v6542_v19 = vpop.permute.xlu0 %2715 }
 0x8a9   : > { %7164 = vst [vmem:[#allocation67_spill] sm:$0xff] %v6523_v30 }
 0x8ac   : > { %v6525_v23 = vpop.permute.xlu1 %2720  ;;  %v6546_v4 = vpop.permute.xlu0 %3060 }
 0x8ad   : > { %7165 = vst [vmem:[#allocation32_spill] sm:$0xff] %v6525_v23  ;;  %7166 = vst [vmem:[#allocation54_spill] sm:$0xff] %v6546_v4 }
 0x8b0   : > { %v2955_v26 = vpop.permute.xlu1 %2954  ;;  %v6550_v50 = vpop.permute.xlu0 %2725 }
 0x8b1   : > { %v2987_v3 = vsub.f32 %v6337_v42, %v2955_v26  ;;  %7168 = vst [vmem:[#allocation69_spill] sm:$0xff] %v6550_v50  ;;  %v3068_v26 = vmul.f32 %v6477_v51, %v5563_v14  ;;  %v2731_v50 = vmul.f32 %v6431_v55, %v5884_v56  ;;  %v7171_v14 = vld [vmem:[#allocation26_spill] sm:$0xff]  ;;  %v2733_v56 = vmul.f32 %v6439_v34, %v5933_v61 }
 0x8b2   : > { %v2730_v51 = vmul.f32 %v6429_v38, %v7171_v14  ;;  %v2732_v38 = vmul.f32 %v6437_v9, %v5676_v16  ;;  %v2735_v61 = vmul.f32 %v6447_v44, %v5991_v58  ;;  %v2734_v16 = vmul.f32 %v6445_v13, %v5686_v41  ;;  %v7174_v13 = vld [vmem:[#allocation60_spill] sm:$0xff]  ;;  %v7178_v14 = vld [vmem:[#allocation34_spill] sm:$0xff] }
 0x8b3   : > { %3161 = vperm.xlu0 %3770, %v2987_v3   ;;  %v2728_v3 = vmul.f32 %v6421_v6, %v5654_v10  ;;  %v2737_v58 = vmul.f32 %v6456_v25, %v6044_v2  ;;  %v7176_v25 = vld [vmem:[#allocation63_spill] sm:$0xff] }
 0x8b4   : > { %v7194_v8 = vld [vmem:[#allocation32_spill] sm:$0xff] }
 0x8b6   : > { %v2747_v46 = vpop.permute.xlu1 %2746 }
 0x8ba   : > { %v2752_v45 = vpop.permute.xlu1 %2751 }
 0x8bb   : > { %v2825_v23 = vadd.f32 %v2752_v45, %v2729_v57 }
 0x8be   : > { %v2757_v49 = vpop.permute.xlu1 %2756 }
 0x8bf   : > { %v2826_v55 = vadd.f32 %v2757_v49, %v2730_v51  ;;  %v3078_v51 = vmul.f32 %v6530_v53, %v7178_v14 }
 0x8c2   : > { %v2762_v62 = vpop.permute.xlu1 %2761 }
 0x8c3   : > { %v2827_v6 = vadd.f32 %v2762_v62, %v2731_v50 }
 0x8c6   : > { %v2767_v0 = vpop.permute.xlu1 %2766 }
 0x8c7   : > { %v2828_v34 = vadd.f32 %v2767_v0, %v2732_v38  ;;  %v7175_v0 = vld [vmem:[#allocation66_spill] sm:$0xff] }
 0x8c8   : > { %v7183_v38 = vld [vmem:[#allocation62_spill] sm:$0xff] }
 0x8ca   : > { %v2772_v20 = vpop.permute.xlu1 %2771 }
 0x8ce   : > { %v6528_v59 = vpop.permute.xlu1 %2776 }
 0x8cf   : > { %v2830_v44 = vadd.f32 %v6528_v59, %v2734_v16  ;;  %v2739_v59 = vmul.f32 %v6534_v63, %v7176_v25  ;;  %v7187_v16 = vld [vmem:[#allocation46_spill] sm:$0xff]  ;;  %v3782_v25 = vld [vmem:[%s6752_s3 + $0x18] sm:$0xff]  }
 0x8d2   : > { %v2782_v43 = vpop.permute.xlu1 %2781 }
 0x8d3   : > { %v2831_v31 = vadd.f32 %v2782_v43, %v2735_v61  ;;  %v2736_v43 = vmul.f32 %v7175_v0, %v7174_v13 }
 0x8d6   : > { %v6532_v17 = vpop.permute.xlu1 %2786 }
 0x8d7   : > { %v2832_v54 = vadd.f32 %v6532_v17, %v2736_v43  ;;  %v7180_v17 = vld [vmem:[#allocation64_spill] sm:$0xff] }
 0x8da   : > { %v6536_v27 = vpop.permute.xlu1 %2791 }
 0x8de   : > { %v6540_v42 = vpop.permute.xlu1 %2796 }
 0x8e2   : > { %v6544_v22 = vpop.permute.xlu1 %2801 }
 0x8e6   : > { %v6548_v35 = vpop.permute.xlu1 %2806 }
 0x8e7   : > { %7167 = vst [vmem:[#allocation88_spill] sm:$0xff] %v6548_v35 }
 0x8ea   : > { %v6552_v40 = vpop.permute.xlu1 %2811 }
 0x8eb   : > { %7169 = vst [vmem:[#allocation19_spill] sm:$0xff] %v6552_v40  ;;  %v2824_v40 = vadd.f32 %v2747_v46, %v2728_v3  ;;  %v2833_v3 = vadd.f32 %v6536_v27, %v2737_v58  ;;  %v7192_v58 = vld [vmem:[#allocation54_spill] sm:$0xff] }
 0x8ed   : > { %v3180_v10 = vpack.c.bf16 %v2825_v23, %v2824_v40  ;;  %v2829_v23 = vadd.f32 %v2772_v20, %v2733_v56 }
 0x8ef   : > { %v3184_v9 = vpack.c.bf16 %v2829_v23, %v2828_v34 }
 0x8fe   : > { %v3087_v4 = vpop.permute.xlu1 %3086  ;;  %v3092_v30 = vpop.permute.xlu0 %3091 }
 0x8ff   : > { %v3164_v35 = vadd.f32 %v3087_v4, %v3068_v26  ;;  %v3165_v33 = vadd.f32 %v3092_v30, %v3069_v47  ;;  %v3186_v26 = vpack.c.bf16 %v2831_v31, %v2830_v44 }
 0x901   : > { %v3181_v15 = vpack.c.bf16 %v3165_v33, %v3164_v35  ;;  %v3182_v33 = vpack.c.bf16 %v2827_v6, %v2826_v55  ;;  %v7179_v6 = vld [vmem:[#allocation61_spill] sm:$0xff]  ;;  %v2741_v55 = vmul.f32 %v6542_v19, %v7180_v17 }
 0x902   : > { %v3097_v45 = vpop.permute.xlu1 %3096  ;;  %v3102_v57 = vpop.permute.xlu0 %3101  ;;  %v2738_v27 = vmul.f32 %v6513_v5, %v7179_v6 }
 0x903   : > { %v3166_v4 = vadd.f32 %v3097_v45, %v3070_v37  ;;  %v3167_v30 = vadd.f32 %v3102_v57, %v3071_v32  ;;  %3224 = vmatprep.subr.bf16.mxu0 %v3181_v15  ;;  %v3079_v15 = vmul.f32 %v6510_v1, %v7177_v21  ;;  %v3188_v45 = vpack.c.bf16 %v2833_v3, %v2832_v54  ;;  %v3824_v21 = vld [vmem:[%s4044_s14] sm:$0xff] }
 0x904   : > { %3225 = vmatpush1.bf16.msra.mxu0 %v3180_v10  ;;  %v2835_v57 = vadd.f32 %v6544_v22, %v2739_v59  ;;  %v2834_v1 = vadd.f32 %v6540_v42, %v2738_v27  ;;  %v7184_v22 = vld [vmem:[#allocation53_spill] sm:$0xff]  ;;  %v7186_v42 = vld [vmem:[#allocation88_spill] sm:$0xff]  ;;  %v3826_v27 = vld [vmem:[%s4044_s14 + $0x10] sm:$0xff] }
 0x905   : > { %v3183_v11 = vpack.c.bf16 %v3167_v30, %v3166_v4  ;;  %v3783_v59 = vld [vmem:[%s6752_s3 + $0x20] ss:$0 sps:$4 sm:$0xff]  }
 0x906   : > { %v3107_v46 = vpop.permute.xlu1 %3106  ;;  %v3112_v62 = vpop.permute.xlu0 %3111  ;;  %v3190_v23 = vpack.c.bf16 %v2835_v57, %v2834_v1  ;;  %v3829_v1 = vld [vmem:[%s4044_s14 + $0x28] sm:$0xff] }
 0x907   : > { %v3168_v35 = vadd.f32 %v3107_v46, %v3072_v7  ;;  %v3169_v50 = vadd.f32 %v3112_v62, %v3073_v39  ;;  %3226 = vmatprep.subr.bf16.mxu0 %v3183_v11  ;;  %v7181_v39 = vld [vmem:[#allocation50_spill] sm:$0xff]  ;;  %v7185_v46 = vld [vmem:[#allocation19_spill] sm:$0xff] }
 0x908   : > { %3227 = vmatpush1.bf16.msra.mxu0 %v3182_v33  ;;  %v3081_v53 = vmul.f32 %v6517_v48, %v7181_v39  ;;  %v7182_v7 = vld [vmem:[#allocation38_spill] sm:$0xff]  ;;  %v2740_v33 = vmul.f32 %v7184_v22, %v7183_v38  ;;  %v2837_v62 = vadd.f32 %v7185_v46, %v2741_v55  ;;  %v3831_v38 = vld [vmem:[%s4044_s14 + $0x38] sm:$0xff] }
 0x909   : > { %v3185_v28 = vpack.c.bf16 %v3169_v50, %v3168_v35  ;;  %v3080_v5 = vmul.f32 %v6538_v18, %v7182_v7  ;;  %v3830_v7 = vld [vmem:[%s4044_s14 + $0x30] sm:$0xff] }
 0x90a   : > { %v3117_v49 = vpop.permute.xlu1 %3116  ;;  %v3122_v20 = vpop.permute.xlu0 %3121  ;;  %v2836_v34 = vadd.f32 %v7186_v42, %v2740_v33 }
 0x90b   : > { %v3170_v40 = vadd.f32 %v3117_v49, %v3074_v52  ;;  %v3171_v47 = vadd.f32 %v3122_v20, %v3075_v60  ;;  %3228 = vmatprep.subr.bf16.mxu0 %v3185_v28  ;;  %v7189_v49 = vld [vmem:[#allocation78_spill] sm:$0xff]  ;;  %v7190_v20 = vld [vmem:[#allocation67_spill] sm:$0xff] }
 0x90c   : > { %3229 = vmatpush1.bf16.msra.mxu0 %v3184_v9  ;;  %v3192_v48 = vpack.c.bf16 %v2837_v62, %v2836_v34  ;;  %v7188_v9 = vld [vmem:[#allocation69_spill] sm:$0xff] }
 0x90d   : > { %v3187_v41 = vpack.c.bf16 %v3171_v47, %v3170_v40  ;;  %v2743_v31 = vmul.f32 %v7188_v9, %v7187_v16  ;;  %v3083_v40 = vmul.f32 %v7190_v20, %v7189_v49  ;;  %v7191_v47 = vld [vmem:[#allocation70_spill] sm:$0xff] }
 0x90e   : > { %v3127_v32 = vpop.permute.xlu1 %3126  ;;  %v3132_v29 = vpop.permute.xlu0 %3131  ;;  %v3082_v44 = vmul.f32 %v7192_v58, %v7191_v47 }
 0x90f   : > { %v3172_v37 = vadd.f32 %v3127_v32, %v3076_v24  ;;  %v3173_v2 = vadd.f32 %v3132_v29, %v3077_v36  ;;  %3230 = vmatprep.subr.bf16.mxu0 %v3187_v41  ;;  %v7193_v36 = vld [vmem:[#allocation65_spill] sm:$0xff]  ;;  %v7195_v29 = vmov 0  }
 0x910   : > { %3231 = vmatpush1.bf16.msra.mxu0 %v3186_v26  ;;  %v2742_v12 = vmul.f32 %v7194_v8, %v7193_v36  ;;  %v3779_v32 = vld [vmem:[%s6752_s3] sm:$0xff]  }
 0x911   : > { %v3189_v10 = vpack.c.bf16 %v3173_v2, %v3172_v37  ;;  %v3780_v37 = vld [vmem:[%s6752_s3 + $0x8] sm:$0xff]   ;;  %v3781_v2 = vld [vmem:[%s6752_s3 + $0x10] sm:$0xff]  }
 0x912   : > { %v3137_v4 = vpop.permute.xlu1 %3136  ;;  %v3142_v30 = vpop.permute.xlu0 %3141 }
 0x913   : > { %v3174_v56 = vadd.f32 %v3137_v4, %v3078_v51  ;;  %v3175_v63 = vadd.f32 %v3142_v30, %v3079_v15  ;;  %3232 = vmatprep.subr.bf16.mxu0 %v3189_v10  ;;  %v3825_v51 = vld [vmem:[%s4044_s14 + $0x8] sm:$0xff]  ;;  %v3827_v4 = vld [vmem:[%s4044_s14 + $0x18] sm:$0xff] }
 0x914   : > { %3233 = vmatpush1.bf16.msra.mxu0 %v3188_v45 }
 0x915   : > { %v3191_v11 = vpack.c.bf16 %v3175_v63, %v3174_v56  ;;  %v3828_v63 = vld [vmem:[%s4044_s14 + $0x20] sm:$0xff] }
 0x916   : > { %v3147_v35 = vpop.permute.xlu1 %3146  ;;  %v3152_v50 = vpop.permute.xlu0 %3151 }
 0x917   : > { %v3176_v61 = vadd.f32 %v3147_v35, %v3080_v5  ;;  %v3177_v19 = vadd.f32 %v3152_v50, %v3081_v53  ;;  %3234 = vmatprep.subr.bf16.mxu0 %v3191_v11 }
 0x918   : > { %3235 = vmatpush1.bf16.msra.mxu0 %v3190_v23 }
 0x919   : > { %v3193_v60 = vpack.c.bf16 %v3177_v19, %v3176_v61 }
 0x91a   : > { %v3157_v18 = vpop.permute.xlu1 %3156 }
 0x91b   : > { %3236 = vmatprep.subr.bf16.mxu0 %v3193_v60  ;;  %v3178_v13 = vadd.f32 %v3157_v18, %v3082_v44 }
 0x91c   : > { %3237 = vmatpush1.bf16.msra.mxu0 %v3192_v48 }
 0x91e   : > { %v2817_v52 = vpop.permute.xlu1 %2816 }
 0x91f   : > { %v2838_v43 = vadd.f32 %v2817_v52, %v2742_v12 }
 0x922   : > { %v2822_v28 = vpop.permute.xlu1 %2821 }
 0x923   : > { %v2839_v24 = vadd.f32 %v2822_v28, %v2743_v31 }
 0x925   : > { %v3194_v3 = vpack.c.bf16 %v2839_v24, %v2838_v43 }
 0x932   : > { %v3162_v41 = vpop.permute.xlu0 %3161 }
 0x933   : > { %v3179_v0 = vadd.f32 %v3162_v41, %v3083_v40 }
 0x935   : > { %v3195_v26 = vpack.c.bf16 %v3179_v0, %v3178_v13 }
 0x937   : > { %3238 = vmatprep.subr.bf16.mxu0 %v3195_v26 }
 0x938   : > { %3239 = vmatpush1.bf16.msra.mxu0 %v3194_v3 }
 0x93b   : > { %3257 = vmatmul.mubr.bf16.vlgmr.msra.gmra.mrb[20].mxu0 %v3779_v32 }
 0x93c   : > { %3266 = vmatprep.mubr.bf16.mxu0 %v7195_v29 }
 0x943   : > { %3267 = vmatmul.mubr.bf16.gmra.mrb[24].mxu0 %v3780_v37 }
 0x944   : > { %3276 = vmatprep.mubr.bf16.mxu0 %v7195_v29 }
 0x94b   : > { %3277 = vmatmul.mubr.bf16.gmra.mrb[28].mxu0 %v3781_v2 }
 0x94c   : > { %3286 = vmatprep.mubr.bf16.mxu0 %v7195_v29 }
 0x953   : > { %3287 = vmatmul.mubr.bf16.gmra.mrb[32].mxu0 %v3782_v25 }
 0x954   : > { %3296 = vmatprep.mubr.bf16.mxu0 %v7195_v29 }
 0x95b   : > { %3297 = vmatmul.mubr.bf16.gmra.mrb[36].mxu0 %v3783_v59 }
 0xa0e   : > { %v3258_v54 = vpop.f32.mrb[20].mxu0 }
 0xa0f   : > { %v3305_v15 = vadd.f32 %v3824_v21, %v3258_v54  ;;  %v3260_v14 = vpop.f32.mrb[21].mxu0 }
 0xa10   : > { %v3306_v10 = vadd.f32 %v3825_v51, %v3260_v14  ;;  %v3262_v6 = vpop.f32.mrb[22].mxu0 }
 0xa11   : > { %3313 = vst [vmem:[%s260_s11] sm:$0xff] %v3305_v15  ;;  %v3307_v45 = vadd.f32 %v3826_v27, %v3262_v6  ;;  %v3264_v57 = vpop.f32.mrb[23].mxu0 }
 0xa12   : > { %3314 = vst [vmem:[%s260_s11 + $0x8] sm:$0xff] %v3306_v10  ;;  %v3308_v30 = vadd.f32 %v3827_v4, %v3264_v57 }
 0xa13   : > { %3315 = vst [vmem:[%s260_s11 + $0x10] sm:$0xff] %v3307_v45 }
 0xa14   : > { %3316 = vst [vmem:[%s260_s11 + $0x18] sm:$0xff] %v3308_v30 }
 0xa16   : > { %v3268_v56 = vpop.f32.mrb[24].mxu0 }
 0xa17   : > { %v3309_v17 = vadd.f32 %v3828_v63, %v3268_v56  ;;  %v3270_v55 = vpop.f32.mrb[25].mxu0 }
 0xa18   : > { %v3310_v39 = vadd.f32 %v3829_v1, %v3270_v55  ;;  %v3272_v53 = vpop.f32.mrb[26].mxu0 }
 0xa19   : > { %3317 = vst [vmem:[%s260_s11 + $0x20] sm:$0xff] %v3309_v17  ;;  %v3311_v5 = vadd.f32 %v3830_v7, %v3272_v53  ;;  %v3274_v11 = vpop.f32.mrb[27].mxu0 }
 0xa1a   : > { %3318 = vst [vmem:[%s260_s11 + $0x28] sm:$0xff] %v3310_v39  ;;  %v3312_v22 = vadd.f32 %v3831_v38, %v3274_v11 }
 0xa1b   : > { %3319 = vst [vmem:[%s260_s11 + $0x30] sm:$0xff] %v3311_v5 }
 0xa1c   : > { %3320 = vst [vmem:[%s260_s11 + $0x38] sm:$0xff] %v3312_v22 }
 0xa1d   : > { %3845 = shalt.err (!%p3842_p5)
}
 0xa1e   : > { %s3846_s14 = scalar_lea.hbm %s6664_s26, 1024  ;;  %s3850_s23 = scalar_lea.hbm %s6753_s4, 2048 }
 0xa1f   : > { %p3847_p7 = scmp.ne.s32.totalorder %s6664_s26, %s3846_s14  ;;  %p3851_p12 = scmp.lt.u32.totalorder %s6664_s26, %s6753_s4 }
 0xa20   : > { %p3852_p13 = scmp.lt.u32.totalorder %s3850_s23, %s3846_s14  ;;  %p3854_p1 = scmp.lt.u32.totalorder %s3846_s14, %s6664_s26 }
 0xa21   : > { %p3848_p10 = pnand %p3847_p7, %p4016_p6 }
 0xa22   : > { %p3853_p0 = por %p3852_p13, %p3851_p12 }
 0xa23   : > { %p3849_p11 = pneg %p3848_p10 }
 0xa24   : > { %p3855_p2 = por %p3854_p1, %p3853_p0 }
 0xa26   : > { %p3856_p3 = pnand %p3855_p2, %p3849_p11 }
 0xa28   : > { %3859 = shalt.err (!%p3856_p3)
}
 0xa29   : > { %s3944_s13 = smov 256   ;;  %s3945_s25 = smov 512   ;;  %v3278_v33 = vpop.f32.mrb[28].mxu0 }
 0xa2a   : > { %s3946_s10 = smov 16   ;;  %s267_s30 = scalar_lea.vmem [#allocation5], %s3638_s9  ;;  %v3280_v23 = vpop.f32.mrb[29].mxu0 }
 0xa2b   : > { %3663 = dma.vmem_to_hbm [thread:$0]  (%p4016_p6), %s6656_s8, 1024, %s6664_s26, %s3332_s6, %s3944_s13, %s3945_s25, %s3946_s10   ;;  %v3282_v46 = vpop.f32.mrb[30].mxu0 }
 0xa2c   : > { %3321 = vst [vmem:[%s267_s30] sm:$0xff] %v3278_v33  ;;  %3322 = vst [vmem:[%s267_s30 + $0x8] sm:$0xff] %v3280_v23  ;;  %v3284_v62 = vpop.f32.mrb[31].mxu0  ;;  %s3366_s8 = sshll.u32 %s267_s30, 4  ;;  %s6702_s6 = scalar_lea.hbm %s6754_s5, %s6652_s17  ;;  %s6696_s8 = int_to_ptr.vmem [resolvable:$true] %s3366_s8 }
 0xa2d   : > { %3323 = vst [vmem:[%s267_s30 + $0x10] sm:$0xff] %v3282_v46  ;;  %3324 = vst [vmem:[%s267_s30 + $0x18] sm:$0xff] %v3284_v62  ;;  %v3288_v35 = vpop.f32.mrb[32].mxu0  ;;  %s3337_s7 = scalar_lea.sflag [#allocation6], %s4035_s12  ;;  %s3860_s14 = scalar_lea.vmem %s6696_s8, 1280 }
 0xa2e   : > { %3325 = vst [vmem:[%s267_s30 + $0x20] sm:$0xff] %v3288_v35  ;;  %v3290_v50 = vpop.f32.mrb[33].mxu0  ;;  %p3861_p4 = scmp.ne.s32.totalorder %s6696_s8, %s3860_s14  ;;  %s3947_s15 = smov [#allocation5]  }
 0xa2f   : > { %3326 = vst [vmem:[%s267_s30 + $0x28] sm:$0xff] %v3290_v50  ;;  %v3292_v61 = vpop.f32.mrb[34].mxu0  ;;  %s3864_s16 = sshll.u32 %s3947_s15, 4  ;;  %s3865_s16 = int_to_ptr.vmem [resolvable:$false] %s3864_s16 }
 0xa30   : > { %3327 = vst [vmem:[%s267_s30 + $0x30] sm:$0xff] %v3292_v61  ;;  %v3294_v19 = vpop.f32.mrb[35].mxu0  ;;  %p3862_p5 = pnand %p3861_p4, %p4016_p6  ;;  %s3866_s23 = scalar_lea.vmem %s3865_s16, 2560 }
 0xa31   : > { %3328 = vst [vmem:[%s267_s30 + $0x38] sm:$0xff] %v3294_v19  ;;  %v3298_v42 = vpop.f32.mrb[36].mxu0  ;;  %p3867_p10 = scmp.lt.s32.totalorder %s6696_s8, %s3865_s16  ;;  %p3868_p11 = scmp.lt.s32.totalorder %s3866_s23, %s3860_s14 }
 0xa32   : > { %3329 = vst [vmem:[%s267_s30 + $0x40] sm:$0xff] %v3298_v42  ;;  %v3300_v34 = vpop.f32.mrb[37].mxu0  ;;  %p3863_p7 = pneg %p3862_p5 }
 0xa33   : > { %3330 = vst [vmem:[%s267_s30 + $0x48] sm:$0xff] %v3300_v34  ;;  %v3302_v60 = vpop.f32.mrb[38].mxu0  ;;  %p3869_p12 = por %p3868_p11, %p3867_p10 }
 0xa34   : > { %v3303_v48 = vpop.f32.mrb[39].mxu0 }
 0xa35   : > { %p3870_p13 = pnand %p3869_p12, %p3863_p7 }
 0xa37   : > { %3873 = shalt.err (!%p3870_p13)
}
 0xa38   : > { %s3874_s17 = scalar_lea.hbm %s6702_s6, 1280  ;;  %s3878_s30 = scalar_lea.hbm %s6754_s5, 2560 }
 0xa39   : > { %p3875_p0 = scmp.ne.s32.totalorder %s6702_s6, %s3874_s17  ;;  %p3879_p3 = scmp.lt.u32.totalorder %s6702_s6, %s6754_s5 }
 0xa3a   : > { %p3880_p4 = scmp.lt.u32.totalorder %s3878_s30, %s3874_s17  ;;  %p3882_p7 = scmp.lt.u32.totalorder %s3874_s17, %s6702_s6 }
 0xa3b   : > { %p3876_p1 = pnand %p3875_p0, %p4016_p6 }
 0xa3c   : > { %p3881_p5 = por %p3880_p4, %p3879_p3 }
 0xa3d   : > { %p3877_p2 = pneg %p3876_p1 }
 0xa3e   : > { %p3883_p10 = por %p3882_p7, %p3881_p5 }
 0xa40   : > { %p3884_p11 = pnand %p3883_p10, %p3877_p2 }
 0xa42   : > { %3887 = shalt.err (!%p3884_p11)
}
 0xa43   : > { %3664 = dma.vmem_to_hbm [thread:$0]  (%p4016_p6), %s6696_s8, 1280, %s6702_s6, %s3337_s7, %s3944_s13, %s3945_s25, %s3946_s10  }
 0xa44 PF: > { %s3381_s14 = sand.u32 1, %s3914_s18   ;;  %p3668_p12 = pnand %p3468_p9, %p4020_p8 }
 0xa45   : > { %s3382_s15 = scalar_lea.sflag [#allocation4], %s3381_s14 }
 0xa46   : > { %3905 = dma.done.wait (!%p3668_p12), %s3382_s15, 1024  }
 0xa47   : > { %3907 = vsyncadd (!%p3668_p12), %s3382_s15, 4294966272  ;;  %s3391_s28 = scalar_lea.sflag [#allocation6], %s3381_s14 }
 0xa48   : > { %3909 = dma.done.wait (!%p3668_p12), %s3391_s28, 1280  }
 0xa49   : > { %3911 = vsyncadd (!%p3668_p12), %s3391_s28, 4294966016  ;;  %p19_p6 = scmp.ge.s32.totalorder %s4001_s24, 4   ;;  %s7196_s18 = smov %s3918_s19 }
 0xa4a   : > { %s7197_s19 = smov %s3922_s20  ;;  %s7198_s20 = smov %s4014_s27 }
 0xa4b   : > { %s7199_s21 = smov %s4001_s24  ;;  %21 = sbr.rel (!%p19_p6) target bundleno = 5 (0x5), region = 116 }
 0xa52   :  { %3396 = vsyncpa [#allocation4], 1 }
 0xa53   :  { %3398 = vsyncpa [#allocation4 + $0x1], 1 }
 0xa54   :  { %3399 = vsyncpa [#allocation6], 1 }
 0xa55   :  { %3401 = vsyncpa [#allocation6 + $0x1], 1 }

</bundles_post_ra>
